<compile_context>
chip_gen: v7x
topology: tpu7x:2x2x1
jax: 0.10.0
libtpu: 0.0.40
codegen_flags: <defaults>
</compile_context>

<pallas_src>
import jax
import jax.numpy as jnp
from jax import lax
from jax.experimental import pallas as pl
from jax.experimental.pallas import tpu as pltpu

P_SEQ = 50      # `p` in the PyTorch script (sequence length)
F_OUT = 10      # `f` / output_length
L_PAD = 64      # padded per-frame length (>= P_SEQ + max dilation, mult. of 8)
PAD_ROWS = 8    # zero guard rows above/below the stacked frames (>= max dilation 4)
FC_HID = 128    # fc1 hidden dim padded 100 -> 128 (lane-dense)


# ----------------------------- Pallas kernels -----------------------------

def _conv_stack_kernel(x_ref, w1_ref, b1_ref, w2_ref, b2_ref, w3_ref, b3_ref,
                       o_ref, act_ref):
    # x_ref:   (b_tile*64, Cin)        zero-padded frames stacked along sublanes
    # w*_ref:  (3, Cin_l, Cout_l)      conv taps (k, in, out)
    # b*_ref:  (1, Cout_l)
    # o_ref:   (b_tile*64, 64)         full padded conv3 output slab
    # act_ref: (2*PAD_ROWS + b_tile*64, 128)  persistent VMEM activation frame
    L = x_ref.shape[0]
    cin0 = x_ref.shape[1]
    P0 = PAD_ROWS

    # Only the guard rows need zeroing every step (2 vregs).  In-frame pad
    # rows [50, 64) are zero in the padded input and are re-zeroed after every
    # conv layer by the validity mask, so they never go stale across steps.
    guard = jnp.zeros((P0, act_ref.shape[1]), jnp.float32)
    act_ref[0:P0, :] = guard
    act_ref[P0 + L:P0 + L + P0, :] = guard

    # Single sublane-aligned slab store of the (already padded) input frames.
    act_ref[P0:P0 + L, 0:cin0] = x_ref[...]

    rows = lax.broadcasted_iota(jnp.int32, (L, 1), 0)
    valid = (rows & (L_PAD - 1)) < P_SEQ          # periodic per-frame row mask

    def conv_relu(w_ref, b_ref, d):
        # PyTorch Conv1d(kernel=3, padding=d, dilation=d):
        #   out[t] = w_k0 @ h[t-d] + w_k1 @ h[t] + w_k2 @ h[t+d] + b
        # TODO(synk): on v5e, consider fusing the 3 taps into one K=3*Cin dot
        # (MRF pops + VPU adds); kept as 3 dots here — v6e/v7x are not bound on it.
        cin, cout = w_ref.shape[1], w_ref.shape[2]
        h = act_ref[P0:P0 + L, 0:cin]
        h_m = act_ref[P0 - d:P0 - d + L, 0:cin]   # h[t - d] (zeros outside)
        h_p = act_ref[P0 + d:P0 + d + L, 0:cin]   # h[t + d] (zeros outside)
        out = (jnp.dot(h_m, w_ref[0], preferred_element_type=jnp.float32)
               + jnp.dot(h, w_ref[1], preferred_element_type=jnp.float32)
               + jnp.dot(h_p, w_ref[2], preferred_element_type=jnp.float32)
               + b_ref[...])
        # ReLU + re-zero pad rows so the next layer / next grid step sees zeros.
        out = jnp.where(valid, jnp.maximum(out, 0.0), 0.0)
        act_ref[P0:P0 + L, 0:cout] = out

    conv_relu(w1_ref, b1_ref, 1)
    conv_relu(w2_ref, b2_ref, 2)
    conv_relu(w3_ref, b3_ref, 4)

    # Emit the whole padded slab with one aligned store (no per-frame crop).
    o_ref[...] = act_ref[P0:P0 + L, 0:w3_ref.shape[2]]


def _fc_kernel(h_ref, w1_ref, b1_ref, w2_ref, b2_ref, o_ref):
    # h_ref: (B, 4096) time-major flatten of the padded frame
    # w1_ref: (4096, 128), b1_ref: (1, 128), w2_ref: (128, F_OUT), b2_ref: (1, F_OUT)
    y1 = jnp.dot(h_ref[...], w1_ref[...], preferred_element_type=jnp.float32)
    y1 = jnp.maximum(y1 + b1_ref[...], 0.0)
    o_ref[...] = (jnp.dot(y1, w2_ref[...], preferred_element_type=jnp.float32)
                  + b2_ref[...])


# ------------------------------ wrappers -----------------------------------

def conv_stack(x_rows, w1, b1, w2, b2, w3, b3, *, b_tile):
    rows, cin = x_rows.shape
    n_frames = rows // L_PAD
    c_out = w3.shape[-1]
    max_ch = max(cin, w1.shape[-1], w2.shape[-1], w3.shape[-1])
    L = b_tile * L_PAD

    def wspec(a):
        nd = a.ndim
        return pl.BlockSpec(a.shape, lambda i, _nd=nd: (0,) * _nd)

    return pl.pallas_call(
        _conv_stack_kernel,
        out_shape=jax.ShapeDtypeStruct((rows, c_out), jnp.float32),
        grid=(n_frames // b_tile,),
        in_specs=[
            pl.BlockSpec((L, cin), lambda i: (i, 0)),
            wspec(w1), wspec(b1), wspec(w2), wspec(b2), wspec(w3), wspec(b3),
        ],
        out_specs=pl.BlockSpec((L, c_out), lambda i: (i, 0)),
        scratch_shapes=[pltpu.VMEM((2 * PAD_ROWS + L, max_ch), jnp.float32)],
        compiler_params=pltpu.CompilerParams(dimension_semantics=("parallel",)),
    )(x_rows, w1, b1, w2, b2, w3, b3)


def fc_head(h_flat, w1, b1, w2, b2):
    # Small head: everything fits comfortably in VMEM; pin it there explicitly.
    # TODO(synk): add a grid over B-row blocks (constant index maps for the
    # weights) if the batch ever grows large.
    B = h_flat.shape[0]
    vspec = pl.BlockSpec(memory_space=pltpu.MemorySpace.VMEM)
    return pl.pallas_call(
        _fc_kernel,
        out_shape=jax.ShapeDtypeStruct((B, w2.shape[1]), jnp.float32),
        in_specs=[vspec] * 5,
        out_specs=vspec,
    )(h_flat, w1, b1, w2, b2)


def _pick_b_tile(n_frames):
    # Biggest power-of-two tile dividing the batch, capped so the grid keeps
    # >= 2 steps when possible (both TensorCores on v7x).  VMEM never gates
    # this: even b_tile=16 uses well under 1 MiB of scratch per step.
    cap = n_frames // 2 if n_frames >= 2 else 1
    best = 1
    for t in (2, 4, 8, 16):
        if t <= cap and n_frames % t == 0:
            best = t
    return best


@jax.jit
def timeseries_cnn_forward(x, prepped):
    """x: (B, P_SEQ, C_in) float32 -- same layout the PyTorch module takes."""
    (w1t, b1, w2t, b2, w3t, b3, fw1_tm, fb1, fw2t, fb2) = prepped
    B, _, cin = x.shape
    b_tile = _pick_b_tile(B)

    # One cheap XLA pad (50 -> 64 rows per frame), then a free row-major
    # flatten so the conv kernel can slab-copy straight into its scratch.
    x_pad = jnp.pad(x.astype(jnp.float32),
                    ((0, 0), (0, L_PAD - P_SEQ), (0, 0)))
    x_rows = x_pad.reshape(B * L_PAD, cin)

    h_rows = conv_stack(x_rows, w1t, b1, w2t, b2, w3t, b3,
                        b_tile=b_tile)                      # (B*64, 64)
    h_flat = h_rows.reshape(B, L_PAD * h_rows.shape[-1])    # free -> (B, 4096)
    y = fc_head(h_flat, fw1_tm, fb1, fw2t, fb2)             # (B, F_OUT)
    return y.reshape(B, F_OUT, 1)


# ----------------------- parameter init & one-time prep ---------------------

def init_params(key, input_channels, output_length=F_OUT):
    ks = jax.random.split(key, 10)

    def n(k, shape, scale):
        return scale * jax.random.normal(k, shape, jnp.float32)

    w1 = n(ks[0], (64, input_channels, 3), 0.10); b1 = n(ks[1], (64,), 0.10)
    w2 = n(ks[2], (128, 64, 3), 0.05);            b2 = n(ks[3], (128,), 0.05)
    w3 = n(ks[4], (64, 128, 3), 0.05);            b3 = n(ks[5], (64,), 0.05)
    fw1 = n(ks[6], (100, 64 * P_SEQ), 0.02);      fb1 = n(ks[7], (100,), 0.02)
    fw2 = n(ks[8], (output_length, 100), 0.05);   fb2 = n(ks[9], (output_length,), 0.05)
    return (w1, b1, w2, b2, w3, b3, fw1, fb1, fw2, fb2)


def prepare_params(params):
    """One-time re-layout of PyTorch-style params into kernel-friendly layout."""
    (w1, b1, w2, b2, w3, b3, fw1, fb1, fw2, fb2) = params

    def conv_w(w):                     # (Cout, Cin, 3) -> (3, Cin, Cout)
        return jnp.transpose(w, (2, 1, 0)).astype(jnp.float32)

    c3_out = w3.shape[0]               # 64
    hid = fw1.shape[0]                 # 100
    # fc1 weight (100, 3200), PyTorch column index c*50 + t  ->  time-major
    # (64*64, 128): row index t*64 + c matching the kernel's padded-frame
    # flatten; rows for t in [50, 64) and hidden cols [100, 128) are zero.
    fw1_tc = jnp.transpose(fw1.reshape(hid, c3_out, P_SEQ), (2, 1, 0))  # (50, 64, 100)
    fw1_tc = jnp.pad(fw1_tc, ((0, L_PAD - P_SEQ), (0, 0), (0, FC_HID - hid)))
    fw1_tm = fw1_tc.reshape(L_PAD * c3_out, FC_HID).astype(jnp.float32)  # (4096, 128)

    fb1_p = jnp.pad(fb1, (0, FC_HID - hid)).reshape(1, -1).astype(jnp.float32)
    fw2_p = jnp.pad(fw2.T.astype(jnp.float32), ((0, FC_HID - hid), (0, 0)))  # (128, 10)
    fb2_p = fb2.reshape(1, -1).astype(jnp.float32)

    return (conv_w(w1), b1.reshape(1, -1).astype(jnp.float32),
            conv_w(w2), b2.reshape(1, -1).astype(jnp.float32),
            conv_w(w3), b3.reshape(1, -1).astype(jnp.float32),
            fw1_tm, fb1_p, fw2_p, fb2_p)


# ------------------------- plain-JAX reference ------------------------------

def reference_forward(x, params):
    (w1, b1, w2, b2, w3, b3, fw1, fb1, fw2, fb2) = params
    xc = jnp.transpose(x, (0, 2, 1))  # (B, C, L) like x.permute(0, 2, 1)

    def conv(h, w, b, pad, dil):
        out = lax.conv_general_dilated(
            h, w, window_strides=(1,), padding=((pad, pad),),
            rhs_dilation=(dil,), dimension_numbers=('NCH', 'OIH', 'NCH'))
        return jnp.maximum(out + b[None, :, None], 0.0)

    h = conv(xc, w1, b1, 1, 1)
    h = conv(h, w2, b2, 2, 2)
    h = conv(h, w3, b3, 4, 4)
    flat = h.reshape(h.shape[0], -1)
    y1 = jnp.maximum(flat @ fw1.T + fb1, 0.0)
    y2 = y1 @ fw2.T + fb2
    return y2.reshape(-1, F_OUT, 1)


# --------------------------------- main -------------------------------------

if __name__ == "__main__":
    key = jax.random.PRNGKey(0)
    kx, kp = jax.random.split(key)

    B, C_IN = 2, 8
    x = jax.random.normal(kx, (B, P_SEQ, C_IN), jnp.float32)
    params = init_params(kp, C_IN, output_length=F_OUT)
    prepped = prepare_params(params)      # hoisted: runs once, not per forward

    out = jax.block_until_ready(timeseries_cnn_forward(x, prepped))
    assert out.shape == (B, F_OUT, 1)

    ref = reference_forward(x, params)
    err = float(jnp.max(jnp.abs(out - ref)))
    assert err < 1e-3, f"mismatch vs reference: max abs err = {err}"

    print("KERNEL_OK")
</pallas_src>

<mosaic_0001>
module attributes {stable_mosaic.version = 11 : i64} {
  func.func @_conv_stack_kernel(%arg0: i32, %arg1: memref<64x8xf32, #tpu.memory_space<vmem>>, %arg2: memref<3x8x64xf32, #tpu.memory_space<vmem>>, %arg3: memref<1x64xf32, #tpu.memory_space<vmem>>, %arg4: memref<3x64x128xf32, #tpu.memory_space<vmem>>, %arg5: memref<1x128xf32, #tpu.memory_space<vmem>>, %arg6: memref<3x128x64xf32, #tpu.memory_space<vmem>>, %arg7: memref<1x64xf32, #tpu.memory_space<vmem>>, %arg8: memref<64x64xf32, #tpu.memory_space<vmem>>, %arg9: memref<80x128xf32, #tpu.memory_space<vmem>>) attributes {dimension_semantics = [#tpu.dimension_semantics<parallel>], iteration_bounds = array<i64: 2>, scalar_prefetch = 0 : i64, scratch_operands = 1 : i64, tpu.core_type = #tpu.core_type<tc>, window_params = [{transform_indices = @transform_0, window_bounds = array<i64: 64, 8>}, {pipeline_mode = #tpu.pipeline_mode<synchronous>, transform_indices = @transform_1, window_bounds = array<i64: 3, 8, 64>}, {pipeline_mode = #tpu.pipeline_mode<synchronous>, transform_indices = @transform_2, window_bounds = array<i64: 1, 64>}, {pipeline_mode = #tpu.pipeline_mode<synchronous>, transform_indices = @transform_3, window_bounds = array<i64: 3, 64, 128>}, {pipeline_mode = #tpu.pipeline_mode<synchronous>, transform_indices = @transform_4, window_bounds = array<i64: 1, 128>}, {pipeline_mode = #tpu.pipeline_mode<synchronous>, transform_indices = @transform_5, window_bounds = array<i64: 3, 128, 64>}, {pipeline_mode = #tpu.pipeline_mode<synchronous>, transform_indices = @transform_6, window_bounds = array<i64: 1, 64>}, {transform_indices = @transform_7, window_bounds = array<i64: 64, 64>}]} {
    %cst = arith.constant 0.000000e+00 : f32
    %0 = vector.broadcast %cst : f32 to vector<8x128xf32>
    %c0 = arith.constant 0 : index
    %c0_0 = arith.constant 0 : index
    %1 = vector.load %arg9[%c0, %c0_0] : memref<80x128xf32, #tpu.memory_space<vmem>>, vector<8x128xf32>
    tpu.vector_store %arg9[%c0, %c0_0], %0 {strides = array<i32>} : memref<80x128xf32, #tpu.memory_space<vmem>>, vector<8x128xf32>,
    %c72 = arith.constant 72 : index
    %c0_1 = arith.constant 0 : index
    %2 = vector.load %arg9[%c72, %c0_1] : memref<80x128xf32, #tpu.memory_space<vmem>>, vector<8x128xf32>
    tpu.vector_store %arg9[%c72, %c0_1], %0 {strides = array<i32>} : memref<80x128xf32, #tpu.memory_space<vmem>>, vector<8x128xf32>,
    %c0_2 = arith.constant 0 : index
    %c0_3 = arith.constant 0 : index
    %3 = vector.load %arg1[%c0_2, %c0_3] : memref<64x8xf32, #tpu.memory_space<vmem>>, vector<64x8xf32>
    %c8 = arith.constant 8 : index
    %c0_4 = arith.constant 0 : index
    %4 = vector.load %arg9[%c8, %c0_4] : memref<80x128xf32, #tpu.memory_space<vmem>>, vector<64x8xf32>
    tpu.vector_store %arg9[%c8, %c0_4], %3 {strides = array<i32>} : memref<80x128xf32, #tpu.memory_space<vmem>>, vector<64x8xf32>,
    %5 = tpu.iota {dimensions = array<i32: 0>} : vector<64x1xi32>
    %c63_i32 = arith.constant 63 : i32
    %6 = vector.broadcast %c63_i32 : i32 to vector<64x1xi32>
    %7 = arith.andi %5, %6 : vector<64x1xi32>
    %c50_i32 = arith.constant 50 : i32
    %8 = vector.broadcast %c50_i32 : i32 to vector<64x1xi32>
    %9 = arith.cmpi slt, %7, %8 : vector<64x1xi32>
    %c8_5 = arith.constant 8 : index
    %c0_6 = arith.constant 0 : index
    %10 = vector.load %arg9[%c8_5, %c0_6] : memref<80x128xf32, #tpu.memory_space<vmem>>, vector<64x8xf32>
    %c7 = arith.constant 7 : index
    %c0_7 = arith.constant 0 : index
    %11 = vector.load %arg9[%c7, %c0_7] : memref<80x128xf32, #tpu.memory_space<vmem>>, vector<64x8xf32>
    %c9 = arith.constant 9 : index
    %c0_8 = arith.constant 0 : index
    %12 = vector.load %arg9[%c9, %c0_8] : memref<80x128xf32, #tpu.memory_space<vmem>>, vector<64x8xf32>
    %c0_9 = arith.constant 0 : index
    %c0_10 = arith.constant 0 : index
    %c0_11 = arith.constant 0 : index
    %13 = vector.load %arg2[%c0_9, %c0_10, %c0_11] : memref<3x8x64xf32, #tpu.memory_space<vmem>>, vector<1x8x64xf32>
    %14 = vector.shape_cast %13 : vector<1x8x64xf32> to vector<8x64xf32>
    %cst_12 = arith.constant dense<0.000000e+00> : vector<64x64xf32>
    %15 = tpu.matmul %11, %14, %cst_12 {dimension_numbers = #tpu.dot_dimension_numbers<[1], [0], [0], [1], [0, 0, 1, 1], [], []>} : vector<64x8xf32>, vector<8x64xf32>, vector<64x64xf32> -> vector<64x64xf32>
    %c1 = arith.constant 1 : index
    %c0_13 = arith.constant 0 : index
    %c0_14 = arith.constant 0 : index
    %16 = vector.load %arg2[%c1, %c0_13, %c0_14] : memref<3x8x64xf32, #tpu.memory_space<vmem>>, vector<1x8x64xf32>
    %17 = vector.shape_cast %16 : vector<1x8x64xf32> to vector<8x64xf32>
    %cst_15 = arith.constant dense<0.000000e+00> : vector<64x64xf32>
    %18 = tpu.matmul %10, %17, %cst_15 {dimension_numbers = #tpu.dot_dimension_numbers<[1], [0], [0], [1], [0, 0, 1, 1], [], []>} : vector<64x8xf32>, vector<8x64xf32>, vector<64x64xf32> -> vector<64x64xf32>
    %19 = arith.addf %15, %18 : vector<64x64xf32>
    %c2 = arith.constant 2 : index
    %c0_16 = arith.constant 0 : index
    %c0_17 = arith.constant 0 : index
    %20 = vector.load %arg2[%c2, %c0_16, %c0_17] : memref<3x8x64xf32, #tpu.memory_space<vmem>>, vector<1x8x64xf32>
    %21 = vector.shape_cast %20 : vector<1x8x64xf32> to vector<8x64xf32>
    %cst_18 = arith.constant dense<0.000000e+00> : vector<64x64xf32>
    %22 = tpu.matmul %12, %21, %cst_18 {dimension_numbers = #tpu.dot_dimension_numbers<[1], [0], [0], [1], [0, 0, 1, 1], [], []>} : vector<64x8xf32>, vector<8x64xf32>, vector<64x64xf32> -> vector<64x64xf32>
    %23 = arith.addf %19, %22 : vector<64x64xf32>
    %c0_19 = arith.constant 0 : index
    %c0_20 = arith.constant 0 : index
    %24 = vector.load %arg3[%c0_19, %c0_20] : memref<1x64xf32, #tpu.memory_space<vmem>>, vector<1x64xf32>
    %25 = vector.broadcast %24 : vector<1x64xf32> to vector<64x64xf32>
    %26 = arith.addf %23, %25 : vector<64x64xf32>
    %cst_21 = arith.constant 0.000000e+00 : f32
    %27 = vector.broadcast %cst_21 : f32 to vector<64x64xf32>
    %28 = arith.maximumf %26, %27 : vector<64x64xf32>
    %cst_22 = arith.constant 0.000000e+00 : f32
    %29 = vector.shape_cast %9 : vector<64x1xi1> to vector<64x1xi1>
    %30 = vector.broadcast %29 : vector<64x1xi1> to vector<64x64xi1>
    %31 = vector.broadcast %cst_22 : f32 to vector<64x64xf32>
    %32 = arith.select %30, %28, %31 : vector<64x64xi1>, vector<64x64xf32>
    %c8_23 = arith.constant 8 : index
    %c0_24 = arith.constant 0 : index
    %33 = vector.load %arg9[%c8_23, %c0_24] : memref<80x128xf32, #tpu.memory_space<vmem>>, vector<64x64xf32>
    tpu.vector_store %arg9[%c8_23, %c0_24], %32 {strides = array<i32>} : memref<80x128xf32, #tpu.memory_space<vmem>>, vector<64x64xf32>,
    %c8_25 = arith.constant 8 : index
    %c0_26 = arith.constant 0 : index
    %34 = vector.load %arg9[%c8_25, %c0_26] : memref<80x128xf32, #tpu.memory_space<vmem>>, vector<64x64xf32>
    %c6 = arith.constant 6 : index
    %c0_27 = arith.constant 0 : index
    %35 = vector.load %arg9[%c6, %c0_27] : memref<80x128xf32, #tpu.memory_space<vmem>>, vector<64x64xf32>
    %c10 = arith.constant 10 : index
    %c0_28 = arith.constant 0 : index
    %36 = vector.load %arg9[%c10, %c0_28] : memref<80x128xf32, #tpu.memory_space<vmem>>, vector<64x64xf32>
    %c0_29 = arith.constant 0 : index
    %c0_30 = arith.constant 0 : index
    %c0_31 = arith.constant 0 : index
    %37 = vector.load %arg4[%c0_29, %c0_30, %c0_31] : memref<3x64x128xf32, #tpu.memory_space<vmem>>, vector<1x64x128xf32>
    %38 = vector.shape_cast %37 : vector<1x64x128xf32> to vector<64x128xf32>
    %cst_32 = arith.constant dense<0.000000e+00> : vector<64x128xf32>
    %39 = tpu.matmul %35, %38, %cst_32 {dimension_numbers = #tpu.dot_dimension_numbers<[1], [0], [0], [1], [0, 0, 1, 1], [], []>} : vector<64x64xf32>, vector<64x128xf32>, vector<64x128xf32> -> vector<64x128xf32>
    %c1_33 = arith.constant 1 : index
    %c0_34 = arith.constant 0 : index
    %c0_35 = arith.constant 0 : index
    %40 = vector.load %arg4[%c1_33, %c0_34, %c0_35] : memref<3x64x128xf32, #tpu.memory_space<vmem>>, vector<1x64x128xf32>
    %41 = vector.shape_cast %40 : vector<1x64x128xf32> to vector<64x128xf32>
    %cst_36 = arith.constant dense<0.000000e+00> : vector<64x128xf32>
    %42 = tpu.matmul %34, %41, %cst_36 {dimension_numbers = #tpu.dot_dimension_numbers<[1], [0], [0], [1], [0, 0, 1, 1], [], []>} : vector<64x64xf32>, vector<64x128xf32>, vector<64x128xf32> -> vector<64x128xf32>
    %43 = arith.addf %39, %42 : vector<64x128xf32>
    %c2_37 = arith.constant 2 : index
    %c0_38 = arith.constant 0 : index
    %c0_39 = arith.constant 0 : index
    %44 = vector.load %arg4[%c2_37, %c0_38, %c0_39] : memref<3x64x128xf32, #tpu.memory_space<vmem>>, vector<1x64x128xf32>
    %45 = vector.shape_cast %44 : vector<1x64x128xf32> to vector<64x128xf32>
    %cst_40 = arith.constant dense<0.000000e+00> : vector<64x128xf32>
    %46 = tpu.matmul %36, %45, %cst_40 {dimension_numbers = #tpu.dot_dimension_numbers<[1], [0], [0], [1], [0, 0, 1, 1], [], []>} : vector<64x64xf32>, vector<64x128xf32>, vector<64x128xf32> -> vector<64x128xf32>
    %47 = arith.addf %43, %46 : vector<64x128xf32>
    %c0_41 = arith.constant 0 : index
    %c0_42 = arith.constant 0 : index
    %48 = vector.load %arg5[%c0_41, %c0_42] : memref<1x128xf32, #tpu.memory_space<vmem>>, vector<1x128xf32>
    %49 = vector.broadcast %48 : vector<1x128xf32> to vector<64x128xf32>
    %50 = arith.addf %47, %49 : vector<64x128xf32>
    %cst_43 = arith.constant 0.000000e+00 : f32
    %51 = vector.broadcast %cst_43 : f32 to vector<64x128xf32>
    %52 = arith.maximumf %50, %51 : vector<64x128xf32>
    %cst_44 = arith.constant 0.000000e+00 : f32
    %53 = vector.shape_cast %9 : vector<64x1xi1> to vector<64x1xi1>
    %54 = vector.broadcast %53 : vector<64x1xi1> to vector<64x128xi1>
    %55 = vector.broadcast %cst_44 : f32 to vector<64x128xf32>
    %56 = arith.select %54, %52, %55 : vector<64x128xi1>, vector<64x128xf32>
    %c8_45 = arith.constant 8 : index
    %c0_46 = arith.constant 0 : index
    %57 = vector.load %arg9[%c8_45, %c0_46] : memref<80x128xf32, #tpu.memory_space<vmem>>, vector<64x128xf32>
    tpu.vector_store %arg9[%c8_45, %c0_46], %56 {strides = array<i32>} : memref<80x128xf32, #tpu.memory_space<vmem>>, vector<64x128xf32>,
    %c8_47 = arith.constant 8 : index
    %c0_48 = arith.constant 0 : index
    %58 = vector.load %arg9[%c8_47, %c0_48] : memref<80x128xf32, #tpu.memory_space<vmem>>, vector<64x128xf32>
    %c4 = arith.constant 4 : index
    %c0_49 = arith.constant 0 : index
    %59 = vector.load %arg9[%c4, %c0_49] : memref<80x128xf32, #tpu.memory_space<vmem>>, vector<64x128xf32>
    %c12 = arith.constant 12 : index
    %c0_50 = arith.constant 0 : index
    %60 = vector.load %arg9[%c12, %c0_50] : memref<80x128xf32, #tpu.memory_space<vmem>>, vector<64x128xf32>
    %c0_51 = arith.constant 0 : index
    %c0_52 = arith.constant 0 : index
    %c0_53 = arith.constant 0 : index
    %61 = vector.load %arg6[%c0_51, %c0_52, %c0_53] : memref<3x128x64xf32, #tpu.memory_space<vmem>>, vector<1x128x64xf32>
    %62 = vector.shape_cast %61 : vector<1x128x64xf32> to vector<128x64xf32>
    %cst_54 = arith.constant dense<0.000000e+00> : vector<64x64xf32>
    %63 = tpu.matmul %59, %62, %cst_54 {dimension_numbers = #tpu.dot_dimension_numbers<[1], [0], [0], [1], [0, 0, 1, 1], [], []>} : vector<64x128xf32>, vector<128x64xf32>, vector<64x64xf32> -> vector<64x64xf32>
    %c1_55 = arith.constant 1 : index
    %c0_56 = arith.constant 0 : index
    %c0_57 = arith.constant 0 : index
    %64 = vector.load %arg6[%c1_55, %c0_56, %c0_57] : memref<3x128x64xf32, #tpu.memory_space<vmem>>, vector<1x128x64xf32>
    %65 = vector.shape_cast %64 : vector<1x128x64xf32> to vector<128x64xf32>
    %cst_58 = arith.constant dense<0.000000e+00> : vector<64x64xf32>
    %66 = tpu.matmul %58, %65, %cst_58 {dimension_numbers = #tpu.dot_dimension_numbers<[1], [0], [0], [1], [0, 0, 1, 1], [], []>} : vector<64x128xf32>, vector<128x64xf32>, vector<64x64xf32> -> vector<64x64xf32>
    %67 = arith.addf %63, %66 : vector<64x64xf32>
    %c2_59 = arith.constant 2 : index
    %c0_60 = arith.constant 0 : index
    %c0_61 = arith.constant 0 : index
    %68 = vector.load %arg6[%c2_59, %c0_60, %c0_61] : memref<3x128x64xf32, #tpu.memory_space<vmem>>, vector<1x128x64xf32>
    %69 = vector.shape_cast %68 : vector<1x128x64xf32> to vector<128x64xf32>
    %cst_62 = arith.constant dense<0.000000e+00> : vector<64x64xf32>
    %70 = tpu.matmul %60, %69, %cst_62 {dimension_numbers = #tpu.dot_dimension_numbers<[1], [0], [0], [1], [0, 0, 1, 1], [], []>} : vector<64x128xf32>, vector<128x64xf32>, vector<64x64xf32> -> vector<64x64xf32>
    %71 = arith.addf %67, %70 : vector<64x64xf32>
    %c0_63 = arith.constant 0 : index
    %c0_64 = arith.constant 0 : index
    %72 = vector.load %arg7[%c0_63, %c0_64] : memref<1x64xf32, #tpu.memory_space<vmem>>, vector<1x64xf32>
    %73 = vector.broadcast %72 : vector<1x64xf32> to vector<64x64xf32>
    %74 = arith.addf %71, %73 : vector<64x64xf32>
    %cst_65 = arith.constant 0.000000e+00 : f32
    %75 = vector.broadcast %cst_65 : f32 to vector<64x64xf32>
    %76 = arith.maximumf %74, %75 : vector<64x64xf32>
    %cst_66 = arith.constant 0.000000e+00 : f32
    %77 = vector.shape_cast %9 : vector<64x1xi1> to vector<64x1xi1>
    %78 = vector.broadcast %77 : vector<64x1xi1> to vector<64x64xi1>
    %79 = vector.broadcast %cst_66 : f32 to vector<64x64xf32>
    %80 = arith.select %78, %76, %79 : vector<64x64xi1>, vector<64x64xf32>
    %c8_67 = arith.constant 8 : index
    %c0_68 = arith.constant 0 : index
    %81 = vector.load %arg9[%c8_67, %c0_68] : memref<80x128xf32, #tpu.memory_space<vmem>>, vector<64x64xf32>
    tpu.vector_store %arg9[%c8_67, %c0_68], %80 {strides = array<i32>} : memref<80x128xf32, #tpu.memory_space<vmem>>, vector<64x64xf32>,
    %c8_69 = arith.constant 8 : index
    %c0_70 = arith.constant 0 : index
    %82 = vector.load %arg9[%c8_69, %c0_70] : memref<80x128xf32, #tpu.memory_space<vmem>>, vector<64x64xf32>
    %c0_71 = arith.constant 0 : index
    %c0_72 = arith.constant 0 : index
    %83 = vector.load %arg8[%c0_71, %c0_72] : memref<64x64xf32, #tpu.memory_space<vmem>>, vector<64x64xf32>
    tpu.vector_store %arg8[%c0_71, %c0_72], %82 {strides = array<i32>} : memref<64x64xf32, #tpu.memory_space<vmem>>, vector<64x64xf32>,
    return
  }
  func.func @transform_0(%arg0: i32) -> (i32, i32) {
    %c0_i32 = arith.constant 0 : i32
    %c0_i32_0 = arith.constant 0 : i32
    return %arg0, %c0_i32 : i32, i32
  }
  func.func @transform_1(%arg0: i32) -> (i32, i32, i32) {
    %c0_i32 = arith.constant 0 : i32
    %c0_i32_0 = arith.constant 0 : i32
    %c0_i32_1 = arith.constant 0 : i32
    %c0_i32_2 = arith.constant 0 : i32
    return %c0_i32, %c0_i32_0, %c0_i32_1 : i32, i32, i32
  }
  func.func @transform_2(%arg0: i32) -> (i32, i32) {
    %c0_i32 = arith.constant 0 : i32
    %c0_i32_0 = arith.constant 0 : i32
    %c0_i32_1 = arith.constant 0 : i32
    return %c0_i32, %c0_i32_0 : i32, i32
  }
  func.func @transform_3(%arg0: i32) -> (i32, i32, i32) {
    %c0_i32 = arith.constant 0 : i32
    %c0_i32_0 = arith.constant 0 : i32
    %c0_i32_1 = arith.constant 0 : i32
    %c0_i32_2 = arith.constant 0 : i32
    return %c0_i32, %c0_i32_0, %c0_i32_1 : i32, i32, i32
  }
  func.func @transform_4(%arg0: i32) -> (i32, i32) {
    %c0_i32 = arith.constant 0 : i32
    %c0_i32_0 = arith.constant 0 : i32
    %c0_i32_1 = arith.constant 0 : i32
    return %c0_i32, %c0_i32_0 : i32, i32
  }
  func.func @transform_5(%arg0: i32) -> (i32, i32, i32) {
    %c0_i32 = arith.constant 0 : i32
    %c0_i32_0 = arith.constant 0 : i32
    %c0_i32_1 = arith.constant 0 : i32
    %c0_i32_2 = arith.constant 0 : i32
    return %c0_i32, %c0_i32_0, %c0_i32_1 : i32, i32, i32
  }
  func.func @transform_6(%arg0: i32) -> (i32, i32) {
    %c0_i32 = arith.constant 0 : i32
    %c0_i32_0 = arith.constant 0 : i32
    %c0_i32_1 = arith.constant 0 : i32
    return %c0_i32, %c0_i32_0 : i32, i32
  }
  func.func @transform_7(%arg0: i32) -> (i32, i32) {
    %c0_i32 = arith.constant 0 : i32
    %c0_i32_0 = arith.constant 0 : i32
    return %arg0, %c0_i32 : i32, i32
  }
}

module attributes {stable_mosaic.version = 11 : i64} {
  func.func @_fc_kernel(%arg0: memref<2x4096xf32, #tpu.memory_space<vmem>>, %arg1: memref<4096x128xf32, #tpu.memory_space<vmem>>, %arg2: memref<1x128xf32, #tpu.memory_space<vmem>>, %arg3: memref<128x10xf32, #tpu.memory_space<vmem>>, %arg4: memref<1x10xf32, #tpu.memory_space<vmem>>, %arg5: memref<2x10xf32, #tpu.memory_space<vmem>>) attributes {dimension_semantics = [], scalar_prefetch = 0 : i64, scratch_operands = 0 : i64, tpu.core_type = #tpu.core_type<tc>} {
    %c0 = arith.constant 0 : index
    %c0_0 = arith.constant 0 : index
    %0 = vector.load %arg0[%c0, %c0_0] : memref<2x4096xf32, #tpu.memory_space<vmem>>, vector<2x4096xf32>
    %c0_1 = arith.constant 0 : index
    %c0_2 = arith.constant 0 : index
    %1 = vector.load %arg1[%c0_1, %c0_2] : memref<4096x128xf32, #tpu.memory_space<vmem>>, vector<4096x128xf32>
    %cst = arith.constant dense<0.000000e+00> : vector<2x128xf32>
    %2 = tpu.matmul %0, %1, %cst {dimension_numbers = #tpu.dot_dimension_numbers<[1], [0], [0], [1], [0, 0, 1, 1], [], []>} : vector<2x4096xf32>, vector<4096x128xf32>, vector<2x128xf32> -> vector<2x128xf32>
    %c0_3 = arith.constant 0 : index
    %c0_4 = arith.constant 0 : index
    %3 = vector.load %arg2[%c0_3, %c0_4] : memref<1x128xf32, #tpu.memory_space<vmem>>, vector<1x128xf32>
    %4 = vector.broadcast %3 : vector<1x128xf32> to vector<2x128xf32>
    %5 = arith.addf %2, %4 : vector<2x128xf32>
    %cst_5 = arith.constant 0.000000e+00 : f32
    %6 = vector.broadcast %cst_5 : f32 to vector<2x128xf32>
    %7 = arith.maximumf %5, %6 : vector<2x128xf32>
    %c0_6 = arith.constant 0 : index
    %c0_7 = arith.constant 0 : index
    %8 = vector.load %arg3[%c0_6, %c0_7] : memref<128x10xf32, #tpu.memory_space<vmem>>, vector<128x10xf32>
    %cst_8 = arith.constant dense<0.000000e+00> : vector<2x10xf32>
    %9 = tpu.matmul %7, %8, %cst_8 {dimension_numbers = #tpu.dot_dimension_numbers<[1], [0], [0], [1], [0, 0, 1, 1], [], []>} : vector<2x128xf32>, vector<128x10xf32>, vector<2x10xf32> -> vector<2x10xf32>
    %c0_9 = arith.constant 0 : index
    %c0_10 = arith.constant 0 : index
    %10 = vector.load %arg4[%c0_9, %c0_10] : memref<1x10xf32, #tpu.memory_space<vmem>>, vector<1x10xf32>
    %11 = vector.broadcast %10 : vector<1x10xf32> to vector<2x10xf32>
    %12 = arith.addf %9, %11 : vector<2x10xf32>
    %c0_11 = arith.constant 0 : index
    %c0_12 = arith.constant 0 : index
    %13 = vector.load %arg5[%c0_11, %c0_12] : memref<2x10xf32, #tpu.memory_space<vmem>>, vector<2x10xf32>
    tpu.vector_store %arg5[%c0_11, %c0_12], %12 {strides = array<i32>} : memref<2x10xf32, #tpu.memory_space<vmem>>, vector<2x10xf32>,
    return
  }
}

</mosaic_0001>

<bundles_post_ra>
// kernel: timeseries_cnn_forward.2
= control target key start
LH: loop header
LB: loop body
LE: loop exit
PB: predicated region body
PF: predicated region fallthrough
CT: control target
= control target key end

     0   :  { %12 = vsyncpa [#allocation4], 0  ;;  %s3300_s0 = inlined_call_operand.vmem [shape: f32[128,8], index: 0, kind: input, shape index: {}]   ;;  %s3301_s1 = inlined_call_operand.hbm [shape: f32[3,8,64], index: 1, kind: input, shape index: {}]   ;;  %s3302_s2 = inlined_call_operand.hbm [shape: f32[1,64], index: 2, kind: input, shape index: {}]   ;;  %s3303_s3 = inlined_call_operand.hbm [shape: f32[3,64,128], index: 3, kind: input, shape index: {}]   ;;  %s3304_s4 = inlined_call_operand.hbm [shape: f32[1,128], index: 4, kind: input, shape index: {}]   ;;  %s3305_s5 = inlined_call_operand.vmem [shape: f32[3,128,64], index: 5, kind: input, shape index: {}]   ;;  %s3306_s6 = inlined_call_operand.hbm [shape: f32[1,64], index: 6, kind: input, shape index: {}]   ;;  %s3307_s7 = inlined_call_operand.vmem [shape: f32[128,64], index: 7, kind: output, shape index: {}]  }
   0x1   :  { %13 = vsyncpa [#allocation6], 0 }
   0x2   :  { %14 = vsyncpa [#allocation9], 0  ;;  %s2868_s24 = smov 0  }
   0x3 LB: > { %s2820_s25 = smov [#allocation5]   ;;  %s1908_s27 = sadd.s32 4294967295, %s2818_s24   ;;  %s2818_s24 = sphi %s2868_s24, %s20_s24  }
   0x4   : > { %s229_s26 = sshll.u32 %s2820_s25, 4  ;;  %p1910_p0 = scmp.ge.s32.totalorder %s2818_s24, 1  ;;  %s2882_s26 = int_to_ptr.vmem [resolvable:$true] %s229_s26 }
   0x5   : > { %p203_p1 = scmp.lt.s32.totalorder %s2818_s24, 3  ;;  %p2878_p2 = scmp.eq.s32.totalorder %s1908_s27, 0 }
   0x6   : > { %s2821_s30 = smov [#allocation8]   ;;  %s2822_s9 = smov [#allocation3]  }
   0x7   : > { %s3311_s28 = scalar_select %p2878_p2, 1, 0 }
   0x8   : > { %p2884_p3 = pnand %p1910_p0, %p203_p1  ;;  %s253_s8 = sshll.u32 %s2821_s30, 4  ;;  %s2890_s8 = int_to_ptr.vmem [resolvable:$true] %s253_s8 }
   0x9   : > { %s215_s10 = sshll.u32 %s2822_s9, 4  ;;  %s2823_s12 = smov [#allocation7]   ;;  %s2898_s10 = int_to_ptr.vmem [resolvable:$true] %s215_s10 }
   0xa   : > { %s3312_s29 = scalar_select %p2884_p3, 1, 0 }
   0xb   : > { %p2617_p4 = pneg %p2884_p3  ;;  %s2900_s13 = sshll.u32 %s2823_s12, 4  ;;  %s240_s13 = int_to_ptr.vmem [resolvable:$true] %s2900_s13 }
   0xc   : > { %s2660_s16 = scalar_lea.hbm %s3302_s2, 16 }
   0xd   : > { %p2894_p5 = pnand %p2878_p2, %p2617_p4  ;;  %p2661_p6 = scmp.ne.s32.totalorder %s3302_s2, %s2660_s16 }
   0xe   : > { %p2667_p10 = scmp.lt.u32.totalorder %s2660_s16, %s3302_s2 }
   0xf   : > { %p2910_p7 = pneg %p2894_p5 }
  0x11   : > { %p2663_p8 = pnand %p2910_p7, %p2661_p6 }
  0x13   : > { %p2664_p9 = pneg %p2663_p8 }
  0x15   : > { %p2669_p11 = pnand %p2667_p10, %p2664_p9 }
  0x17   : > { %2672 = shalt.err (!%p2669_p11)
}
  0x18   : > { %s2673_s22 = scalar_lea.vmem %s2882_s26, 16  ;;  %s2680_s23 = scalar_lea.vmem %s2882_s26, 32 }
  0x19   : > { %p2674_p12 = scmp.ne.s32.totalorder %s2882_s26, %s2673_s22  ;;  %p2681_p1 = scmp.lt.s32.totalorder %s2882_s26, %s2882_s26 }
  0x1a   : > { %p2682_p4 = scmp.lt.s32.totalorder %s2680_s23, %s2673_s22 }
  0x1b   : > { %p2676_p13 = pnand %p2674_p12, %p2910_p7 }
  0x1c   : > { %p2683_p6 = por %p2682_p4, %p2681_p1 }
  0x1d   : > { %p2677_p0 = pneg %p2676_p13 }
  0x1f   : > { %p2684_p8 = pnand %p2683_p6, %p2677_p0 }
  0x21   : > { %2687 = shalt.err (!%p2684_p8)
}
  0x22   : > { %2623 = dma.hbm_to_vmem [thread:$0]  (!%p2894_p5), %s3302_s2, 16, %s2882_s26, [#allocation6]  }
  0x23   : > { %s2688_s14 = scalar_lea.hbm %s3304_s4, 16 }
  0x24   : > { %p2689_p9 = scmp.ne.s32.totalorder %s3304_s4, %s2688_s14  ;;  %p2695_p12 = scmp.lt.u32.totalorder %s2688_s14, %s3304_s4 }
  0x26   : > { %p2691_p10 = pnand %p2689_p9, %p2910_p7 }
  0x28   : > { %p2692_p11 = pneg %p2691_p10 }
  0x2a   : > { %p2697_p13 = pnand %p2695_p12, %p2692_p11 }
  0x2c   : > { %2700 = shalt.err (!%p2697_p13)
}
  0x2d   : > { %s2701_s26 = scalar_lea.vmem %s2890_s8, 16  ;;  %s2708_s20 = scalar_lea.vmem %s2890_s8, 32 }
  0x2e   : > { %p2702_p0 = scmp.ne.s32.totalorder %s2890_s8, %s2701_s26  ;;  %p2709_p6 = scmp.lt.s32.totalorder %s2890_s8, %s2890_s8 }
  0x2f   : > { %p2710_p8 = scmp.lt.s32.totalorder %s2708_s20, %s2701_s26 }
  0x30   : > { %p2704_p1 = pnand %p2702_p0, %p2910_p7 }
  0x31   : > { %p2711_p9 = por %p2710_p8, %p2709_p6 }
  0x32   : > { %p2705_p4 = pneg %p2704_p1 }
  0x34   : > { %p2712_p10 = pnand %p2711_p9, %p2705_p4 }
  0x36   : > { %2715 = shalt.err (!%p2712_p10)
}
  0x37   : > { %2629 = dma.hbm_to_vmem [thread:$0]  (!%p2894_p5), %s3304_s4, 16, %s2890_s8, [#allocation9]  }
  0x38   : > { %s2716_s30 = scalar_lea.hbm %s3301_s1, 384 }
  0x39   : > { %p2717_p11 = scmp.ne.s32.totalorder %s3301_s1, %s2716_s30  ;;  %p2723_p0 = scmp.lt.u32.totalorder %s2716_s30, %s3301_s1 }
  0x3b   : > { %p2719_p12 = pnand %p2717_p11, %p2910_p7 }
  0x3d   : > { %p2720_p13 = pneg %p2719_p12 }
  0x3f   : > { %p2725_p1 = pnand %p2723_p0, %p2720_p13 }
  0x41   : > { %2728 = shalt.err (!%p2725_p1)
}
  0x42   : > { %s2729_s8 = scalar_lea.vmem %s2898_s10, 384  ;;  %p2737_p9 = scmp.lt.s32.totalorder %s2898_s10, %s2898_s10 }
  0x43   : > { %p2730_p4 = scmp.ne.s32.totalorder %s2898_s10, %s2729_s8  ;;  %p2738_p10 = scmp.lt.s32.totalorder %s2729_s8, %s2729_s8 }
  0x45   : > { %p2732_p6 = pnand %p2730_p4, %p2910_p7  ;;  %p2739_p11 = por %p2738_p10, %p2737_p9 }
  0x47   : > { %p2733_p8 = pneg %p2732_p6 }
  0x49   : > { %p2740_p12 = pnand %p2739_p11, %p2733_p8 }
  0x4b   : > { %2743 = shalt.err (!%p2740_p12)
}
  0x4c   : > { %s2824_s16 = smov 128   ;;  %s2825_s17 = smov 8  }
  0x4d   : > { %2620 = dma.hbm_to_vmem [thread:$0]  (!%p2894_p5), %s3301_s1, 384, %s2898_s10, [#allocation4], %s2824_s16, %s2824_s16, %s2825_s17  }
  0x4e   : > { %s2744_s22 = scalar_lea.hbm %s3303_s3, 3072 }
  0x4f   : > { %p2745_p13 = scmp.ne.s32.totalorder %s3303_s3, %s2744_s22  ;;  %p2751_p4 = scmp.lt.u32.totalorder %s2744_s22, %s3303_s3 }
  0x51   : > { %p2747_p0 = pnand %p2745_p13, %p2910_p7 }
  0x53   : > { %p2748_p1 = pneg %p2747_p0 }
  0x55   : > { %p2753_p6 = pnand %p2751_p4, %p2748_p1 }
  0x57   : > { %2756 = shalt.err (!%p2753_p6)
}
  0x58   : > { %s2757_s12 = scalar_lea.vmem %s240_s13, 3072  ;;  %p2765_p11 = scmp.lt.s32.totalorder %s240_s13, %s240_s13 }
  0x59   : > { %p2758_p8 = scmp.ne.s32.totalorder %s240_s13, %s2757_s12  ;;  %p2766_p12 = scmp.lt.s32.totalorder %s2757_s12, %s2757_s12 }
  0x5b   : > { %p2760_p9 = pnand %p2758_p8, %p2910_p7  ;;  %p2767_p2 = por %p2766_p12, %p2765_p11 }
  0x5d   : > { %p2761_p10 = pneg %p2760_p9 }
  0x5f   : > { %p2768_p3 = pnand %p2767_p2, %p2761_p10 }
  0x61   : > { %2771 = shalt.err (!%p2768_p3)
}
  0x62   : > { %2626 = dma.hbm_to_vmem [thread:$0]  (!%p2894_p5), %s3303_s3, 3072, %s240_s13, [#allocation6], %s2824_s16, %s2824_s16, %s2825_s17  }
  0x63   : > { %s2826_s15 = smov [#allocation10]   ;;  %s2772_s20 = scalar_lea.hbm %s3306_s6, 16 }
  0x64   : > { %s267_s8 = sshll.u32 %s2826_s15, 4  ;;  %p2773_p13 = scmp.ne.s32.totalorder %s3306_s6, %s2772_s20  ;;  %s268_s8 = int_to_ptr.vmem [resolvable:$true] %s267_s8 }
  0x65   : > { %p2779_p0 = scmp.lt.u32.totalorder %s2772_s20, %s3306_s6 }
  0x66   : > { %p2775_p2 = pnand %p2773_p13, %p2910_p7 }
  0x68   : > { %p2776_p3 = pneg %p2775_p2 }
  0x6a   : > { %p2781_p1 = pnand %p2779_p0, %p2776_p3 }
  0x6c   : > { %2784 = shalt.err (!%p2781_p1)
}
  0x6d   : > { %s2785_s13 = scalar_lea.vmem %s268_s8, 16  ;;  %s2792_s16 = scalar_lea.vmem %s268_s8, 32 }
  0x6e   : > { %p2786_p4 = scmp.ne.s32.totalorder %s268_s8, %s2785_s13  ;;  %p2793_p9 = scmp.lt.s32.totalorder %s268_s8, %s268_s8 }
  0x6f   : > { %p2794_p10 = scmp.lt.s32.totalorder %s2792_s16, %s2785_s13 }
  0x70   : > { %p2788_p6 = pnand %p2786_p4, %p2910_p7 }
  0x71   : > { %p2795_p11 = por %p2794_p10, %p2793_p9 }
  0x72   : > { %p2789_p8 = pneg %p2788_p6 }
  0x74   : > { %p2796_p12 = pnand %p2795_p11, %p2789_p8 }
  0x76   : > { %2799 = shalt.err (!%p2796_p12)
}
  0x77   : > { %2632 = dma.hbm_to_vmem [thread:$0]  (!%p2894_p5), %s3306_s6, 16, %s268_s8, [#allocation9]  }
  0x78   : > { %p3315_p13 = scmp.ne.s32.totalorder %s3312_s29, 0 }
  0x79   : > { %p3316_p2 = scmp.ne.s32.totalorder (!%p3315_p13), %s3311_s28, 0 }
  0x7a   : > { %289 = sbr.rel (%p3315_p13) target bundleno = 927 (0x39f), region = 48 }
  0x81   : > { %2805 = dma.done.wait (%p3316_p2), [#allocation4], 384  }
  0x82   : > { %2807 = vsyncadd (%p3316_p2), [#allocation4], 4294966912 }
  0x83   : > { %2809 = dma.done.wait (%p3316_p2), [#allocation6], 3088  }
  0x84   : > { %2811 = vsyncadd (%p3316_p2), [#allocation6], 4294964208 }
  0x85   : > { %2813 = dma.done.wait (%p3316_p2), [#allocation9], 32  }
  0x86   : > { %2815 = vsyncadd (%p3316_p2), [#allocation9], 4294967264  ;;  %s1923_s29 = sshll.u32 %s1908_s27, 3  ;;  %v2827_v0 = vmov 0.0   ;;  %vm359_vm0 = vcmask 64512   ;;  %v417_v1 = vld [vmem:[#allocation3] sm:$0xff] }
  0x87   : > { %p338_p5 = scmp.lt.s32.totalorder %s1923_s29, 15  ;;  %349 = vst [vmem:[#allocation2] sm:$0xff] %v2827_v0  ;;  %350 = vst [vmem:[#allocation2 + $0x48] sm:$0xff] %v2827_v0  ;;  %v419_v2 = vld [vmem:[#allocation3 + $0x8] sm:$0xff]  ;;  %2173 = vmatprep.subr.mxu0 %v417_v1  ;;  %v679_v4 = vld [vmem:[#allocation3 + $0x10] sm:$0xff]  ;;  %vm864_vm1 = vcmask 523264  }
  0x88   : > { %2159 = vmatprep.subr.mxu1 %v419_v2  ;;  %2174 = vmatpush3.msra.mxu0 %v417_v1  ;;  %v906_v36 = vld [vmem:[#allocation7 + $0x40] sm:$0xff]  ;;  %v907_v37 = vld [vmem:[#allocation7 + $0x48] sm:$0xff]  ;;  %v908_v39 = vld [vmem:[#allocation7 + $0x50] sm:$0xff] }
  0x89   : > { %s3320_s29 = smov (!%p338_p5, %s1923_s29), 15  ;;  %2160 = vmatpush3.msra.mxu1 %v419_v2  ;;  %2187 = vmatprep.subr.mxu0 %v679_v4  ;;  %v2417_v38 = vpack.c.bf16 %v907_v37, %v906_v36  ;;  %v909_v40 = vld [vmem:[#allocation7 + $0x58] sm:$0xff]  ;;  %v910_v42 = vld [vmem:[#allocation7 + $0x60] sm:$0xff]  ;;  %v911_v43 = vld [vmem:[#allocation7 + $0x68] sm:$0xff] }
  0x8a   : > { %s1924_s11 = sshll.u32 %s3320_s29, 3  ;;  %v2421_v41 = vpack.c.bf16 %v909_v40, %v908_v39  ;;  %v2425_v44 = vpack.c.bf16 %v911_v43, %v910_v42  ;;  %v912_v45 = vld [vmem:[#allocation7 + $0x70] sm:$0xff]  ;;  %v913_v46 = vld [vmem:[#allocation7 + $0x78] sm:$0xff]  ;;  %v897_v48 = vld [vmem:[#allocation7] sm:$0xff] }
  0x8b   : > { %s341_s28 = scalar_lea.vmem %s3300_s0, %s1924_s11  ;;  %2418 = vmatprep.subr.bf16.mxu1 %v2417_v38  ;;  %v2429_v47 = vpack.c.bf16 %v913_v46, %v912_v45  ;;  %v898_v49 = vld [vmem:[#allocation7 + $0x8] sm:$0xff]  ;;  %v1951_v63 = vld [vmem:[#allocation5] ss:$0 sm:$0xff]  ;;  %v901_v37 = vld [vmem:[#allocation7 + $0x20] sm:$0xff]  ;;  %s3270_s9 = scalar_lea.vmem %s3307_s7, %s1924_s11 }
  0x8c   : > { %v351_v3 = vld [vmem:[%s341_s28] sm:$0xff]  ;;  %v352_v5 = vld [vmem:[%s341_s28 + $0x8] sm:$0xff]  ;;  %v353_v6 = vld [vmem:[%s341_s28 + $0x10] sm:$0xff]  ;;  %v2433_v50 = vpack.c.bf16 %v898_v49, %v897_v48 }
  0x8d   : > { %360 = vst.msk [vmem:[#allocation2 + $0x8] sm:$0xff] %vm359_vm0, %v351_v3  ;;  %361 = vst.msk [vmem:[#allocation2 + $0x10] sm:$0xff] %vm359_vm0, %v352_v5  ;;  %v354_v7 = vld [vmem:[%s341_s28 + $0x18] sm:$0xff]  ;;  %v355_v8 = vld [vmem:[%s341_s28 + $0x20] sm:$0xff]  ;;  %v368_v3 = vlaneseq }
  0x8e   : > { %362 = vst.msk [vmem:[#allocation2 + $0x18] sm:$0xff] %vm359_vm0, %v353_v6  ;;  %v356_v9 = vld [vmem:[%s341_s28 + $0x28] sm:$0xff]  ;;  %363 = vst.msk [vmem:[#allocation2 + $0x20] sm:$0xff] %vm359_vm0, %v354_v7  ;;  %v357_v10 = vld [vmem:[%s341_s28 + $0x30] sm:$0xff] }
  0x8f   : > { %364 = vst.msk [vmem:[#allocation2 + $0x28] sm:$0xff] %vm359_vm0, %v355_v8  ;;  %365 = vst.msk [vmem:[#allocation2 + $0x30] sm:$0xff] %vm359_vm0, %v356_v9  ;;  %v358_v11 = vld [vmem:[%s341_s28 + $0x38] sm:$0xff]  ;;  %v904_v46 = vld [vmem:[#allocation7 + $0x38] sm:$0xff] }
  0x90   : > { %366 = vst.msk [vmem:[#allocation2 + $0x38] sm:$0xff] %vm359_vm0, %v357_v10  ;;  %367 = vst.msk [vmem:[#allocation2 + $0x40] sm:$0xff] %vm359_vm0, %v358_v11  ;;  %v369_v11 = vshrl.u32 %v368_v3, 7  ;;  %v903_v45 = vld [vmem:[#allocation7 + $0x30] sm:$0xff] }
  0x91   : > { %v2445_v48 = vpack.c.bf16 %v904_v46, %v903_v45  ;;  %v1987_v45 = vld [vmem:[%s3305_s5 + $0xd0] sm:$0xff]  ;;  %v1988_v46 = vld [vmem:[%s3305_s5 + $0xd8] sm:$0xff] }
  0x94   : > { %v393_v12 = vld [vmem:[#allocation2 + $0x8] sm:$0xff]  ;;  %v394_v14 = vld [vmem:[#allocation2 + $0x10] sm:$0xff] }
  0x95   : > { %v401_v13 = vld [vmem:[#allocation2 + $0x7] sm:$0xff]  ;;  %2161 = vmatprep.mubr.msk.f32.mxu1 %vm359_vm0, %v393_v12  ;;  %v402_v15 = vld [vmem:[#allocation2 + $0xf] sm:$0xff]  ;;  %v395_v16 = vld [vmem:[#allocation2 + $0x18] sm:$0xff] }
  0x96   : > { %2175 = vmatprep.mubr.msk.f32.mxu0 %vm359_vm0, %v401_v13  ;;  %2162 = vmatmul.mubr.msk.f32.vlgmr.msra.gmra.mrb[0].mxu1 %vm359_vm0, %v394_v14  ;;  %v403_v17 = vld [vmem:[#allocation2 + $0x17] sm:$0xff]  ;;  %v396_v18 = vld [vmem:[#allocation2 + $0x20] sm:$0xff]  ;;  %v397_v20 = vld [vmem:[#allocation2 + $0x28] sm:$0xff] }
  0x97   : > { %2176 = vmatmul.mubr.msk.f32.vlgmr.msra.gmra.mrb[0].mxu0 %vm359_vm0, %v402_v15  ;;  %2164 = vmatprep.mubr.msk.f32.mxu1 %vm359_vm0, %v395_v16  ;;  %v404_v19 = vld [vmem:[#allocation2 + $0x1f] sm:$0xff]  ;;  %v405_v21 = vld [vmem:[#allocation2 + $0x27] sm:$0xff]  ;;  %v398_v22 = vld [vmem:[#allocation2 + $0x30] sm:$0xff] }
  0x98   : > { %2188 = vmatpush3.msra.mxu0 %v679_v4  ;;  %2178 = vmatprep.mubr.msk.f32.mxu0 %vm359_vm0, %v403_v17  ;;  %v406_v23 = vld [vmem:[#allocation2 + $0x2f] sm:$0xff]  ;;  %v399_v24 = vld [vmem:[#allocation2 + $0x38] sm:$0xff]  ;;  %v400_v26 = vld [vmem:[#allocation2 + $0x40] sm:$0xff] }
  0x99   : > { %v407_v25 = vld [vmem:[#allocation2 + $0x37] sm:$0xff]  ;;  %v408_v27 = vld [vmem:[#allocation2 + $0x3f] sm:$0xff]  ;;  %v409_v30 = vld [vmem:[#allocation2 + $0x9] sm:$0xff]  ;;  %2420 = vmatpush3.bf16.msra.mxu1 %v2417_v38 }
  0x9a   : > { %2165 = vmatmul.mubr.msk.f32.gmra.mrb[2].mxu1 %vm359_vm0, %v396_v18  ;;  %v415_v28 = vld [vmem:[#allocation2 + $0x39] sm:$0xff]  ;;  %v416_v29 = vld [vmem:[#allocation2 + $0x41] sm:$0xff]  ;;  %v410_v31 = vld [vmem:[#allocation2 + $0x11] sm:$0xff]  ;;  %2422 = vmatprep.subr.bf16.mxu1 %v2421_v41 }
  0x9b   : > { %2179 = vmatmul.mubr.msk.f32.gmra.mrb[2].mxu0 %vm359_vm0, %v404_v19  ;;  %2167 = vmatprep.mubr.msk.f32.mxu1 %vm359_vm0, %v397_v20  ;;  %872 = vst.msk [vmem:[#allocation2 + $0x40] sm:$0xff] %vm864_vm1, %v2827_v0  ;;  %v411_v32 = vld [vmem:[#allocation2 + $0x19] sm:$0xff]  ;;  %v412_v33 = vld [vmem:[#allocation2 + $0x21] sm:$0xff]  ;;  %v413_v34 = vld [vmem:[#allocation2 + $0x29] sm:$0xff]  ;;  %v375_v20 = vadd.s32 48, %v369_v11 }
  0x9c   : > { %2181 = vmatprep.mubr.msk.f32.mxu0 %vm359_vm0, %v405_v21  ;;  %v414_v35 = vld [vmem:[#allocation2 + $0x31] sm:$0xff] }
  0x9d   : > { %2424 = vmatpush3.bf16.msra.mxu1 %v2421_v41  ;;  %v902_v38 = vld [vmem:[#allocation7 + $0x28] sm:$0xff] }
  0x9e   : > { %2168 = vmatmul.mubr.msk.f32.gmra.mrb[4].mxu1 %vm359_vm0, %v398_v22  ;;  %2426 = vmatprep.subr.bf16.mxu1 %v2425_v44  ;;  %v2441_v42 = vpack.c.bf16 %v902_v38, %v901_v37  ;;  %v1380_v38 = vld [vmem:[%s3305_s5 + $0x30] sm:$0xff] }
  0x9f   : > { %2182 = vmatmul.mubr.msk.f32.gmra.mrb[4].mxu0 %vm359_vm0, %v406_v23  ;;  %2170 = vmatprep.mubr.msk.f32.mxu1 %vm359_vm0, %v399_v24 }
  0xa0   : > { %2184 = vmatprep.mubr.msk.f32.mxu0 %vm359_vm0, %v407_v25 }
  0xa1   : > { %2428 = vmatpush3.bf16.msra.mxu1 %v2425_v44 }
  0xa2   : > { %2171 = vmatmul.mubr.msk.f32.gmra.mrb[6].mxu1 %vm359_vm0, %v400_v26  ;;  %2430 = vmatprep.subr.bf16.mxu1 %v2429_v47  ;;  %v899_v26 = vld [vmem:[#allocation7 + $0x10] sm:$0xff] }
  0xa3   : > { %2185 = vmatmul.mubr.msk.f32.gmra.mrb[6].mxu0 %vm359_vm0, %v408_v27  ;;  %v900_v27 = vld [vmem:[#allocation7 + $0x18] sm:$0xff] }
  0xa4   : > { %2189 = vmatprep.mubr.msk.f32.mxu0 %vm359_vm0, %v409_v30 }
  0xa5   : > { %2432 = vmatpush3.bf16.msra.mxu1 %v2429_v47 }
  0xa6   : > { %2434 = vmatprep.subr.bf16.mxu1 %v2433_v50 }
  0xa7   : > { %2190 = vmatmul.mubr.msk.f32.vlgmr.msra.gmra.mrb[0].mxu0 %vm359_vm0, %v410_v31 }
  0xa8   : > { %2192 = vmatprep.mubr.msk.f32.mxu0 %vm359_vm0, %v411_v32 }
  0xab   : > { %2193 = vmatmul.mubr.msk.f32.gmra.mrb[2].mxu0 %vm359_vm0, %v412_v33 }
  0xac   : > { %2195 = vmatprep.mubr.msk.f32.mxu0 %vm359_vm0, %v413_v34  ;;  %v2437_v34 = vpack.c.bf16 %v900_v27, %v899_v26  ;;  %v1376_v26 = vld [vmem:[%s3305_s5 + $0x10] sm:$0xff]  ;;  %v1377_v27 = vld [vmem:[%s3305_s5 + $0x18] sm:$0xff] }
  0xaf   : > { %2196 = vmatmul.mubr.msk.f32.gmra.mrb[4].mxu0 %vm359_vm0, %v414_v35 }
  0xb0   : > { %2198 = vmatprep.mubr.msk.f32.mxu0 %vm359_vm0, %v415_v28 }
  0xb3   : > { %2199 = vmatmul.mubr.msk.f32.gmra.mrb[8].mxu0 %vm359_vm0, %v416_v29  ;;  %v383_v29 = vand.u32 63, %v375_v20  ;;  %v1979_v20 = vld [vmem:[%s3305_s5 + $0x90] sm:$0xff] }
  0xb5   : > { %vm3083_vm2 = vcmp.lt.s32.totalorder %v383_v29, 50  ;;  %v2501_v29 = vpack.c.bf16 %v1377_v27, %v1376_v26 }
 0x169   : > { %v2163_v51 = vpop.f32.mrb[0].mxu1 }
 0x16a   : > { %v510_v52 = vpop.f32.mrb[1].mxu1 }
 0x16d   : > { %v2166_v53 = vpop.f32.mrb[2].mxu1 }
 0x16e   : > { %v520_v54 = vpop.f32.mrb[3].mxu1 }
 0x171   : > { %v2169_v55 = vpop.f32.mrb[4].mxu1 }
 0x172   : > { %v530_v56 = vpop.f32.mrb[5].mxu1 }
 0x175   : > { %v2172_v57 = vpop.f32.mrb[6].mxu1 }
 0x176   : > { %v2186_v58 = vpop.f32.mrb[6].mxu0  ;;  %v540_v59 = vpop.f32.mrb[7].mxu1 }
 0x177   : > { %v669_v60 = vpop.f32.mrb[7].mxu0 }
 0x178   : > { %v670_v61 = vadd.f32 %v669_v60, %v540_v59  ;;  %v896_v59 = vld [vmem:[#allocation2 + $0x42] sm:$0xff] }
 0x17a   : > { %v2191_v62 = vpop.f32.mrb[0].mxu0 }
 0x17b   : > { %v2561_v1 = vadd.f32 %v2191_v62, %v2163_v51  ;;  %v770_v2 = vpop.f32.mrb[1].mxu0  ;;  %v1174_v51 = vld [vmem:[#allocation7 + $0x88] sm:$0xff] }
 0x17c   : > { %v2562_v4 = vadd.f32 %v770_v2, %v510_v52  ;;  %v880_v52 = vld [vmem:[#allocation2 + $0x40] sm:$0xff] }
 0x17d   : > { %v825_v5 = vadd.f32 %v2561_v1, %v1951_v63  ;;  %v1178_v1 = vld [vmem:[#allocation7 + $0xa8] sm:$0xff] }
 0x17e   : > { %v824_v6 = vadd.f32 %v2562_v4, %v1951_v63  ;;  %v2194_v7 = vpop.f32.mrb[2].mxu0 }
 0x17f   : > { %v833_v8 = vmax.f32 %v825_v5, 0.0  ;;  %v2563_v9 = vadd.f32 %v2194_v7, %v2166_v53  ;;  %v780_v10 = vpop.f32.mrb[3].mxu0  ;;  %v1179_v5 = vld [vmem:[#allocation7 + $0xb0] sm:$0xff] }
 0x180   : > { %v832_v12 = vmax.f32 %v824_v6, 0.0  ;;  %v2564_v13 = vadd.f32 %v780_v10, %v520_v54  ;;  %v1180_v6 = vld [vmem:[#allocation7 + $0xb8] sm:$0xff] }
 0x181   : > { %866 = vst.msk [vmem:[#allocation2 + $0x10] sm:$0xff] %vm864_vm1, %v833_v8  ;;  %v827_v14 = vadd.f32 %v2563_v9, %v1951_v63  ;;  %v2461_v8 = vpack.c.bf16 %v1180_v6, %v1179_v5 }
 0x182   : > { %865 = vst.msk [vmem:[#allocation2 + $0x8] sm:$0xff] %vm864_vm1, %v832_v12  ;;  %v826_v15 = vadd.f32 %v2564_v13, %v1951_v63  ;;  %v2197_v16 = vpop.f32.mrb[4].mxu0 }
 0x183   : > { %v835_v17 = vmax.f32 %v827_v14, 0.0  ;;  %v2565_v18 = vadd.f32 %v2197_v16, %v2169_v55  ;;  %v790_v19 = vpop.f32.mrb[5].mxu0  ;;  %v1175_v55 = vld [vmem:[#allocation7 + $0x90] sm:$0xff] }
 0x184   : > { %v834_v21 = vmax.f32 %v826_v15, 0.0  ;;  %v2566_v22 = vadd.f32 %v790_v19, %v530_v56  ;;  %v1176_v56 = vld [vmem:[#allocation7 + $0x98] sm:$0xff] }
 0x185   : > { %868 = vst.msk [vmem:[#allocation2 + $0x20] sm:$0xff] %vm864_vm1, %v835_v17  ;;  %v829_v23 = vadd.f32 %v2565_v18, %v1951_v63  ;;  %v1977_v17 = vld [vmem:[%s3305_s5 + $0x80] sm:$0xff]  ;;  %v1978_v18 = vld [vmem:[%s3305_s5 + $0x88] sm:$0xff] }
 0x186   : > { %867 = vst.msk [vmem:[#allocation2 + $0x18] sm:$0xff] %vm864_vm1, %v834_v21  ;;  %v828_v24 = vadd.f32 %v2566_v22, %v1951_v63  ;;  %v2200_v25 = vpop.f32.mrb[8].mxu0  ;;  %v2465_v19 = vpack.c.bf16 %v1978_v18, %v1977_v17  ;;  %v1980_v21 = vld [vmem:[%s3305_s5 + $0x98] sm:$0xff] }
 0x187   : > { %v837_v28 = vmax.f32 %v829_v23, 0.0  ;;  %v800_v30 = vpop.f32.mrb[9].mxu0  ;;  %v2469_v22 = vpack.c.bf16 %v1980_v21, %v1979_v20  ;;  %v1374_v23 = vld [vmem:[%s3305_s5] sm:$0xff] }
 0x188   : > { %v836_v31 = vmax.f32 %v828_v24, 0.0  ;;  %v815_v32 = vadd.f32 %v800_v30, %v670_v61  ;;  %v874_v36 = vld [vmem:[#allocation2 + $0x10] sm:$0xff]  ;;  %v2453_v61 = vpack.c.bf16 %v1176_v56, %v1175_v55  ;;  %v1375_v24 = vld [vmem:[%s3305_s5 + $0x8] sm:$0xff]  ;;  %v1385_v55 = vld [vmem:[%s3305_s5 + $0x58] sm:$0xff] }
 0x189   : > { %870 = vst.msk [vmem:[#allocation2 + $0x30] sm:$0xff] %vm864_vm1, %v837_v28  ;;  %v873_v33 = vld [vmem:[#allocation2 + $0x8] sm:$0xff]  ;;  %v2497_v25 = vpack.c.bf16 %v1375_v24, %v1374_v23  ;;  %v1378_v28 = vld [vmem:[%s3305_s5 + $0x20] sm:$0xff] }
 0x18a   : > { %869 = vst.msk [vmem:[#allocation2 + $0x28] sm:$0xff] %vm864_vm1, %v836_v31  ;;  %v830_v35 = vadd.f32 %v1951_v63, %v815_v32  ;;  %2217 = vmatprep.mubr.msk.f32.mxu1 %vm864_vm1, %v873_v33  ;;  %v881_v60 = vld [vmem:[#allocation2 + $0x6] sm:$0xff]  ;;  %v882_v62 = vld [vmem:[#allocation2 + $0xe] sm:$0xff] }
 0x18b   : > { %2218 = vmatmul.mubr.msk.f32.vlgmr.msra.gmra.mrb[8].mxu1 %vm864_vm1, %v874_v36  ;;  %v1177_v63 = vld [vmem:[#allocation7 + $0xa0] sm:$0xff]  ;;  %v1981_v31 = vld [vmem:[%s3305_s5 + $0xa0] sm:$0xff]  ;;  %2498 = vmatprep.subr.bf16.mxu0 %v2497_v25 }
 0x18c   : > { %v838_v40 = vmax.f32 %v830_v35, 0.0  ;;  %2436 = vmatpush3.bf16.msra.mxu1 %v2433_v50  ;;  %v876_v44 = vld [vmem:[#allocation2 + $0x20] sm:$0xff]  ;;  %v1173_v50 = vld [vmem:[#allocation7 + $0x80] sm:$0xff]  ;;  %v2457_v3 = vpack.c.bf16 %v1178_v1, %v1177_v63  ;;  %2500 = vmatpush3.bf16.msra.mxu0 %v2497_v25  ;;  %v1984_v35 = vld [vmem:[%s3305_s5 + $0xb8] sm:$0xff] }
 0x18d   : > { %v875_v41 = vld [vmem:[#allocation2 + $0x18] sm:$0xff]  ;;  %2438 = vmatprep.subr.bf16.mxu1 %v2437_v34  ;;  %v2449_v54 = vpack.c.bf16 %v1174_v51, %v1173_v50  ;;  %v889_v11 = vld [vmem:[#allocation2 + $0xa] sm:$0xff]  ;;  %2502 = vmatprep.subr.bf16.mxu0 %v2501_v29  ;;  %v1989_v51 = vld [vmem:[%s3305_s5 + $0xe0] sm:$0xff] }
 0x18e   : > { %v862_v43 = vsel %vm3083_vm2, %v838_v40, 0.0  ;;  %2220 = vmatprep.mubr.msk.f32.mxu1 %vm864_vm1, %v875_v41  ;;  %v883_v2 = vld [vmem:[#allocation2 + $0x16] sm:$0xff]  ;;  %v884_v4 = vld [vmem:[#allocation2 + $0x1e] sm:$0xff]  ;;  %v1379_v30 = vld [vmem:[%s3305_s5 + $0x28] sm:$0xff] }
 0x18f   : > { %871 = vst.msk [vmem:[#allocation2 + $0x38] sm:$0xff] %vm864_vm1, %v862_v43  ;;  %2221 = vmatmul.mubr.msk.f32.gmra.mrb[10].mxu1 %vm864_vm1, %v876_v44  ;;  %v890_v12 = vld [vmem:[#allocation2 + $0x12] sm:$0xff]  ;;  %v891_v13 = vld [vmem:[#allocation2 + $0x1a] sm:$0xff]  ;;  %v1982_v32 = vld [vmem:[%s3305_s5 + $0xa8] sm:$0xff]  ;;  %v2505_v36 = vpack.c.bf16 %v1379_v30, %v1378_v28 }
 0x190   : > { %2440 = vmatpush3.bf16.msra.mxu1 %v2437_v34  ;;  %v878_v49 = vld [vmem:[#allocation2 + $0x30] sm:$0xff]  ;;  %v2473_v33 = vpack.c.bf16 %v1982_v32, %v1981_v31  ;;  %v1381_v40 = vld [vmem:[%s3305_s5 + $0x38] sm:$0xff]  ;;  %2504 = vmatpush3.bf16.msra.mxu0 %v2501_v29  ;;  %v1986_v43 = vld [vmem:[%s3305_s5 + $0xc8] sm:$0xff] }
 0x191   : > { %v877_v47 = vld [vmem:[#allocation2 + $0x28] sm:$0xff]  ;;  %2442 = vmatprep.subr.bf16.mxu1 %v2441_v42  ;;  %v1983_v34 = vld [vmem:[%s3305_s5 + $0xb0] sm:$0xff]  ;;  %2506 = vmatprep.subr.bf16.mxu0 %v2505_v36  ;;  %v2509_v41 = vpack.c.bf16 %v1381_v40, %v1380_v38  ;;  %v1389_v1 = vld [vmem:[%s3305_s5 + $0x78] sm:$0xff] }
 0x192   : > { %2223 = vmatprep.mubr.msk.f32.mxu1 %vm864_vm1, %v877_v47  ;;  %v885_v7 = vld [vmem:[#allocation2 + $0x26] sm:$0xff]  ;;  %v886_v9 = vld [vmem:[#allocation2 + $0x2e] sm:$0xff]  ;;  %v2477_v37 = vpack.c.bf16 %v1984_v35, %v1983_v34  ;;  %v2485_v47 = vpack.c.bf16 %v1988_v46, %v1987_v45  ;;  %v1996_v29 = vld [vmem:[%s3305_s5 + $0x118] sm:$0xff] }
 0x193   : > { %2224 = vmatmul.mubr.msk.f32.gmra.mrb[12].mxu1 %vm864_vm1, %v878_v49  ;;  %v892_v14 = vld [vmem:[#allocation2 + $0x22] sm:$0xff]  ;;  %v893_v15 = vld [vmem:[#allocation2 + $0x2a] sm:$0xff] }
 0x194   : > { %2444 = vmatpush3.bf16.msra.mxu1 %v2441_v42  ;;  %v1985_v42 = vld [vmem:[%s3305_s5 + $0xc0] sm:$0xff]  ;;  %2508 = vmatpush3.bf16.msra.mxu0 %v2505_v36  ;;  %v1383_v49 = vld [vmem:[%s3305_s5 + $0x48] sm:$0xff]  ;;  %v1388_v63 = vld [vmem:[%s3305_s5 + $0x70] sm:$0xff] }
 0x195   : > { %2446 = vmatprep.subr.bf16.mxu1 %v2445_v48  ;;  %v2481_v44 = vpack.c.bf16 %v1986_v43, %v1985_v42  ;;  %2510 = vmatprep.subr.bf16.mxu0 %v2509_v41  ;;  %v1995_v28 = vld [vmem:[%s3305_s5 + $0x110] sm:$0xff]  ;;  %v1997_v38 = vld [vmem:[%s3305_s5 + $0x120] sm:$0xff]  ;;  %v1998_v40 = vld [vmem:[%s3305_s5 + $0x128] sm:$0xff] }
 0x196   : > { %v879_v53 = vld [vmem:[#allocation2 + $0x38] sm:$0xff]  ;;  %v2533_v36 = vpack.c.bf16 %v1996_v29, %v1995_v28  ;;  %v1999_v46 = vld [vmem:[%s3305_s5 + $0x130] sm:$0xff] }
 0x197   : > { %2226 = vmatprep.mubr.msk.f32.mxu1 %vm864_vm1, %v879_v53  ;;  %v888_v57 = vld [vmem:[#allocation2 + $0x3e] sm:$0xff]  ;;  %v887_v10 = vld [vmem:[#allocation2 + $0x36] sm:$0xff] }
 0x198   : > { %v895_v58 = vld [vmem:[#allocation2 + $0x3a] sm:$0xff]  ;;  %2227 = vmatmul.mubr.msk.f32.gmra.mrb[14].mxu1 %vm864_vm1, %v880_v52  ;;  %v894_v16 = vld [vmem:[#allocation2 + $0x32] sm:$0xff]  ;;  %2512 = vmatpush3.bf16.msra.mxu0 %v2509_v41  ;;  %v1990_v52 = vld [vmem:[%s3305_s5 + $0xe8] sm:$0xff] }
 0x199   : > { %1356 = vst [vmem:[#allocation2 + $0x40] sm:$0xff] %v2827_v0  ;;  %2448 = vmatpush3.bf16.msra.mxu1 %v2445_v48  ;;  %2245 = vmatprep.mubr.msk.f32.mxu1 %vm864_vm1, %v881_v60  ;;  %v1382_v48 = vld [vmem:[%s3305_s5 + $0x40] sm:$0xff]  ;;  %v2489_v53 = vpack.c.bf16 %v1990_v52, %v1989_v51 }
 0x19a   : > { %2450 = vmatprep.subr.bf16.mxu1 %v2449_v54  ;;  %v2513_v50 = vpack.c.bf16 %v1383_v49, %v1382_v48  ;;  %v1386_v60 = vld [vmem:[%s3305_s5 + $0x60] sm:$0xff] }
 0x19b   : > { %v2001_v52 = vld [vmem:[%s3305_s5 + $0x140] sm:$0xff] }
 0x19c   : > { %2246 = vmatmul.mubr.msk.f32.vlgmr.msra.gmra.mrb[8].mxu1 %vm864_vm1, %v882_v62  ;;  %2514 = vmatprep.subr.bf16.mxu0 %v2513_v50 }
 0x19d   : > { %2452 = vmatpush3.bf16.msra.mxu1 %v2449_v54  ;;  %2248 = vmatprep.mubr.msk.f32.mxu1 %vm864_vm1, %v883_v2  ;;  %v1384_v54 = vld [vmem:[%s3305_s5 + $0x50] sm:$0xff]  ;;  %v2525_v2 = vpack.c.bf16 %v1389_v1, %v1388_v63 }
 0x19e   : > { %2454 = vmatprep.subr.bf16.mxu1 %v2453_v61  ;;  %2516 = vmatpush3.bf16.msra.mxu0 %v2513_v50  ;;  %v2517_v56 = vpack.c.bf16 %v1385_v55, %v1384_v54  ;;  %v2003_v55 = vld [vmem:[%s3305_s5 + $0x150] sm:$0xff] }
 0x19f   : > { %v2007_v1 = vld [vmem:[%s3305_s5 + $0x170] sm:$0xff] }
 0x1a0   : > { %2249 = vmatmul.mubr.msk.f32.gmra.mrb[10].mxu1 %vm864_vm1, %v884_v4  ;;  %2518 = vmatprep.subr.bf16.mxu0 %v2517_v56  ;;  %v1994_v4 = vld [vmem:[%s3305_s5 + $0x108] sm:$0xff] }
 0x1a1   : > { %2456 = vmatpush3.bf16.msra.mxu1 %v2453_v61  ;;  %2251 = vmatprep.mubr.msk.f32.mxu1 %vm864_vm1, %v885_v7  ;;  %v1387_v61 = vld [vmem:[%s3305_s5 + $0x68] sm:$0xff] }
 0x1a2   : > { %2458 = vmatprep.subr.bf16.mxu1 %v2457_v3  ;;  %2520 = vmatpush3.bf16.msra.mxu0 %v2517_v56  ;;  %v2521_v62 = vpack.c.bf16 %v1387_v61, %v1386_v60  ;;  %v2004_v56 = vld [vmem:[%s3305_s5 + $0x158] sm:$0xff]  ;;  %v2005_v61 = vld [vmem:[%s3305_s5 + $0x160] sm:$0xff] }
 0x1a3   : > { %v2549_v60 = vpack.c.bf16 %v2004_v56, %v2003_v55 }
 0x1a4   : > { %2252 = vmatmul.mubr.msk.f32.gmra.mrb[12].mxu1 %vm864_vm1, %v886_v9  ;;  %2522 = vmatprep.subr.bf16.mxu0 %v2521_v62 }
 0x1a5   : > { %2460 = vmatpush3.bf16.msra.mxu1 %v2457_v3  ;;  %2254 = vmatprep.mubr.msk.f32.mxu1 %vm864_vm1, %v887_v10  ;;  %v1993_v3 = vld [vmem:[%s3305_s5 + $0x100] sm:$0xff] }
 0x1a6   : > { %2462 = vmatprep.subr.bf16.mxu1 %v2461_v8  ;;  %2524 = vmatpush3.bf16.msra.mxu0 %v2521_v62  ;;  %v2529_v5 = vpack.c.bf16 %v1994_v4, %v1993_v3  ;;  %v2006_v62 = vld [vmem:[%s3305_s5 + $0x168] sm:$0xff] }
 0x1a7   : > { %2526 = vmatprep.subr.bf16.mxu0 %v2525_v2  ;;  %v2553_v63 = vpack.c.bf16 %v2006_v62, %v2005_v61 }
 0x1a8   : > { %2255 = vmatmul.mubr.msk.f32.gmra.mrb[16].mxu1 %vm864_vm1, %v888_v57  ;;  %v1991_v57 = vld [vmem:[%s3305_s5 + $0xf0] sm:$0xff] }
 0x1a9   : > { %2464 = vmatpush3.bf16.msra.mxu1 %v2461_v8  ;;  %2273 = vmatprep.mubr.msk.f32.mxu1 %vm864_vm1, %v889_v11  ;;  %v1976_v11 = vld [vmem:[#allocation8] ss:$0 sm:$0xff] }
 0x1aa   : > { %2466 = vmatprep.subr.bf16.mxu1 %v2465_v19  ;;  %2528 = vmatpush3.bf16.msra.mxu0 %v2525_v2 }
 0x1ab   : > { %2530 = vmatprep.subr.bf16.mxu0 %v2529_v5 }
 0x1ac   : > { %2274 = vmatmul.mubr.msk.f32.vlgmr.msra.gmra.mrb[8].mxu1 %vm864_vm1, %v890_v12 }
 0x1ad   : > { %2276 = vmatprep.mubr.msk.f32.mxu1 %vm864_vm1, %v891_v13  ;;  %2468 = vmatpush3.bf16.msra.mxu1 %v2465_v19 }
 0x1ae   : > { %2470 = vmatprep.subr.bf16.mxu1 %v2469_v22 }
 0x1b0   : > { %2277 = vmatmul.mubr.msk.f32.gmra.mrb[10].mxu1 %vm864_vm1, %v892_v14 }
 0x1b1   : > { %2279 = vmatprep.mubr.msk.f32.mxu1 %vm864_vm1, %v893_v15  ;;  %2472 = vmatpush3.bf16.msra.mxu1 %v2469_v22 }
 0x1b2   : > { %2474 = vmatprep.subr.bf16.mxu1 %v2473_v33 }
 0x1b4   : > { %2280 = vmatmul.mubr.msk.f32.gmra.mrb[12].mxu1 %vm864_vm1, %v894_v16 }
 0x1b5   : > { %2282 = vmatprep.mubr.msk.f32.mxu1 %vm864_vm1, %v895_v58  ;;  %2476 = vmatpush3.bf16.msra.mxu1 %v2473_v33  ;;  %v1992_v58 = vld [vmem:[%s3305_s5 + $0xf8] sm:$0xff] }
 0x1b6   : > { %2478 = vmatprep.subr.bf16.mxu1 %v2477_v37 }
 0x1b8   : > { %2283 = vmatmul.mubr.msk.f32.gmra.mrb[18].mxu1 %vm864_vm1, %v896_v59  ;;  %v2493_v59 = vpack.c.bf16 %v1992_v58, %v1991_v57 }
 0x1b9   : > { %2480 = vmatpush3.bf16.msra.mxu1 %v2477_v37 }
 0x1ba   : > { %2482 = vmatprep.subr.bf16.mxu1 %v2481_v44 }
 0x1bd   : > { %2484 = vmatpush3.bf16.msra.mxu1 %v2481_v44  ;;  %v2537_v44 = vpack.c.bf16 %v1998_v40, %v1997_v38 }
 0x1be   : > { %2486 = vmatprep.subr.bf16.mxu1 %v2485_v47 }
 0x1c1   : > { %2488 = vmatpush3.bf16.msra.mxu1 %v2485_v47  ;;  %v2000_v47 = vld [vmem:[%s3305_s5 + $0x138] sm:$0xff] }
 0x1c2   : > { %2490 = vmatprep.subr.bf16.mxu1 %v2489_v53  ;;  %v2541_v51 = vpack.c.bf16 %v2000_v47, %v1999_v46 }
 0x1c5   : > { %2492 = vmatpush3.bf16.msra.mxu1 %v2489_v53  ;;  %v2002_v53 = vld [vmem:[%s3305_s5 + $0x148] sm:$0xff] }
 0x1c6   : > { %2494 = vmatprep.subr.bf16.mxu1 %v2493_v59  ;;  %v2545_v54 = vpack.c.bf16 %v2002_v53, %v2001_v52 }
 0x1c9   : > { %2496 = vmatpush3.bf16.msra.mxu1 %v2493_v59  ;;  %v1373_v59 = vld [vmem:[#allocation2 + $0x44] sm:$0xff] }
 0x26b   : > { %v2228_v6 = vpop.f32.mrb[14].mxu1 }
 0x26c   : > { %v1034_v7 = vpop.f32.mrb[15].mxu1 }
 0x27b   : > { %v2256_v8 = vpop.f32.mrb[16].mxu1 }
 0x27c   : > { %v1163_v9 = vpop.f32.mrb[17].mxu1 }
 0x27d   : > { %v1164_v10 = vadd.f32 %v1163_v9, %v1034_v7 }
 0x27f   : > { %v2275_v12 = vpop.f32.mrb[8].mxu1 }
 0x280   : > { %v1326_v13 = vadd.f32 %v2275_v12, %v1976_v11  ;;  %v1271_v14 = vpop.f32.mrb[9].mxu1 }
 0x281   : > { %v1325_v15 = vadd.f32 %v1976_v11, %v1271_v14 }
 0x282   : > { %v1334_v16 = vmax.f32 %v1326_v13, 0.0 }
 0x283   : > { %v1333_v17 = vmax.f32 %v1325_v15, 0.0  ;;  %v2278_v18 = vpop.f32.mrb[10].mxu1 }
 0x284   : > { %1350 = vst [vmem:[#allocation2 + $0x10] sm:$0xff] %v1334_v16  ;;  %v1328_v19 = vadd.f32 %v2278_v18, %v1976_v11  ;;  %v1281_v20 = vpop.f32.mrb[11].mxu1 }
 0x285   : > { %1349 = vst [vmem:[#allocation2 + $0x8] sm:$0xff] %v1333_v17  ;;  %v1327_v21 = vadd.f32 %v1976_v11, %v1281_v20  ;;  %2317 = vmatprep.mubr.f32.mxu1 %v1333_v17 }
 0x286   : > { %v1336_v22 = vmax.f32 %v1328_v19, 0.0  ;;  %2318 = vmatmul.mubr.f32.vlgmr.msra.gmra.mrb[20].mxu1 %v1334_v16  ;;  %v2009_v16 = vld [vmem:[#allocation10] ss:$0 sm:$0xff] }
 0x287   : > { %v1335_v23 = vmax.f32 %v1327_v21, 0.0  ;;  %v2281_v24 = vpop.f32.mrb[12].mxu1 }
 0x288   : > { %1352 = vst [vmem:[#allocation2 + $0x20] sm:$0xff] %v1336_v22  ;;  %v1330_v25 = vadd.f32 %v2281_v24, %v1976_v11  ;;  %v1291_v26 = vpop.f32.mrb[13].mxu1 }
 0x289   : > { %1351 = vst [vmem:[#allocation2 + $0x18] sm:$0xff] %v1335_v23  ;;  %v1329_v27 = vadd.f32 %v1976_v11, %v1291_v26  ;;  %2320 = vmatprep.mubr.f32.mxu1 %v1335_v23 }
 0x28a   : > { %v1338_v30 = vmax.f32 %v1330_v25, 0.0  ;;  %2321 = vmatmul.mubr.f32.gmra.mrb[22].mxu1 %v1336_v22 }
 0x28b   : > { %v1337_v31 = vmax.f32 %v1329_v27, 0.0  ;;  %v2284_v32 = vpop.f32.mrb[18].mxu1 }
 0x28c   : > { %1354 = vst [vmem:[#allocation2 + $0x30] sm:$0xff] %v1338_v30  ;;  %v1301_v33 = vpop.f32.mrb[19].mxu1  ;;  %v1365_v34 = vld [vmem:[#allocation2 + $0x4] sm:$0xff]  ;;  %v1366_v35 = vld [vmem:[#allocation2 + $0xc] sm:$0xff] }
 0x28d   : > { %1353 = vst [vmem:[#allocation2 + $0x28] sm:$0xff] %v1337_v31  ;;  %v1316_v37 = vadd.f32 %v1301_v33, %v1164_v10  ;;  %2361 = vmatprep.mubr.f32.mxu0 %v1365_v34  ;;  %2323 = vmatprep.mubr.f32.mxu1 %v1337_v31 }
 0x28e   : > { %2362 = vmatmul.mubr.f32.vlgmr.msra.gmra.mrb[10].mxu0 %v1366_v35  ;;  %2324 = vmatmul.mubr.f32.gmra.mrb[24].mxu1 %v1338_v30 }
 0x28f   : > { %v1331_v41 = vadd.f32 %v1976_v11, %v1316_v37  ;;  %2532 = vmatpush3.bf16.msra.mxu0 %v2529_v5 }
 0x290   : > { %v1367_v42 = vld [vmem:[#allocation2 + $0x14] sm:$0xff]  ;;  %2534 = vmatprep.subr.bf16.mxu0 %v2533_v36  ;;  %v1368_v43 = vld [vmem:[#allocation2 + $0x1c] sm:$0xff] }
 0x291   : > { %v1339_v45 = vmax.f32 %v1331_v41, 0.0  ;;  %2364 = vmatprep.mubr.f32.mxu0 %v1367_v42 }
 0x292   : > { %2365 = vmatmul.mubr.f32.gmra.mrb[12].mxu0 %v1368_v43 }
 0x293   : > { %v1347_v48 = vsel %vm3083_vm2, %v1339_v45, 0.0  ;;  %2536 = vmatpush3.bf16.msra.mxu0 %v2533_v36  ;;  %2659 = vmatprep.mubr.msk.f32.mxu1 %vm3083_vm2, %v1339_v45 }
 0x294   : > { %1355 = vst [vmem:[#allocation2 + $0x38] sm:$0xff] %v1347_v48  ;;  %v1369_v49 = vld [vmem:[#allocation2 + $0x24] sm:$0xff]  ;;  %2538 = vmatprep.subr.bf16.mxu0 %v2537_v44  ;;  %v1370_v50 = vld [vmem:[#allocation2 + $0x2c] sm:$0xff]  ;;  %2327 = vmatmul.mubr.f32.gmra.mrb[26].mxu1 %v2827_v0 }
 0x295   : > { %2367 = vmatprep.mubr.f32.mxu0 %v1369_v49 }
 0x296   : > { %2368 = vmatmul.mubr.f32.gmra.mrb[14].mxu0 %v1370_v50 }
 0x297   : > { %2540 = vmatpush3.bf16.msra.mxu0 %v2537_v44 }
 0x298   : > { %2542 = vmatprep.subr.bf16.mxu0 %v2541_v51 }
 0x29b   : > { %2544 = vmatpush3.bf16.msra.mxu0 %v2541_v51  ;;  %v1371_v57 = vld [vmem:[#allocation2 + $0x34] sm:$0xff]  ;;  %v1372_v58 = vld [vmem:[#allocation2 + $0x3c] sm:$0xff] }
 0x29c   : > { %2370 = vmatprep.mubr.f32.mxu0 %v1371_v57  ;;  %2546 = vmatprep.subr.bf16.mxu0 %v2545_v54  ;;  %1785 = vst.msk [vmem:[#allocation2 + $0x40] sm:$0xff] %vm864_vm1, %v2827_v0  ;;  %v2008_v0 = vld [vmem:[%s3305_s5 + $0x178] sm:$0xff] }
 0x29d   : > { %2371 = vmatmul.mubr.f32.gmra.mrb[16].mxu0 %v1372_v58  ;;  %v2557_v3 = vpack.c.bf16 %v2008_v0, %v2007_v1 }
 0x29e   : > { %2405 = vmatprep.mubr.f32.mxu0 %v1366_v35 }
 0x29f   : > { %2548 = vmatpush3.bf16.msra.mxu0 %v2545_v54 }
 0x2a0   : > { %2550 = vmatprep.subr.bf16.mxu0 %v2549_v60 }
 0x2a3   : > { %2552 = vmatpush3.bf16.msra.mxu0 %v2549_v60  ;;  %v1793_v2 = vld [vmem:[#allocation2 + $0x40] sm:$0xff] }
 0x2a4   : > { %2554 = vmatprep.subr.bf16.mxu0 %v2553_v63  ;;  %1801 = vst.msk [vmem:[%s3270_s9 + $0x38] sm:$0xff] %vm864_vm1, %v1793_v2 }
 0x2a7   : > { %2556 = vmatpush3.bf16.msra.mxu0 %v2553_v63 }
 0x2a8   : > { %2558 = vmatprep.subr.bf16.mxu0 %v2557_v3 }
 0x2ab   : > { %2560 = vmatpush3.bf16.msra.mxu0 %v2557_v3 }
 0x2ae   : > { %2406 = vmatmul.mubr.f32.vlgmr.msra.gmra.mrb[10].mxu0 %v1367_v42 }
 0x2af   : > { %2408 = vmatprep.mubr.f32.mxu0 %v1368_v43 }
 0x2b2   : > { %2409 = vmatmul.mubr.f32.gmra.mrb[12].mxu0 %v1369_v49 }
 0x2b3   : > { %2411 = vmatprep.mubr.f32.mxu0 %v1370_v50 }
 0x2b6   : > { %2412 = vmatmul.mubr.f32.gmra.mrb[14].mxu0 %v1371_v57 }
 0x2b7   : > { %2414 = vmatprep.mubr.f32.mxu0 %v1372_v58 }
 0x2ba   : > { %2415 = vmatmul.mubr.f32.gmra.mrb[18].mxu0 %v1373_v59 }
 0x359   : > { %v2319_v4 = vpop.f32.mrb[20].mxu1 }
 0x35a   : > { %v1473_v5 = vpop.f32.mrb[21].mxu1 }
 0x35d   : > { %v2322_v6 = vpop.f32.mrb[22].mxu1 }
 0x35e   : > { %v1483_v7 = vpop.f32.mrb[23].mxu1 }
 0x361   : > { %v2325_v8 = vpop.f32.mrb[24].mxu1 }
 0x362   : > { %v1493_v9 = vpop.f32.mrb[25].mxu1 }
 0x367   : > { %v2328_v10 = vpop.f32.mrb[26].mxu1 }
 0x368   : > { %v1503_v11 = vpop.f32.mrb[27].mxu1 }
 0x370   : > { %v2372_v12 = vpop.f32.mrb[16].mxu0 }
 0x371   : > { %v1608_v13 = vpop.f32.mrb[17].mxu0 }
 0x372   : > { %v1609_v14 = vadd.f32 %v1608_v13, %v1503_v11 }
 0x381   : > { %v2407_v15 = vpop.f32.mrb[10].mxu0 }
 0x382   : > { %v2567_v17 = vadd.f32 %v2407_v15, %v2319_v4  ;;  %v1700_v18 = vpop.f32.mrb[11].mxu0 }
 0x383   : > { %v2568_v19 = vadd.f32 %v1700_v18, %v1473_v5 }
 0x384   : > { %v1755_v20 = vadd.f32 %v2567_v17, %v2009_v16 }
 0x385   : > { %v1754_v21 = vadd.f32 %v2568_v19, %v2009_v16  ;;  %v2410_v22 = vpop.f32.mrb[12].mxu0 }
 0x386   : > { %v1763_v23 = vmax.f32 %v1755_v20, 0.0  ;;  %v2569_v24 = vadd.f32 %v2410_v22, %v2322_v6  ;;  %v1710_v25 = vpop.f32.mrb[13].mxu0 }
 0x387   : > { %v1762_v26 = vmax.f32 %v1754_v21, 0.0  ;;  %v2570_v27 = vadd.f32 %v1710_v25, %v1483_v7 }
 0x388   : > { %1779 = vst.msk [vmem:[#allocation2 + $0x10] sm:$0xff] %vm864_vm1, %v1763_v23  ;;  %v1757_v28 = vadd.f32 %v2569_v24, %v2009_v16 }
 0x389   : > { %1778 = vst.msk [vmem:[#allocation2 + $0x8] sm:$0xff] %vm864_vm1, %v1762_v26  ;;  %v1756_v29 = vadd.f32 %v2570_v27, %v2009_v16  ;;  %v2413_v30 = vpop.f32.mrb[14].mxu0 }
 0x38a   : > { %v1765_v31 = vmax.f32 %v1757_v28, 0.0  ;;  %v2571_v32 = vadd.f32 %v2413_v30, %v2325_v8  ;;  %v1720_v33 = vpop.f32.mrb[15].mxu0 }
 0x38b   : > { %v1764_v34 = vmax.f32 %v1756_v29, 0.0  ;;  %v2572_v35 = vadd.f32 %v1720_v33, %v1493_v9 }
 0x38c   : > { %1781 = vst.msk [vmem:[#allocation2 + $0x20] sm:$0xff] %vm864_vm1, %v1765_v31  ;;  %v1759_v36 = vadd.f32 %v2571_v32, %v2009_v16 }
 0x38d   : > { %1780 = vst.msk [vmem:[#allocation2 + $0x18] sm:$0xff] %vm864_vm1, %v1764_v34  ;;  %v1758_v37 = vadd.f32 %v2572_v35, %v2009_v16  ;;  %v2416_v38 = vpop.f32.mrb[18].mxu0 }
 0x38e   : > { %v1767_v40 = vmax.f32 %v1759_v36, 0.0  ;;  %v1730_v41 = vpop.f32.mrb[19].mxu0 }
 0x38f   : > { %v1787_v42 = vld [vmem:[#allocation2 + $0x10] sm:$0xff]  ;;  %v1766_v43 = vmax.f32 %v1758_v37, 0.0  ;;  %v1745_v44 = vadd.f32 %v1730_v41, %v1609_v14 }
 0x390   : > { %1795 = vst.msk [vmem:[%s3270_s9 + $0x8] sm:$0xff] %vm864_vm1, %v1787_v42  ;;  %v1786_v45 = vld [vmem:[#allocation2 + $0x8] sm:$0xff]  ;;  %1783 = vst.msk [vmem:[#allocation2 + $0x30] sm:$0xff] %vm864_vm1, %v1767_v40 }
 0x391   : > { %1794 = vst.msk [vmem:[%s3270_s9] sm:$0xff] %vm864_vm1, %v1786_v45  ;;  %1782 = vst.msk [vmem:[#allocation2 + $0x28] sm:$0xff] %vm864_vm1, %v1766_v43  ;;  %v1760_v46 = vadd.f32 %v2009_v16, %v1745_v44 }
 0x393   : > { %v1789_v47 = vld [vmem:[#allocation2 + $0x20] sm:$0xff]  ;;  %v1768_v48 = vmax.f32 %v1760_v46, 0.0 }
 0x394   : > { %1797 = vst.msk [vmem:[%s3270_s9 + $0x18] sm:$0xff] %vm864_vm1, %v1789_v47  ;;  %v1788_v49 = vld [vmem:[#allocation2 + $0x18] sm:$0xff] }
 0x395   : > { %1796 = vst.msk [vmem:[%s3270_s9 + $0x10] sm:$0xff] %vm864_vm1, %v1788_v49  ;;  %v1776_v50 = vsel %vm3083_vm2, %v1768_v48, 0.0 }
 0x396   : > { %1784 = vst.msk [vmem:[#allocation2 + $0x38] sm:$0xff] %vm864_vm1, %v1776_v50 }
 0x397   : > { %v1791_v51 = vld [vmem:[#allocation2 + $0x30] sm:$0xff] }
 0x398   : > { %1799 = vst.msk [vmem:[%s3270_s9 + $0x28] sm:$0xff] %vm864_vm1, %v1791_v51  ;;  %v1790_v52 = vld [vmem:[#allocation2 + $0x28] sm:$0xff] }
 0x399   : > { %1798 = vst.msk [vmem:[%s3270_s9 + $0x20] sm:$0xff] %vm864_vm1, %v1790_v52 }
 0x39d   : > { %v1792_v53 = vld [vmem:[#allocation2 + $0x38] sm:$0xff] }
 0x39e   : > { %1800 = vst.msk [vmem:[%s3270_s9 + $0x30] sm:$0xff] %vm864_vm1, %v1792_v53 }
 0x39f PF: > { %s20_s24 = sadd.s32 1, %s2818_s24  }
 0x3a0   : > { %p17_p7 = scmp.ge.s32.totalorder %s20_s24, 4  }
 0x3a2   :  { %19 = sbr.rel (!%p17_p7) target bundleno = 3 (0x3), region = 105 }
 0x3a9   :  { %1824 = vsyncpa [#allocation4], 1 }
 0x3aa   :  { %1826 = vsyncpa [#allocation4 + $0x1], 1 }
 0x3ab   :  { %1827 = vsyncpa [#allocation6], 1 }
 0x3ac   :  { %1828 = vsyncpa [#allocation9], 1 }

// kernel: timeseries_cnn_forward.3
= control target key start
LH: loop header
LB: loop body
LE: loop exit
PB: predicated region body
PF: predicated region fallthrough
CT: control target
= control target key end

     0   :  { %10 = vsyncpa [#allocation3], 0  ;;  %s3510_s0 = inlined_call_operand.vmem [shape: f32[2,4096], index: 0, kind: input, shape index: {}]   ;;  %s3511_s1 = inlined_call_operand.hbm [shape: f32[4096,128], index: 1, kind: input, shape index: {}]   ;;  %s3512_s2 = inlined_call_operand.hbm [shape: f32[1,128], index: 2, kind: input, shape index: {}]   ;;  %s3513_s3 = inlined_call_operand.vmem [shape: f32[128,10], index: 3, kind: input, shape index: {}]   ;;  %s3514_s4 = inlined_call_operand.hbm [shape: f32[1,10], index: 4, kind: input, shape index: {}]   ;;  %s3515_s5 = inlined_call_operand.hbm [shape: f32[2,10], index: 5, kind: output, shape index: {}]  }
   0x1   :  { %11 = vsyncpa [#allocation6], 0 }
   0x2   :  { %12 = vsyncpa [#allocation4], 0  ;;  %s3255_s18 = smov [#allocation5]   ;;  %s3256_s20 = smov [#allocation2]  }
   0x3   :  { %s33_s19 = sshll.u32 %s3255_s18, 4  ;;  %s20_s21 = sshll.u32 %s3256_s20, 4  ;;  %s34_s19 = int_to_ptr.vmem [resolvable:$true] %s33_s19  ;;  %s3295_s21 = int_to_ptr.vmem [resolvable:$true] %s20_s21 }
   0x4   :  { %s3161_s24 = scalar_lea.hbm %s3512_s2, 16 }
   0x5   :  { %p3162_p0 = scmp.ne.s32.totalorder %s3512_s2, %s3161_s24  ;;  %p3165_p1 = scmp.lt.u32.totalorder %s3161_s24, %s3512_s2 }
   0x7   :  { %p3167_p2 = pnand %p3165_p1, %p3162_p0 }
   0x9   :  { %3170 = shalt.err (!%p3167_p2)
}
   0xa   :  { %s3171_s29 = scalar_lea.vmem %s34_s19, 16  ;;  %s3175_s30 = scalar_lea.vmem %s34_s19, 32 }
   0xb   :  { %p3172_p3 = scmp.ne.s32.totalorder %s34_s19, %s3171_s29  ;;  %p3176_p4 = scmp.lt.s32.totalorder %s34_s19, %s34_s19 }
   0xc   :  { %p3177_p5 = scmp.lt.s32.totalorder %s3175_s30, %s3171_s29 }
   0xe   :  { %p3178_p6 = por %p3177_p5, %p3176_p4 }
  0x10   :  { %p3179_p7 = pnand %p3178_p6, %p3172_p3 }
  0x12   :  { %3182 = shalt.err (!%p3179_p7)
}
  0x13   :  { %36 = dma.hbm_to_vmem [thread:$0]  %s3512_s2, 16, %s34_s19, [#allocation6]  }
  0x14   :  { %s3183_s10 = scalar_lea.hbm %s3511_s1, 65536 }
  0x15   :  { %p3184_p8 = scmp.ne.s32.totalorder %s3511_s1, %s3183_s10  ;;  %p3187_p9 = scmp.lt.u32.totalorder %s3183_s10, %s3511_s1 }
  0x17   :  { %p3189_p10 = pnand %p3187_p9, %p3184_p8 }
  0x19   :  { %3192 = shalt.err (!%p3189_p10)
}
  0x1a   :  { %s3193_s15 = scalar_lea.vmem %s3295_s21, 65536  ;;  %p3198_p12 = scmp.lt.s32.totalorder %s3295_s21, %s3295_s21 }
  0x1b   :  { %p3194_p11 = scmp.ne.s32.totalorder %s3295_s21, %s3193_s15  ;;  %p3199_p13 = scmp.lt.s32.totalorder %s3193_s15, %s3193_s15 }
  0x1d   :  { %p3200_p0 = por %p3199_p13, %p3198_p12 }
  0x1f   :  { %p3201_p1 = pnand %p3200_p0, %p3194_p11 }
  0x21   :  { %3204 = shalt.err (!%p3201_p1)
}
  0x22   :  { %s3257_s2 = smov 128   ;;  %s3258_s16 = smov 8  }
  0x23   :  { %26 = dma.hbm_to_vmem [thread:$0]  %s3511_s1, 65536, %s3295_s21, [#allocation3], %s3257_s2, %s3257_s2, %s3258_s16  }
  0x24   :  { %s3259_s19 = smov [#allocation7]   ;;  %s3205_s24 = scalar_lea.hbm %s3514_s4, 16 }
  0x25   :  { %s45_s20 = sshll.u32 %s3259_s19, 4  ;;  %p3206_p2 = scmp.ne.s32.totalorder %s3514_s4, %s3205_s24  ;;  %s46_s20 = int_to_ptr.vmem [resolvable:$true] %s45_s20 }
  0x26   :  { %p3209_p3 = scmp.lt.u32.totalorder %s3205_s24, %s3514_s4 }
  0x28   :  { %p3211_p4 = pnand %p3209_p3, %p3206_p2 }
  0x2a   :  { %3214 = shalt.err (!%p3211_p4)
}
  0x2b   :  { %s3215_s29 = scalar_lea.vmem %s46_s20, 16  ;;  %s3219_s1 = scalar_lea.vmem %s46_s20, 32 }
  0x2c   :  { %p3216_p5 = scmp.ne.s32.totalorder %s46_s20, %s3215_s29  ;;  %p3220_p6 = scmp.lt.s32.totalorder %s46_s20, %s46_s20 }
  0x2d   :  { %p3221_p7 = scmp.lt.s32.totalorder %s3219_s1, %s3215_s29 }
  0x2f   :  { %p3222_p8 = por %p3221_p7, %p3220_p6 }
  0x31   :  { %p3223_p9 = pnand %p3222_p8, %p3216_p5 }
  0x33   :  { %3226 = shalt.err (!%p3223_p9)
}
  0x34   :  { %48 = dma.hbm_to_vmem [thread:$0]  %s3514_s4, 16, %s46_s20, [#allocation6]  }
  0x35   :  { %3249 = dma.done.wait [#allocation3], 65536  }
  0x36   :  { %3250 = vsyncadd [#allocation3], 4294901760 }
  0x37   :  { %3251 = dma.done.wait [#allocation6], 32  }
  0x38   :  { %3252 = vsyncadd [#allocation6], 4294967264  ;;  %v82_v0 = vld [vmem:[#allocation2 + $0x80] sm:$0xff]  ;;  %v83_v1 = vld [vmem:[#allocation2 + $0x88] sm:$0xff]  ;;  %v3260_v47 = vmov 1983009808   ;;  %v597_v49 = vlaneseq }
  0x39   :  { %v66_v2 = vld [vmem:[#allocation2] sm:$0xff]  ;;  %v2607_v3 = vpack.c.bf16 %v83_v1, %v82_v0  ;;  %v67_v4 = vld [vmem:[#allocation2 + $0x8] sm:$0xff]  ;;  %v84_v11 = vld [vmem:[#allocation2 + $0x90] sm:$0xff]  ;;  %v595_v48 = vunpack.c.l.s4 %v3260_v47  ;;  %vm3262_vm0 = vmmov 0   ;;  %vm1975_vm1 = vcmask 74752  }
  0x3a   :  { %v114_v5 = vld [vmem:[#allocation2 + $0x180] sm:$0xff]  ;;  %v115_v6 = vld [vmem:[#allocation2 + $0x188] sm:$0xff]  ;;  %v2609_v7 = vpack.c.bf16 %v67_v4, %v66_v2  ;;  %v85_v13 = vld [vmem:[#allocation2 + $0x98] sm:$0xff]  ;;  %v598_v0 = vshrl.u32 %v597_v49, 7 }
  0x3b   :  { %v2639_v8 = vpack.c.bf16 %v115_v6, %v114_v5  ;;  %v98_v9 = vld [vmem:[#allocation2 + $0x100] sm:$0xff]  ;;  %v99_v10 = vld [vmem:[#allocation2 + $0x108] sm:$0xff]  ;;  %2608 = vmatprep.subr.bf16.mxu0 %v2607_v3  ;;  %v68_v14 = vld [vmem:[#allocation2 + $0x10] sm:$0xff]  ;;  %v2611_v16 = vpack.c.bf16 %v85_v13, %v84_v11  ;;  %v596_v63 = vunpack.c.0.s8 %v595_v48 }
  0x3c   :  { %v2641_v12 = vpack.c.bf16 %v99_v10, %v98_v9  ;;  %v69_v15 = vld [vmem:[#allocation2 + $0x18] sm:$0xff]  ;;  %2610 = vmatpush3.bf16.msra.mxu0 %v2609_v7  ;;  %v116_v18 = vld [vmem:[#allocation2 + $0x190] sm:$0xff]  ;;  %v86_v23 = vld [vmem:[#allocation2 + $0xa0] sm:$0xff] }
  0x3d   :  { %2640 = vmatprep.subr.bf16.mxu1 %v2639_v8  ;;  %v2613_v17 = vpack.c.bf16 %v69_v15, %v68_v14  ;;  %v117_v19 = vld [vmem:[#allocation2 + $0x198] sm:$0xff]  ;;  %v100_v20 = vld [vmem:[#allocation2 + $0x110] sm:$0xff]  ;;  %v87_v24 = vld [vmem:[#allocation2 + $0xa8] sm:$0xff]  ;;  %2612 = vmatprep.subr.bf16.mxu0 %v2611_v16  ;;  %v3338_v13 = vsub.s32 %v596_v63, %v598_v0 }
  0x3e   :  { %2642 = vmatpush3.bf16.msra.mxu1 %v2641_v12  ;;  %v2643_v21 = vpack.c.bf16 %v117_v19, %v116_v18  ;;  %v101_v22 = vld [vmem:[#allocation2 + $0x118] sm:$0xff]  ;;  %v2615_v26 = vpack.c.bf16 %v87_v24, %v86_v23  ;;  %v70_v27 = vld [vmem:[#allocation2 + $0x20] sm:$0xff]  ;;  %v71_v28 = vld [vmem:[#allocation2 + $0x28] sm:$0xff] }
  0x3f   :  { %v2645_v25 = vpack.c.bf16 %v101_v22, %v100_v20  ;;  %v118_v29 = vld [vmem:[#allocation2 + $0x1a0] sm:$0xff]  ;;  %v119_v30 = vld [vmem:[#allocation2 + $0x1a8] sm:$0xff]  ;;  %v2617_v33 = vpack.c.bf16 %v71_v28, %v70_v27  ;;  %v88_v35 = vld [vmem:[#allocation2 + $0xb0] sm:$0xff] }
  0x40   :  { %2644 = vmatprep.subr.bf16.mxu1 %v2643_v21  ;;  %v102_v31 = vld [vmem:[#allocation2 + $0x120] sm:$0xff]  ;;  %v103_v32 = vld [vmem:[#allocation2 + $0x128] sm:$0xff]  ;;  %2614 = vmatpush3.bf16.msra.mxu0 %v2613_v17  ;;  %v2647_v34 = vpack.c.bf16 %v119_v30, %v118_v29  ;;  %v89_v36 = vld [vmem:[#allocation2 + $0xb8] sm:$0xff] }
  0x41   :  { %v72_v37 = vld [vmem:[#allocation2 + $0x30] sm:$0xff]  ;;  %2616 = vmatprep.subr.bf16.mxu0 %v2615_v26  ;;  %v2649_v38 = vpack.c.bf16 %v103_v32, %v102_v31  ;;  %v2619_v39 = vpack.c.bf16 %v89_v36, %v88_v35  ;;  %v73_v40 = vld [vmem:[#allocation2 + $0x38] sm:$0xff]  ;;  %v90_v46 = vld [vmem:[#allocation2 + $0xc0] sm:$0xff] }
  0x42   :  { %2646 = vmatpush3.bf16.msra.mxu1 %v2645_v25  ;;  %v120_v41 = vld [vmem:[#allocation2 + $0x1b0] sm:$0xff]  ;;  %v121_v42 = vld [vmem:[#allocation2 + $0x1b8] sm:$0xff]  ;;  %v91_v50 = vld [vmem:[#allocation2 + $0xc8] sm:$0xff]  ;;  %v2621_v51 = vpack.c.bf16 %v73_v40, %v72_v37 }
  0x43   :  { %2648 = vmatprep.subr.bf16.mxu1 %v2647_v34  ;;  %v2651_v43 = vpack.c.bf16 %v121_v42, %v120_v41  ;;  %v104_v44 = vld [vmem:[#allocation2 + $0x130] sm:$0xff]  ;;  %v105_v45 = vld [vmem:[#allocation2 + $0x138] sm:$0xff]  ;;  %v122_v52 = vld [vmem:[#allocation2 + $0x1c0] sm:$0xff]  ;;  %v2623_v55 = vpack.c.bf16 %v91_v50, %v90_v46 }
  0x44   :  { %2618 = vmatpush3.bf16.msra.mxu0 %v2617_v33  ;;  %v123_v53 = vld [vmem:[#allocation2 + $0x1c8] sm:$0xff]  ;;  %v2653_v54 = vpack.c.bf16 %v105_v45, %v104_v44  ;;  %v74_v56 = vld [vmem:[#allocation2 + $0x40] sm:$0xff]  ;;  %v92_v61 = vld [vmem:[#allocation2 + $0xd0] sm:$0xff] }
  0x45   :  { %2620 = vmatprep.subr.bf16.mxu0 %v2619_v39  ;;  %v75_v57 = vld [vmem:[#allocation2 + $0x48] sm:$0xff]  ;;  %v106_v58 = vld [vmem:[#allocation2 + $0x140] sm:$0xff]  ;;  %v2655_v59 = vpack.c.bf16 %v123_v53, %v122_v52  ;;  %v93_v62 = vld [vmem:[#allocation2 + $0xd8] sm:$0xff] }
  0x46   :  { %2650 = vmatpush3.bf16.msra.mxu1 %v2649_v38  ;;  %v107_v60 = vld [vmem:[#allocation2 + $0x148] sm:$0xff]  ;;  %v124_v1 = vld [vmem:[#allocation2 + $0x1d0] sm:$0xff]  ;;  %v125_v2 = vld [vmem:[#allocation2 + $0x1d8] sm:$0xff]  ;;  %v2625_v3 = vpack.c.bf16 %v75_v57, %v74_v56  ;;  %v2627_v5 = vpack.c.bf16 %v93_v62, %v92_v61 }
  0x47   :  { %2652 = vmatprep.subr.bf16.mxu1 %v2651_v43  ;;  %v2657_v4 = vpack.c.bf16 %v107_v60, %v106_v58  ;;  %v76_v6 = vld [vmem:[#allocation2 + $0x50] sm:$0xff]  ;;  %v77_v7 = vld [vmem:[#allocation2 + $0x58] sm:$0xff]  ;;  %v2659_v9 = vpack.c.bf16 %v125_v2, %v124_v1  ;;  %v94_v11 = vld [vmem:[#allocation2 + $0xe0] sm:$0xff] }
  0x48   :  { %2622 = vmatpush3.bf16.msra.mxu0 %v2621_v51  ;;  %v108_v8 = vld [vmem:[#allocation2 + $0x150] sm:$0xff]  ;;  %v109_v10 = vld [vmem:[#allocation2 + $0x158] sm:$0xff]  ;;  %v95_v12 = vld [vmem:[#allocation2 + $0xe8] sm:$0xff]  ;;  %v2629_v16 = vpack.c.bf16 %v77_v7, %v76_v6 }
  0x49   :  { %2624 = vmatprep.subr.bf16.mxu0 %v2623_v55  ;;  %v126_v14 = vld [vmem:[#allocation2 + $0x1e0] sm:$0xff]  ;;  %v127_v15 = vld [vmem:[#allocation2 + $0x1e8] sm:$0xff]  ;;  %v2661_v18 = vpack.c.bf16 %v109_v10, %v108_v8  ;;  %v2631_v19 = vpack.c.bf16 %v95_v12, %v94_v11  ;;  %v96_v25 = vld [vmem:[#allocation2 + $0xf0] sm:$0xff] }
  0x4a   :  { %2654 = vmatpush3.bf16.msra.mxu1 %v2653_v54  ;;  %v78_v17 = vld [vmem:[#allocation2 + $0x60] sm:$0xff]  ;;  %v79_v20 = vld [vmem:[#allocation2 + $0x68] sm:$0xff]  ;;  %v2663_v23 = vpack.c.bf16 %v127_v15, %v126_v14  ;;  %v97_v26 = vld [vmem:[#allocation2 + $0xf8] sm:$0xff] }
  0x4b   :  { %2656 = vmatprep.subr.bf16.mxu1 %v2655_v59  ;;  %v110_v21 = vld [vmem:[#allocation2 + $0x160] sm:$0xff]  ;;  %v111_v24 = vld [vmem:[#allocation2 + $0x168] sm:$0xff]  ;;  %v128_v29 = vld [vmem:[#allocation2 + $0x1f0] sm:$0xff]  ;;  %v2633_v31 = vpack.c.bf16 %v79_v20, %v78_v17  ;;  %v2635_v35 = vpack.c.bf16 %v97_v26, %v96_v25 }
  0x4c   :  { %2626 = vmatpush3.bf16.msra.mxu0 %v2625_v3  ;;  %v58_v22 = vld [vmem:[%s3510_s0] sm:$0xff]  ;;  %v129_v30 = vld [vmem:[#allocation2 + $0x1f8] sm:$0xff]  ;;  %v2665_v34 = vpack.c.bf16 %v111_v24, %v110_v21  ;;  %v80_v36 = vld [vmem:[#allocation2 + $0x70] sm:$0xff] }
  0x4d   :  { %2628 = vmatprep.subr.bf16.mxu0 %v2627_v5  ;;  %v600_v27 = vrot.slane %v58_v22, %v3338_v13  ;;  %v593_v28 = vcombine.high %v58_v22, %v58_v22  ;;  %v81_v37 = vld [vmem:[#allocation2 + $0x78] sm:$0xff]  ;;  %v112_v38 = vld [vmem:[#allocation2 + $0x170] sm:$0xff]  ;;  %v2667_v39 = vpack.c.bf16 %v129_v30, %v128_v29  ;;  %v146_v41 = vld [vmem:[#allocation2 + $0x280] sm:$0xff] }
  0x4e   :  { %2658 = vmatpush3.bf16.msra.mxu1 %v2657_v4  ;;  %v113_v40 = vld [vmem:[#allocation2 + $0x178] sm:$0xff]  ;;  %v147_v42 = vld [vmem:[#allocation2 + $0x288] sm:$0xff]  ;;  %v178_v44 = vld [vmem:[#allocation2 + $0x380] sm:$0xff]  ;;  %v2637_v46 = vpack.c.bf16 %v81_v37, %v80_v36 }
  0x4f   :  { %2660 = vmatprep.subr.bf16.mxu1 %v2659_v9  ;;  %v608_v32 = vcombine.high %v600_v27, %v600_v27  ;;  %v607_v33 = vrot.slane %v593_v28, %v3338_v13  ;;  %v179_v45 = vld [vmem:[#allocation2 + $0x388] sm:$0xff]  ;;  %v2669_v47 = vpack.c.bf16 %v113_v40, %v112_v38  ;;  %v2671_v48 = vpack.c.bf16 %v147_v42, %v146_v41  ;;  %v130_v49 = vld [vmem:[#allocation2 + $0x200] sm:$0xff]  ;;  %v148_v54 = vld [vmem:[#allocation2 + $0x290] sm:$0xff] }
  0x50   :  { %2630 = vmatpush3.bf16.msra.mxu0 %v2629_v16  ;;  %v131_v50 = vld [vmem:[#allocation2 + $0x208] sm:$0xff]  ;;  %v162_v51 = vld [vmem:[#allocation2 + $0x300] sm:$0xff]  ;;  %v2703_v52 = vpack.c.bf16 %v179_v45, %v178_v44  ;;  %v149_v55 = vld [vmem:[#allocation2 + $0x298] sm:$0xff] }
  0x51   :  { %2632 = vmatprep.subr.bf16.mxu0 %v2631_v19  ;;  %825 = vmatprep.mubr.f32.mxu0 %v608_v32  ;;  %v609_v43 = vcombine.high %v607_v33, %v607_v33  ;;  %v163_v53 = vld [vmem:[#allocation2 + $0x308] sm:$0xff]  ;;  %v180_v56 = vld [vmem:[#allocation2 + $0x390] sm:$0xff]  ;;  %v181_v57 = vld [vmem:[#allocation2 + $0x398] sm:$0xff]  ;;  %v2673_v58 = vpack.c.bf16 %v131_v50, %v130_v49  ;;  %v2675_v60 = vpack.c.bf16 %v149_v55, %v148_v54 }
  0x52   :  { %2662 = vmatpush3.bf16.msra.mxu1 %v2661_v18  ;;  %v2705_v59 = vpack.c.bf16 %v163_v53, %v162_v51  ;;  %v132_v61 = vld [vmem:[#allocation2 + $0x210] sm:$0xff]  ;;  %v133_v62 = vld [vmem:[#allocation2 + $0x218] sm:$0xff]  ;;  %v2707_v0 = vpack.c.bf16 %v181_v57, %v180_v56  ;;  %v150_v2 = vld [vmem:[#allocation2 + $0x2a0] sm:$0xff] }
  0x53   :  { %2664 = vmatprep.subr.bf16.mxu1 %v2663_v23  ;;  %895 = vmatprep.mubr.f32.mxu1 %v609_v43  ;;  %v164_v63 = vld [vmem:[#allocation2 + $0x310] sm:$0xff]  ;;  %v165_v1 = vld [vmem:[#allocation2 + $0x318] sm:$0xff]  ;;  %v151_v3 = vld [vmem:[#allocation2 + $0x2a8] sm:$0xff]  ;;  %v2677_v6 = vpack.c.bf16 %v133_v62, %v132_v61 }
  0x54   :  { %2634 = vmatpush3.bf16.msra.mxu0 %v2633_v31  ;;  %v182_v4 = vld [vmem:[#allocation2 + $0x3a0] sm:$0xff]  ;;  %v183_v5 = vld [vmem:[#allocation2 + $0x3a8] sm:$0xff]  ;;  %v2709_v7 = vpack.c.bf16 %v165_v1, %v164_v63  ;;  %v2679_v8 = vpack.c.bf16 %v151_v3, %v150_v2  ;;  %v152_v15 = vld [vmem:[#allocation2 + $0x2b0] sm:$0xff] }
  0x55   :  { %2636 = vmatprep.subr.bf16.mxu0 %v2635_v35  ;;  %v134_v9 = vld [vmem:[#allocation2 + $0x220] sm:$0xff]  ;;  %v135_v10 = vld [vmem:[#allocation2 + $0x228] sm:$0xff]  ;;  %v2711_v12 = vpack.c.bf16 %v183_v5, %v182_v4  ;;  %v153_v16 = vld [vmem:[#allocation2 + $0x2b8] sm:$0xff] }
  0x56   :  { %2666 = vmatpush3.bf16.msra.mxu1 %v2665_v34  ;;  %v166_v11 = vld [vmem:[#allocation2 + $0x320] sm:$0xff]  ;;  %v167_v14 = vld [vmem:[#allocation2 + $0x328] sm:$0xff]  ;;  %v184_v17 = vld [vmem:[#allocation2 + $0x3b0] sm:$0xff]  ;;  %v2681_v19 = vpack.c.bf16 %v135_v10, %v134_v9  ;;  %v2683_v21 = vpack.c.bf16 %v153_v16, %v152_v15 }
  0x57   :  { %2668 = vmatprep.subr.bf16.mxu1 %v2667_v39  ;;  %v185_v18 = vld [vmem:[#allocation2 + $0x3b8] sm:$0xff]  ;;  %v2713_v20 = vpack.c.bf16 %v167_v14, %v166_v11  ;;  %v136_v22 = vld [vmem:[#allocation2 + $0x230] sm:$0xff]  ;;  %v155_v28 = vld [vmem:[#allocation2 + $0x2c8] sm:$0xff] }
  0x58   :  { %2638 = vmatpush3.bf16.msra.mxu0 %v2637_v46  ;;  %v137_v23 = vld [vmem:[#allocation2 + $0x238] sm:$0xff]  ;;  %v168_v24 = vld [vmem:[#allocation2 + $0x330] sm:$0xff]  ;;  %v2715_v25 = vpack.c.bf16 %v185_v18, %v184_v17  ;;  %v186_v29 = vld [vmem:[#allocation2 + $0x3c0] sm:$0xff] }
  0x59   :  { %2672 = vmatprep.subr.bf16.mxu0 %v2671_v48  ;;  %v169_v26 = vld [vmem:[#allocation2 + $0x338] sm:$0xff]  ;;  %v187_v30 = vld [vmem:[#allocation2 + $0x3c8] sm:$0xff]  ;;  %v2685_v32 = vpack.c.bf16 %v137_v23, %v136_v22  ;;  %v138_v37 = vld [vmem:[#allocation2 + $0x240] sm:$0xff] }
  0x5a   :  { %2670 = vmatpush3.bf16.msra.mxu1 %v2669_v47  ;;  %v59_v31 = vld [vmem:[%s3510_s0 + $0x8] sm:$0xff]  ;;  %v2717_v35 = vpack.c.bf16 %v169_v26, %v168_v24  ;;  %v170_v39 = vld [vmem:[#allocation2 + $0x340] sm:$0xff]  ;;  %v2719_v40 = vpack.c.bf16 %v187_v30, %v186_v29  ;;  %v156_v42 = vld [vmem:[#allocation2 + $0x2d0] sm:$0xff] }
  0x5b   :  { %2704 = vmatprep.subr.bf16.mxu1 %v2703_v52  ;;  %826 = vmatmul.mubr.f32.vlgmr.msra.gmra.mrb[0].mxu0 %v600_v27  ;;  %v154_v27 = vld [vmem:[#allocation2 + $0x2c0] sm:$0xff]  ;;  %v610_v34 = vcombine.high %v59_v31, %v59_v31  ;;  %v139_v38 = vld [vmem:[#allocation2 + $0x248] sm:$0xff]  ;;  %v157_v43 = vld [vmem:[#allocation2 + $0x2d8] sm:$0xff] }
  0x5c   :  { %2674 = vmatpush3.bf16.msra.mxu0 %v2673_v58  ;;  %v2687_v36 = vpack.c.bf16 %v155_v28, %v154_v27  ;;  %v171_v41 = vld [vmem:[#allocation2 + $0x348] sm:$0xff]  ;;  %v188_v46 = vld [vmem:[#allocation2 + $0x3d0] sm:$0xff]  ;;  %v189_v47 = vld [vmem:[#allocation2 + $0x3d8] sm:$0xff]  ;;  %v2689_v48 = vpack.c.bf16 %v139_v38, %v138_v37  ;;  %v2691_v51 = vpack.c.bf16 %v157_v43, %v156_v42 }
  0x5d   :  { %896 = vmatmul.mubr.f32.vlgmr.msra.gmra.mrb[0].mxu1 %v607_v33  ;;  %2676 = vmatprep.subr.bf16.mxu0 %v2675_v60  ;;  %v3349_v33 = vrot.slane %v59_v31, %v3338_v13  ;;  %v3354_v45 = vrot.slane %v610_v34, %v3338_v13  ;;  %v2721_v50 = vpack.c.bf16 %v171_v41, %v170_v39  ;;  %v140_v52 = vld [vmem:[#allocation2 + $0x250] sm:$0xff]  ;;  %v141_v53 = vld [vmem:[#allocation2 + $0x258] sm:$0xff]  ;;  %v158_v57 = vld [vmem:[#allocation2 + $0x2e0] sm:$0xff] }
  0x5e   :  { %2706 = vmatpush3.bf16.msra.mxu1 %v2705_v59  ;;  %v172_v54 = vld [vmem:[#allocation2 + $0x350] sm:$0xff]  ;;  %v2723_v55 = vpack.c.bf16 %v189_v47, %v188_v46  ;;  %v173_v56 = vld [vmem:[#allocation2 + $0x358] sm:$0xff]  ;;  %v159_v58 = vld [vmem:[#allocation2 + $0x2e8] sm:$0xff]  ;;  %v2693_v61 = vpack.c.bf16 %v141_v53, %v140_v52 }
  0x5f   :  { %2708 = vmatprep.subr.bf16.mxu1 %v2707_v0  ;;  %v625_v44 = vcombine.high %v3349_v33, %v3349_v33  ;;  %v626_v49 = vcombine.high %v3354_v45, %v3354_v45  ;;  %v190_v59 = vld [vmem:[#allocation2 + $0x3e0] sm:$0xff]  ;;  %v191_v60 = vld [vmem:[#allocation2 + $0x3e8] sm:$0xff]  ;;  %v2725_v62 = vpack.c.bf16 %v173_v56, %v172_v54  ;;  %v2695_v63 = vpack.c.bf16 %v159_v58, %v158_v57  ;;  %v160_v5 = vld [vmem:[#allocation2 + $0x2f0] sm:$0xff] }
  0x60   :  { %2678 = vmatpush3.bf16.msra.mxu0 %v2677_v6  ;;  %v142_v0 = vld [vmem:[#allocation2 + $0x260] sm:$0xff]  ;;  %v143_v1 = vld [vmem:[#allocation2 + $0x268] sm:$0xff]  ;;  %v2727_v3 = vpack.c.bf16 %v191_v60, %v190_v59  ;;  %v161_v6 = vld [vmem:[#allocation2 + $0x2f8] sm:$0xff] }
  0x61   :  { %2680 = vmatprep.subr.bf16.mxu0 %v2679_v8  ;;  %965 = vmatprep.mubr.f32.mxu0 %v625_v44  ;;  %v174_v2 = vld [vmem:[#allocation2 + $0x360] sm:$0xff]  ;;  %v175_v4 = vld [vmem:[#allocation2 + $0x368] sm:$0xff]  ;;  %v193_v8 = vld [vmem:[#allocation2 + $0x3f8] sm:$0xff]  ;;  %v2697_v9 = vpack.c.bf16 %v143_v1, %v142_v0  ;;  %v2699_v11 = vpack.c.bf16 %v161_v6, %v160_v5 }
  0x62   :  { %2710 = vmatpush3.bf16.msra.mxu1 %v2709_v7  ;;  %1035 = vmatprep.mubr.f32.mxu1 %v626_v49  ;;  %v192_v7 = vld [vmem:[#allocation2 + $0x3f0] sm:$0xff]  ;;  %v2729_v10 = vpack.c.bf16 %v175_v4, %v174_v2  ;;  %v145_v14 = vld [vmem:[#allocation2 + $0x278] sm:$0xff]  ;;  %v210_v18 = vld [vmem:[#allocation2 + $0x480] sm:$0xff] }
  0x63   :  { %2712 = vmatprep.subr.bf16.mxu1 %v2711_v12  ;;  %v144_v12 = vld [vmem:[#allocation2 + $0x270] sm:$0xff]  ;;  %v2731_v16 = vpack.c.bf16 %v193_v8, %v192_v7  ;;  %v177_v17 = vld [vmem:[#allocation2 + $0x378] sm:$0xff]  ;;  %v194_v23 = vld [vmem:[#allocation2 + $0x400] sm:$0xff] }
  0x64   :  { %2682 = vmatpush3.bf16.msra.mxu0 %v2681_v19  ;;  %v176_v15 = vld [vmem:[#allocation2 + $0x370] sm:$0xff]  ;;  %v211_v19 = vld [vmem:[#allocation2 + $0x488] sm:$0xff]  ;;  %v2701_v22 = vpack.c.bf16 %v145_v14, %v144_v12  ;;  %v226_v27 = vld [vmem:[#allocation2 + $0x500] sm:$0xff] }
  0x65   :  { %2684 = vmatprep.subr.bf16.mxu0 %v2683_v21  ;;  %v243_v21 = vld [vmem:[#allocation2 + $0x588] sm:$0xff]  ;;  %v2733_v24 = vpack.c.bf16 %v177_v17, %v176_v15  ;;  %v212_v30 = vld [vmem:[#allocation2 + $0x490] sm:$0xff]  ;;  %v213_v31 = vld [vmem:[#allocation2 + $0x498] sm:$0xff] }
  0x66   :  { %2714 = vmatpush3.bf16.msra.mxu1 %v2713_v20  ;;  %v242_v20 = vld [vmem:[#allocation2 + $0x580] sm:$0xff]  ;;  %v195_v26 = vld [vmem:[#allocation2 + $0x408] sm:$0xff]  ;;  %v245_v34 = vld [vmem:[#allocation2 + $0x598] sm:$0xff]  ;;  %v2739_v38 = vpack.c.bf16 %v213_v31, %v212_v30 }
  0x67   :  { %2716 = vmatprep.subr.bf16.mxu1 %v2715_v25  ;;  %v2735_v25 = vpack.c.bf16 %v211_v19, %v210_v18  ;;  %v227_v28 = vld [vmem:[#allocation2 + $0x508] sm:$0xff]  ;;  %v2767_v29 = vpack.c.bf16 %v243_v21, %v242_v20  ;;  %v60_v37 = vld [vmem:[%s3510_s0 + $0x10] sm:$0xff]  ;;  %v229_v46 = vld [vmem:[#allocation2 + $0x518] sm:$0xff] }
  0x68   :  { %2686 = vmatpush3.bf16.msra.mxu0 %v2685_v32  ;;  %v244_v32 = vld [vmem:[#allocation2 + $0x590] sm:$0xff]  ;;  %v3362_v42 = vrot.slane %v60_v37, %v3338_v13  ;;  %v627_v43 = vcombine.high %v60_v37, %v60_v37  ;;  %v214_v47 = vld [vmem:[#allocation2 + $0x4a0] sm:$0xff]  ;;  %v199_v57 = vld [vmem:[#allocation2 + $0x428] sm:$0xff] }
  0x69   :  { %2688 = vmatprep.subr.bf16.mxu0 %v2687_v36  ;;  %v2769_v36 = vpack.c.bf16 %v227_v28, %v226_v27  ;;  %v196_v39 = vld [vmem:[#allocation2 + $0x410] sm:$0xff]  ;;  %v2771_v44 = vpack.c.bf16 %v245_v34, %v244_v32  ;;  %v246_v49 = vld [vmem:[#allocation2 + $0x5a0] sm:$0xff]  ;;  %v231_v60 = vld [vmem:[#allocation2 + $0x528] sm:$0xff] }
  0x6a   :  { %2718 = vmatpush3.bf16.msra.mxu1 %v2717_v35  ;;  %v2737_v35 = vpack.c.bf16 %v195_v26, %v194_v23  ;;  %v228_v41 = vld [vmem:[#allocation2 + $0x510] sm:$0xff]  ;;  %v3368_v52 = vrot.slane %v627_v43, %v3338_v13  ;;  %v198_v56 = vld [vmem:[#allocation2 + $0x420] sm:$0xff]  ;;  %v249_v0 = vld [vmem:[#allocation2 + $0x5b8] sm:$0xff] }
  0x6b   :  { %2720 = vmatprep.subr.bf16.mxu1 %v2719_v40  ;;  %v197_v40 = vld [vmem:[#allocation2 + $0x418] sm:$0xff]  ;;  %v2773_v54 = vpack.c.bf16 %v229_v46, %v228_v41  ;;  %v230_v58 = vld [vmem:[#allocation2 + $0x520] sm:$0xff]  ;;  %v232_v5 = vld [vmem:[#allocation2 + $0x530] sm:$0xff] }
  0x6c   :  { %2690 = vmatpush3.bf16.msra.mxu0 %v2689_v48  ;;  %v215_v48 = vld [vmem:[#allocation2 + $0x4a8] sm:$0xff]  ;;  %v2741_v53 = vpack.c.bf16 %v197_v40, %v196_v39  ;;  %v2777_v1 = vpack.c.bf16 %v231_v60, %v230_v58  ;;  %v201_v4 = vld [vmem:[#allocation2 + $0x438] sm:$0xff]  ;;  %v218_v8 = vld [vmem:[#allocation2 + $0x4c0] sm:$0xff] }
  0x6d   :  { %2692 = vmatprep.subr.bf16.mxu0 %v2691_v51  ;;  %v642_v51 = vcombine.high %v3362_v42, %v3362_v42  ;;  %v233_v7 = vld [vmem:[#allocation2 + $0x538] sm:$0xff]  ;;  %v203_v17 = vld [vmem:[#allocation2 + $0x448] sm:$0xff]  ;;  %v234_v18 = vld [vmem:[#allocation2 + $0x540] sm:$0xff] }
  0x6e   :  { %2722 = vmatpush3.bf16.msra.mxu1 %v2721_v50  ;;  %v247_v50 = vld [vmem:[#allocation2 + $0x5a8] sm:$0xff]  ;;  %v2781_v14 = vpack.c.bf16 %v233_v7, %v232_v5  ;;  %v220_v21 = vld [vmem:[#allocation2 + $0x4d0] sm:$0xff]  ;;  %v237_v32 = vld [vmem:[#allocation2 + $0x558] sm:$0xff] }
  0x6f   :  { %2724 = vmatprep.subr.bf16.mxu1 %v2723_v55  ;;  %v2743_v55 = vpack.c.bf16 %v215_v48, %v214_v47  ;;  %v2775_v59 = vpack.c.bf16 %v247_v50, %v246_v49  ;;  %v235_v20 = vld [vmem:[#allocation2 + $0x548] sm:$0xff]  ;;  %v252_v23 = vld [vmem:[#allocation2 + $0x5d0] sm:$0xff]  ;;  %v222_v34 = vld [vmem:[#allocation2 + $0x4e0] sm:$0xff] }
  0x70   :  { %2694 = vmatpush3.bf16.msra.mxu0 %v2693_v61  ;;  %v216_v61 = vld [vmem:[#allocation2 + $0x4b0] sm:$0xff]  ;;  %v2785_v26 = vpack.c.bf16 %v235_v20, %v234_v18  ;;  %v255_v37 = vld [vmem:[#allocation2 + $0x5e8] sm:$0xff]  ;;  %v206_v41 = vld [vmem:[#allocation2 + $0x460] sm:$0xff] }
  0x71   :  { %2696 = vmatprep.subr.bf16.mxu0 %v2695_v63  ;;  %v248_v63 = vld [vmem:[#allocation2 + $0x5b0] sm:$0xff]  ;;  %v207_v43 = vld [vmem:[#allocation2 + $0x468] sm:$0xff]  ;;  %v225_v49 = vld [vmem:[#allocation2 + $0x4f8] sm:$0xff] }
  0x72   :  { %2726 = vmatpush3.bf16.msra.mxu1 %v2725_v62  ;;  %v217_v62 = vld [vmem:[#allocation2 + $0x4b8] sm:$0xff]  ;;  %v2779_v6 = vpack.c.bf16 %v249_v0, %v248_v63  ;;  %v204_v28 = vld [vmem:[#allocation2 + $0x450] sm:$0xff]  ;;  %v239_v47 = vld [vmem:[#allocation2 + $0x568] sm:$0xff] }
  0x73   :  { %2728 = vmatprep.subr.bf16.mxu1 %v2727_v3  ;;  %v2747_v2 = vpack.c.bf16 %v217_v62, %v216_v61  ;;  %v200_v3 = vld [vmem:[#allocation2 + $0x430] sm:$0xff]  ;;  %v209_v58 = vld [vmem:[#allocation2 + $0x478] sm:$0xff]  ;;  %v274_v61 = vld [vmem:[#allocation2 + $0x680] sm:$0xff] }
  0x74   :  { %2698 = vmatpush3.bf16.msra.mxu0 %v2697_v9  ;;  %v219_v9 = vld [vmem:[#allocation2 + $0x4c8] sm:$0xff]  ;;  %v2749_v12 = vpack.c.bf16 %v201_v4, %v200_v3  ;;  %v236_v30 = vld [vmem:[#allocation2 + $0x550] sm:$0xff]  ;;  %v241_v60 = vld [vmem:[#allocation2 + $0x578] sm:$0xff] }
  0x75   :  { %2700 = vmatprep.subr.bf16.mxu0 %v2699_v11  ;;  %v251_v11 = vld [vmem:[#allocation2 + $0x5c8] sm:$0xff]  ;;  %v2751_v15 = vpack.c.bf16 %v219_v9, %v218_v8  ;;  %v2789_v39 = vpack.c.bf16 %v237_v32, %v236_v30  ;;  %v224_v48 = vld [vmem:[#allocation2 + $0x4f0] sm:$0xff]  ;;  %v306_v63 = vld [vmem:[#allocation2 + $0x780] sm:$0xff] }
  0x76   :  { %2730 = vmatpush3.bf16.msra.mxu1 %v2729_v10  ;;  %v250_v10 = vld [vmem:[#allocation2 + $0x5c0] sm:$0xff]  ;;  %v256_v50 = vld [vmem:[#allocation2 + $0x5f0] sm:$0xff]  ;;  %v275_v62 = vld [vmem:[#allocation2 + $0x688] sm:$0xff] }
  0x77   :  { %2732 = vmatprep.subr.bf16.mxu1 %v2731_v16  ;;  %v202_v16 = vld [vmem:[#allocation2 + $0x440] sm:$0xff]  ;;  %v2783_v19 = vpack.c.bf16 %v251_v11, %v250_v10  ;;  %v307_v0 = vld [vmem:[#allocation2 + $0x788] sm:$0xff]  ;;  %v2799_v3 = vpack.c.bf16 %v275_v62, %v274_v61  ;;  %v276_v9 = vld [vmem:[#allocation2 + $0x690] sm:$0xff] }
  0x78   :  { %2702 = vmatpush3.bf16.msra.mxu0 %v2701_v22  ;;  %v221_v22 = vld [vmem:[#allocation2 + $0x4d8] sm:$0xff]  ;;  %v258_v4 = vld [vmem:[#allocation2 + $0x600] sm:$0xff]  ;;  %v259_v5 = vld [vmem:[#allocation2 + $0x608] sm:$0xff]  ;;  %v2831_v7 = vpack.c.bf16 %v307_v0, %v306_v63 }
  0x79   :  { %2736 = vmatprep.subr.bf16.mxu0 %v2735_v25  ;;  %v2753_v25 = vpack.c.bf16 %v203_v17, %v202_v16  ;;  %v2755_v27 = vpack.c.bf16 %v221_v22, %v220_v21  ;;  %v291_v8 = vld [vmem:[#allocation2 + $0x708] sm:$0xff]  ;;  %v277_v10 = vld [vmem:[#allocation2 + $0x698] sm:$0xff]  ;;  %v2801_v16 = vpack.c.bf16 %v259_v5, %v258_v4  ;;  %v292_v21 = vld [vmem:[#allocation2 + $0x710] sm:$0xff] }
  0x7a   :  { %2734 = vmatpush3.bf16.msra.mxu1 %v2733_v24  ;;  %v253_v24 = vld [vmem:[#allocation2 + $0x5d8] sm:$0xff]  ;;  %v2803_v18 = vpack.c.bf16 %v277_v10, %v276_v9  ;;  %v299_v62 = vld [vmem:[#allocation2 + $0x748] sm:$0xff]  ;;  %v284_v63 = vld [vmem:[#allocation2 + $0x6d0] sm:$0xff] }
  0x7b   :  { %2768 = vmatprep.subr.bf16.mxu1 %v2767_v29  ;;  %966 = vmatmul.mubr.f32.vlgmr.msra.gmra.mrb[2].mxu0 %v3349_v33  ;;  %v643_v33 = vcombine.high %v3368_v52, %v3368_v52  ;;  %v205_v29 = vld [vmem:[#allocation2 + $0x458] sm:$0xff]  ;;  %v2787_v31 = vpack.c.bf16 %v253_v24, %v252_v23  ;;  %v278_v24 = vld [vmem:[#allocation2 + $0x6a0] sm:$0xff]  ;;  %v268_v5 = vld [vmem:[#allocation2 + $0x650] sm:$0xff] }
  0x7c   :  { %2738 = vmatpush3.bf16.msra.mxu0 %v2737_v35  ;;  %1105 = vmatprep.mubr.f32.mxu0 %v642_v51  ;;  %v223_v35 = vld [vmem:[#allocation2 + $0x4e8] sm:$0xff]  ;;  %v257_v51 = vld [vmem:[#allocation2 + $0x5f8] sm:$0xff]  ;;  %v286_v10 = vld [vmem:[#allocation2 + $0x6e0] sm:$0xff] }
  0x7d   :  { %1036 = vmatmul.mubr.f32.vlgmr.msra.gmra.mrb[2].mxu1 %v3354_v45  ;;  %2740 = vmatprep.subr.bf16.mxu0 %v2739_v38  ;;  %v2745_v45 = vpack.c.bf16 %v199_v57, %v198_v56  ;;  %v2757_v38 = vpack.c.bf16 %v205_v29, %v204_v28  ;;  %v2759_v40 = vpack.c.bf16 %v223_v35, %v222_v34  ;;  %v208_v57 = vld [vmem:[#allocation2 + $0x470] sm:$0xff]  ;;  %v261_v20 = vld [vmem:[#allocation2 + $0x618] sm:$0xff]  ;;  %v311_v28 = vld [vmem:[#allocation2 + $0x7a8] sm:$0xff] }
  0x7e   :  { %2770 = vmatpush3.bf16.msra.mxu1 %v2769_v36  ;;  %1175 = vmatprep.mubr.f32.mxu1 %v643_v33  ;;  %v254_v36 = vld [vmem:[#allocation2 + $0x5e0] sm:$0xff]  ;;  %v2763_v56 = vpack.c.bf16 %v225_v49, %v224_v48  ;;  %v240_v33 = vld [vmem:[#allocation2 + $0x570] sm:$0xff]  ;;  %v293_v23 = vld [vmem:[#allocation2 + $0x718] sm:$0xff] }
  0x7f   :  { %2772 = vmatprep.subr.bf16.mxu1 %v2771_v44  ;;  %v238_v44 = vld [vmem:[#allocation2 + $0x560] sm:$0xff]  ;;  %v2791_v46 = vpack.c.bf16 %v255_v37, %v254_v36  ;;  %v263_v35 = vld [vmem:[#allocation2 + $0x628] sm:$0xff]  ;;  %v296_v48 = vld [vmem:[#allocation2 + $0x730] sm:$0xff] }
  0x80   :  { %2742 = vmatpush3.bf16.msra.mxu0 %v2741_v53  ;;  %v2761_v53 = vpack.c.bf16 %v207_v43, %v206_v41  ;;  %v262_v34 = vld [vmem:[#allocation2 + $0x620] sm:$0xff]  ;;  %v313_v41 = vld [vmem:[#allocation2 + $0x7b8] sm:$0xff] }
  0x81   :  { %2744 = vmatprep.subr.bf16.mxu0 %v2743_v55  ;;  %v2793_v55 = vpack.c.bf16 %v239_v47, %v238_v44  ;;  %v294_v36 = vld [vmem:[#allocation2 + $0x720] sm:$0xff]  ;;  %v2809_v43 = vpack.c.bf16 %v263_v35, %v262_v34  ;;  %v265_v47 = vld [vmem:[#allocation2 + $0x638] sm:$0xff]  ;;  %v272_v34 = vld [vmem:[#allocation2 + $0x670] sm:$0xff] }
  0x82   :  { %2774 = vmatpush3.bf16.msra.mxu1 %v2773_v54  ;;  %v61_v54 = vld [vmem:[%s3510_s0 + $0x18] sm:$0xff] }
  0x83   :  { %2776 = vmatprep.subr.bf16.mxu1 %v2775_v59  ;;  %v2795_v59 = vpack.c.bf16 %v257_v51, %v256_v50  ;;  %v3377_v11 = vrot.slane %v61_v54, %v3338_v13  ;;  %v297_v50 = vld [vmem:[#allocation2 + $0x738] sm:$0xff]  ;;  %v282_v51 = vld [vmem:[#allocation2 + $0x6c0] sm:$0xff] }
  0x84   :  { %2746 = vmatpush3.bf16.msra.mxu0 %v2745_v45  ;;  %v644_v45 = vcombine.high %v61_v54, %v61_v54  ;;  %v314_v54 = vld [vmem:[#allocation2 + $0x7c0] sm:$0xff]  ;;  %v285_v0 = vld [vmem:[#allocation2 + $0x6d8] sm:$0xff] }
  0x85   :  { %2748 = vmatprep.subr.bf16.mxu0 %v2747_v2  ;;  %v2797_v2 = vpack.c.bf16 %v241_v60, %v240_v33  ;;  %v266_v33 = vld [vmem:[#allocation2 + $0x640] sm:$0xff]  ;;  %v2819_v4 = vpack.c.bf16 %v285_v0, %v284_v63  ;;  %v301_v9 = vld [vmem:[#allocation2 + $0x758] sm:$0xff]  ;;  %v356_v63 = vld [vmem:[#allocation2 + $0x910] sm:$0xff] }
  0x86   :  { %2778 = vmatpush3.bf16.msra.mxu1 %v2777_v1  ;;  %v2765_v1 = vpack.c.bf16 %v209_v58, %v208_v57  ;;  %v2845_v57 = vpack.c.bf16 %v297_v50, %v296_v48  ;;  %v298_v60 = vld [vmem:[#allocation2 + $0x740] sm:$0xff]  ;;  %v273_v35 = vld [vmem:[#allocation2 + $0x678] sm:$0xff]  ;;  %v323_v48 = vld [vmem:[#allocation2 + $0x808] sm:$0xff] }
  0x87   :  { %2780 = vmatprep.subr.bf16.mxu1 %v2779_v6  ;;  %v290_v6 = vld [vmem:[#allocation2 + $0x700] sm:$0xff] }
  0x88   :  { %2750 = vmatpush3.bf16.msra.mxu0 %v2749_v12  ;;  %v308_v12 = vld [vmem:[#allocation2 + $0x790] sm:$0xff]  ;;  %v2833_v17 = vpack.c.bf16 %v291_v8, %v290_v6  ;;  %v269_v6 = vld [vmem:[#allocation2 + $0x658] sm:$0xff] }
  0x89   :  { %2752 = vmatprep.subr.bf16.mxu0 %v2751_v15  ;;  %v3380_v15 = vrot.slane %v644_v45, %v3338_v13  ;;  %v316_v45 = vld [vmem:[#allocation2 + $0x7d0] sm:$0xff] }
  0x8a   :  { %2782 = vmatpush3.bf16.msra.mxu1 %v2781_v14  ;;  %v309_v14 = vld [vmem:[#allocation2 + $0x798] sm:$0xff] }
  0x8b   :  { %2784 = vmatprep.subr.bf16.mxu1 %v2783_v19  ;;  %v260_v19 = vld [vmem:[#allocation2 + $0x610] sm:$0xff]  ;;  %v2835_v22 = vpack.c.bf16 %v309_v14, %v308_v12  ;;  %v660_v29 = vcombine.high %v3380_v15, %v3380_v15  ;;  %v287_v12 = vld [vmem:[#allocation2 + $0x6e8] sm:$0xff]  ;;  %v318_v14 = vld [vmem:[#allocation2 + $0x7e0] sm:$0xff] }
  0x8c   :  { %2754 = vmatpush3.bf16.msra.mxu0 %v2753_v25  ;;  %v279_v25 = vld [vmem:[#allocation2 + $0x6a8] sm:$0xff]  ;;  %v2805_v30 = vpack.c.bf16 %v261_v20, %v260_v19  ;;  %v2823_v19 = vpack.c.bf16 %v287_v12, %v286_v10  ;;  %v270_v20 = vld [vmem:[#allocation2 + $0x660] sm:$0xff] }
  0x8d   :  { %2756 = vmatprep.subr.bf16.mxu0 %v2755_v27  ;;  %v310_v27 = vld [vmem:[#allocation2 + $0x7a0] sm:$0xff]  ;;  %v2807_v32 = vpack.c.bf16 %v279_v25, %v278_v24  ;;  %v303_v24 = vld [vmem:[#allocation2 + $0x768] sm:$0xff]  ;;  %v288_v25 = vld [vmem:[#allocation2 + $0x6f0] sm:$0xff] }
  0x8e   :  { %2786 = vmatpush3.bf16.msra.mxu1 %v2785_v26  ;;  %v659_v26 = vcombine.high %v3377_v11, %v3377_v11  ;;  %v2839_v37 = vpack.c.bf16 %v311_v28, %v310_v27  ;;  %v320_v27 = vld [vmem:[#allocation2 + $0x7f0] sm:$0xff]  ;;  %v321_v28 = vld [vmem:[#allocation2 + $0x7f8] sm:$0xff]  ;;  %v326_v10 = vld [vmem:[#allocation2 + $0x820] sm:$0xff] }
  0x8f   :  { %2788 = vmatprep.subr.bf16.mxu1 %v2787_v31  ;;  %v2837_v31 = vpack.c.bf16 %v293_v23, %v292_v21  ;;  %v271_v21 = vld [vmem:[#allocation2 + $0x668] sm:$0xff] }
  0x90   :  { %2758 = vmatpush3.bf16.msra.mxu0 %v2757_v38  ;;  %v295_v38 = vld [vmem:[#allocation2 + $0x728] sm:$0xff] }
  0x91   :  { %2760 = vmatprep.subr.bf16.mxu0 %v2759_v40  ;;  %v312_v40 = vld [vmem:[#allocation2 + $0x7b0] sm:$0xff]  ;;  %v327_v12 = vld [vmem:[#allocation2 + $0x828] sm:$0xff] }
  0x92   :  { %2790 = vmatpush3.bf16.msra.mxu1 %v2789_v39  ;;  %v281_v39 = vld [vmem:[#allocation2 + $0x6b8] sm:$0xff]  ;;  %v2843_v49 = vpack.c.bf16 %v313_v41, %v312_v40  ;;  %v370_v40 = vld [vmem:[#allocation2 + $0x980] sm:$0xff]  ;;  %v371_v41 = vld [vmem:[#allocation2 + $0x988] sm:$0xff] }
  0x93   :  { %2792 = vmatprep.subr.bf16.mxu1 %v2791_v46  ;;  %v264_v46 = vld [vmem:[#allocation2 + $0x630] sm:$0xff]  ;;  %v2895_v50 = vpack.c.bf16 %v371_v41, %v370_v40  ;;  %v349_v41 = vld [vmem:[#allocation2 + $0x8d8] sm:$0xff] }
  0x94   :  { %2762 = vmatpush3.bf16.msra.mxu0 %v2761_v53  ;;  %v283_v53 = vld [vmem:[#allocation2 + $0x6c8] sm:$0xff]  ;;  %v348_v40 = vld [vmem:[#allocation2 + $0x8d0] sm:$0xff] }
  0x95   :  { %2764 = vmatprep.subr.bf16.mxu0 %v2763_v56  ;;  %v2813_v56 = vpack.c.bf16 %v265_v47, %v264_v46  ;;  %v2815_v58 = vpack.c.bf16 %v283_v53, %v282_v51  ;;  %v322_v47 = vld [vmem:[#allocation2 + $0x800] sm:$0xff]  ;;  %v355_v51 = vld [vmem:[#allocation2 + $0x908] sm:$0xff]  ;;  %v340_v53 = vld [vmem:[#allocation2 + $0x890] sm:$0xff] }
  0x96   :  { %2794 = vmatpush3.bf16.msra.mxu1 %v2793_v55  ;;  %v315_v55 = vld [vmem:[#allocation2 + $0x7c8] sm:$0xff] }
  0x97   :  { %2796 = vmatprep.subr.bf16.mxu1 %v2795_v59  ;;  %v267_v59 = vld [vmem:[#allocation2 + $0x648] sm:$0xff]  ;;  %v2847_v61 = vpack.c.bf16 %v315_v55, %v314_v54  ;;  %v341_v54 = vld [vmem:[#allocation2 + $0x898] sm:$0xff] }
  0x98   :  { %2766 = vmatpush3.bf16.msra.mxu0 %v2765_v1  ;;  %v317_v1 = vld [vmem:[#allocation2 + $0x7d8] sm:$0xff] }
  0x99   :  { %2800 = vmatprep.subr.bf16.mxu0 %v2799_v3  ;;  %v2849_v3 = vpack.c.bf16 %v299_v62, %v298_v60  ;;  %v2851_v8 = vpack.c.bf16 %v317_v1, %v316_v45  ;;  %v2867_v60 = vpack.c.bf16 %v341_v54, %v340_v53  ;;  %v325_v62 = vld [vmem:[#allocation2 + $0x818] sm:$0xff]  ;;  %v342_v1 = vld [vmem:[#allocation2 + $0x8a0] sm:$0xff] }
  0x9a   :  { %2798 = vmatpush3.bf16.msra.mxu1 %v2797_v2  ;;  %v2817_v2 = vpack.c.bf16 %v267_v59, %v266_v33  ;;  %v2865_v33 = vpack.c.bf16 %v323_v48, %v322_v47  ;;  %v357_v45 = vld [vmem:[#allocation2 + $0x918] sm:$0xff]  ;;  %v2883_v47 = vpack.c.bf16 %v349_v41, %v348_v40  ;;  %v332_v48 = vld [vmem:[#allocation2 + $0x850] sm:$0xff]  ;;  %v350_v54 = vld [vmem:[#allocation2 + $0x8e0] sm:$0xff] }
  0x9b   :  { %2832 = vmatprep.subr.bf16.mxu1 %v2831_v7  ;;  %1106 = vmatmul.mubr.f32.vlgmr.msra.gmra.mrb[4].mxu0 %v3362_v42  ;;  %v280_v42 = vld [vmem:[#allocation2 + $0x6b0] sm:$0xff]  ;;  %v365_v53 = vld [vmem:[#allocation2 + $0x958] sm:$0xff] }
  0x9c   :  { %2802 = vmatpush3.bf16.msra.mxu0 %v2801_v16  ;;  %1245 = vmatprep.mubr.f32.mxu0 %v659_v26  ;;  %v2811_v44 = vpack.c.bf16 %v281_v39, %v280_v42  ;;  %v300_v7 = vld [vmem:[#allocation2 + $0x750] sm:$0xff]  ;;  %v319_v16 = vld [vmem:[#allocation2 + $0x7e8] sm:$0xff]  ;;  %v289_v26 = vld [vmem:[#allocation2 + $0x6f8] sm:$0xff] }
  0x9d   :  { %1176 = vmatmul.mubr.f32.vlgmr.msra.gmra.mrb[4].mxu1 %v3368_v52  ;;  %2804 = vmatprep.subr.bf16.mxu0 %v2803_v18  ;;  %v2841_v52 = vpack.c.bf16 %v295_v38, %v294_v36  ;;  %v2853_v18 = vpack.c.bf16 %v301_v9, %v300_v7  ;;  %v2855_v23 = vpack.c.bf16 %v319_v16, %v318_v14  ;;  %v304_v36 = vld [vmem:[#allocation2 + $0x770] sm:$0xff]  ;;  %v305_v38 = vld [vmem:[#allocation2 + $0x778] sm:$0xff]  ;;  %v338_v42 = vld [vmem:[#allocation2 + $0x880] sm:$0xff] }
  0x9e   :  { %2834 = vmatpush3.bf16.msra.mxu1 %v2833_v17  ;;  %1315 = vmatprep.mubr.f32.mxu1 %v660_v29  ;;  %v2821_v17 = vpack.c.bf16 %v269_v6, %v268_v5  ;;  %v2825_v29 = vpack.c.bf16 %v271_v21, %v270_v20  ;;  %v339_v39 = vld [vmem:[#allocation2 + $0x888] sm:$0xff]  ;;  %v358_v14 = vld [vmem:[#allocation2 + $0x920] sm:$0xff]  ;;  %v377_v20 = vld [vmem:[#allocation2 + $0x9b8] sm:$0xff]  ;;  %v2873_v21 = vpack.c.bf16 %v327_v12, %v326_v10 }
  0x9f   :  { %2836 = vmatprep.subr.bf16.mxu1 %v2835_v22  ;;  %v302_v22 = vld [vmem:[#allocation2 + $0x760] sm:$0xff]  ;;  %v2863_v46 = vpack.c.bf16 %v339_v39, %v338_v42  ;;  %v375_v5 = vld [vmem:[#allocation2 + $0x9a8] sm:$0xff]  ;;  %v336_v10 = vld [vmem:[#allocation2 + $0x870] sm:$0xff] }
  0xa0   :  { %2806 = vmatpush3.bf16.msra.mxu0 %v2805_v30  ;;  %v62_v30 = vld [vmem:[%s3510_s0 + $0x20] sm:$0xff]  ;;  %v363_v39 = vld [vmem:[#allocation2 + $0x948] sm:$0xff]  ;;  %v337_v12 = vld [vmem:[#allocation2 + $0x878] sm:$0xff] }
  0xa1   :  { %2808 = vmatprep.subr.bf16.mxu0 %v2807_v32  ;;  %v2827_v32 = vpack.c.bf16 %v289_v26, %v288_v25  ;;  %v3392_v55 = vrot.slane %v62_v30, %v3338_v13  ;;  %v360_v25 = vld [vmem:[#allocation2 + $0x930] sm:$0xff] }
  0xa2   :  { %2838 = vmatpush3.bf16.msra.mxu1 %v2837_v31  ;;  %v2857_v31 = vpack.c.bf16 %v303_v24, %v302_v22  ;;  %v329_v24 = vld [vmem:[#allocation2 + $0x838] sm:$0xff]  ;;  %v420_v40 = vld [vmem:[#allocation2 + $0xb10] sm:$0xff] }
  0xa3   :  { %2840 = vmatprep.subr.bf16.mxu1 %v2839_v37  ;;  %v2859_v37 = vpack.c.bf16 %v321_v28, %v320_v27  ;;  %v361_v27 = vld [vmem:[#allocation2 + $0x938] sm:$0xff]  ;;  %v346_v28 = vld [vmem:[#allocation2 + $0x8c0] sm:$0xff] }
  0xa4   :  { %2810 = vmatpush3.bf16.msra.mxu0 %v2809_v43  ;;  %v661_v43 = vcombine.high %v62_v30, %v62_v30  ;;  %v378_v30 = vld [vmem:[#allocation2 + $0x9c0] sm:$0xff] }
  0xa5   :  { %2812 = vmatprep.subr.bf16.mxu0 %v2811_v44  ;;  %v2861_v44 = vpack.c.bf16 %v305_v38, %v304_v36  ;;  %v330_v36 = vld [vmem:[#allocation2 + $0x840] sm:$0xff] }
  0xa6   :  { %2842 = vmatpush3.bf16.msra.mxu1 %v2841_v52  ;;  %v2829_v52 = vpack.c.bf16 %v273_v35, %v272_v34  ;;  %v2909_v34 = vpack.c.bf16 %v361_v27, %v360_v25  ;;  %v362_v38 = vld [vmem:[#allocation2 + $0x940] sm:$0xff]  ;;  %v387_v25 = vld [vmem:[#allocation2 + $0xa08] sm:$0xff] }
  0xa7   :  { %2844 = vmatprep.subr.bf16.mxu1 %v2843_v49  ;;  %v354_v49 = vld [vmem:[#allocation2 + $0x900] sm:$0xff] }
  0xa8   :  { %2814 = vmatpush3.bf16.msra.mxu0 %v2813_v56  ;;  %v372_v56 = vld [vmem:[#allocation2 + $0x990] sm:$0xff]  ;;  %v2897_v59 = vpack.c.bf16 %v355_v51, %v354_v49  ;;  %v333_v49 = vld [vmem:[#allocation2 + $0x858] sm:$0xff] }
  0xa9   :  { %2816 = vmatprep.subr.bf16.mxu0 %v2815_v58  ;;  %v3395_v58 = vrot.slane %v661_v43, %v3338_v13  ;;  %v380_v43 = vld [vmem:[#allocation2 + $0x9d0] sm:$0xff] }
  0xaa   :  { %2846 = vmatpush3.bf16.msra.mxu1 %v2845_v57  ;;  %v373_v57 = vld [vmem:[#allocation2 + $0x998] sm:$0xff] }
  0xab   :  { %2848 = vmatprep.subr.bf16.mxu1 %v2847_v61  ;;  %v324_v61 = vld [vmem:[#allocation2 + $0x810] sm:$0xff]  ;;  %v2899_v0 = vpack.c.bf16 %v373_v57, %v372_v56  ;;  %v677_v6 = vcombine.high %v3395_v58, %v3395_v58  ;;  %v351_v56 = vld [vmem:[#allocation2 + $0x8e8] sm:$0xff]  ;;  %v382_v57 = vld [vmem:[#allocation2 + $0x9e0] sm:$0xff] }
  0xac   :  { %2818 = vmatpush3.bf16.msra.mxu0 %v2817_v2  ;;  %v343_v2 = vld [vmem:[#allocation2 + $0x8a8] sm:$0xff]  ;;  %v2869_v7 = vpack.c.bf16 %v325_v62, %v324_v61  ;;  %v2887_v61 = vpack.c.bf16 %v351_v56, %v350_v54  ;;  %v334_v62 = vld [vmem:[#allocation2 + $0x860] sm:$0xff] }
  0xad   :  { %2820 = vmatprep.subr.bf16.mxu0 %v2819_v4  ;;  %v374_v4 = vld [vmem:[#allocation2 + $0x9a0] sm:$0xff]  ;;  %v2871_v9 = vpack.c.bf16 %v343_v2, %v342_v1  ;;  %v367_v1 = vld [vmem:[#allocation2 + $0x968] sm:$0xff]  ;;  %v352_v2 = vld [vmem:[#allocation2 + $0x8f0] sm:$0xff] }
  0xae   :  { %2850 = vmatpush3.bf16.msra.mxu1 %v2849_v3  ;;  %v676_v3 = vcombine.high %v3392_v55, %v3392_v55  ;;  %v2903_v16 = vpack.c.bf16 %v375_v5, %v374_v4  ;;  %v384_v4 = vld [vmem:[#allocation2 + $0x9f0] sm:$0xff]  ;;  %v385_v5 = vld [vmem:[#allocation2 + $0x9f8] sm:$0xff]  ;;  %v390_v54 = vld [vmem:[#allocation2 + $0xa20] sm:$0xff] }
  0xaf   :  { %2852 = vmatprep.subr.bf16.mxu1 %v2851_v8  ;;  %v2901_v8 = vpack.c.bf16 %v357_v45, %v356_v63  ;;  %v335_v63 = vld [vmem:[#allocation2 + $0x868] sm:$0xff] }
  0xb0   :  { %2822 = vmatpush3.bf16.msra.mxu0 %v2821_v17  ;;  %v359_v17 = vld [vmem:[#allocation2 + $0x928] sm:$0xff] }
  0xb1   :  { %2824 = vmatprep.subr.bf16.mxu0 %v2823_v19  ;;  %v376_v19 = vld [vmem:[#allocation2 + $0x9b0] sm:$0xff]  ;;  %v391_v56 = vld [vmem:[#allocation2 + $0xa28] sm:$0xff] }
  0xb2   :  { %2854 = vmatpush3.bf16.msra.mxu1 %v2853_v18  ;;  %v345_v18 = vld [vmem:[#allocation2 + $0x8b8] sm:$0xff]  ;;  %v2907_v26 = vpack.c.bf16 %v377_v20, %v376_v19  ;;  %v434_v19 = vld [vmem:[#allocation2 + $0xb80] sm:$0xff]  ;;  %v435_v20 = vld [vmem:[#allocation2 + $0xb88] sm:$0xff] }
  0xb3   :  { %2856 = vmatprep.subr.bf16.mxu1 %v2855_v23  ;;  %v328_v23 = vld [vmem:[#allocation2 + $0x830] sm:$0xff]  ;;  %v2959_v27 = vpack.c.bf16 %v435_v20, %v434_v19  ;;  %v413_v20 = vld [vmem:[#allocation2 + $0xad8] sm:$0xff] }
  0xb4   :  { %2826 = vmatpush3.bf16.msra.mxu0 %v2825_v29  ;;  %v347_v29 = vld [vmem:[#allocation2 + $0x8c8] sm:$0xff]  ;;  %v412_v19 = vld [vmem:[#allocation2 + $0xad0] sm:$0xff] }
  0xb5   :  { %2828 = vmatprep.subr.bf16.mxu0 %v2827_v32  ;;  %v2877_v32 = vpack.c.bf16 %v329_v24, %v328_v23  ;;  %v2879_v35 = vpack.c.bf16 %v347_v29, %v346_v28  ;;  %v386_v24 = vld [vmem:[#allocation2 + $0xa00] sm:$0xff]  ;;  %v419_v28 = vld [vmem:[#allocation2 + $0xb08] sm:$0xff]  ;;  %v404_v29 = vld [vmem:[#allocation2 + $0xa90] sm:$0xff] }
  0xb6   :  { %2858 = vmatpush3.bf16.msra.mxu1 %v2857_v31  ;;  %v379_v31 = vld [vmem:[#allocation2 + $0x9c8] sm:$0xff] }
  0xb7   :  { %2860 = vmatprep.subr.bf16.mxu1 %v2859_v37  ;;  %v331_v37 = vld [vmem:[#allocation2 + $0x848] sm:$0xff]  ;;  %v2911_v42 = vpack.c.bf16 %v379_v31, %v378_v30  ;;  %v405_v30 = vld [vmem:[#allocation2 + $0xa98] sm:$0xff] }
  0xb8   :  { %2830 = vmatpush3.bf16.msra.mxu0 %v2829_v52  ;;  %v381_v52 = vld [vmem:[#allocation2 + $0x9d8] sm:$0xff] }
  0xb9   :  { %2864 = vmatprep.subr.bf16.mxu0 %v2863_v46  ;;  %v2913_v46 = vpack.c.bf16 %v363_v39, %v362_v38  ;;  %v2915_v51 = vpack.c.bf16 %v381_v52, %v380_v43  ;;  %v2931_v38 = vpack.c.bf16 %v405_v30, %v404_v29  ;;  %v389_v39 = vld [vmem:[#allocation2 + $0xa18] sm:$0xff]  ;;  %v406_v52 = vld [vmem:[#allocation2 + $0xaa0] sm:$0xff] }
  0xba   :  { %2862 = vmatpush3.bf16.msra.mxu1 %v2861_v44  ;;  %v2881_v44 = vpack.c.bf16 %v331_v37, %v330_v36  ;;  %v2929_v36 = vpack.c.bf16 %v387_v25, %v386_v24  ;;  %v421_v43 = vld [vmem:[#allocation2 + $0xb18] sm:$0xff]  ;;  %v2947_v24 = vpack.c.bf16 %v413_v20, %v412_v19  ;;  %v396_v25 = vld [vmem:[#allocation2 + $0xa50] sm:$0xff]  ;;  %v414_v30 = vld [vmem:[#allocation2 + $0xae0] sm:$0xff] }
  0xbb   :  { %2896 = vmatprep.subr.bf16.mxu1 %v2895_v50  ;;  %1246 = vmatmul.mubr.f32.vlgmr.msra.gmra.mrb[6].mxu0 %v3377_v11  ;;  %v344_v11 = vld [vmem:[#allocation2 + $0x8b0] sm:$0xff]  ;;  %v429_v29 = vld [vmem:[#allocation2 + $0xb58] sm:$0xff] }
  0xbc   :  { %2866 = vmatpush3.bf16.msra.mxu0 %v2865_v33  ;;  %1385 = vmatprep.mubr.f32.mxu0 %v676_v3  ;;  %v2875_v22 = vpack.c.bf16 %v345_v18, %v344_v11  ;;  %v364_v50 = vld [vmem:[#allocation2 + $0x950] sm:$0xff]  ;;  %v383_v33 = vld [vmem:[#allocation2 + $0x9e8] sm:$0xff]  ;;  %v353_v3 = vld [vmem:[#allocation2 + $0x8f8] sm:$0xff] }
  0xbd   :  { %1316 = vmatmul.mubr.f32.vlgmr.msra.gmra.mrb[6].mxu1 %v3380_v15  ;;  %2868 = vmatprep.subr.bf16.mxu0 %v2867_v60  ;;  %v2905_v15 = vpack.c.bf16 %v359_v17, %v358_v14  ;;  %v2917_v60 = vpack.c.bf16 %v365_v53, %v364_v50  ;;  %v2919_v45 = vpack.c.bf16 %v383_v33, %v382_v57  ;;  %v368_v14 = vld [vmem:[#allocation2 + $0x970] sm:$0xff]  ;;  %v369_v17 = vld [vmem:[#allocation2 + $0x978] sm:$0xff]  ;;  %v402_v11 = vld [vmem:[#allocation2 + $0xa80] sm:$0xff] }
  0xbe   :  { %2898 = vmatpush3.bf16.msra.mxu1 %v2897_v59  ;;  %1455 = vmatprep.mubr.f32.mxu1 %v677_v6  ;;  %v2885_v59 = vpack.c.bf16 %v333_v49, %v332_v48  ;;  %v2889_v6 = vpack.c.bf16 %v335_v63, %v334_v62  ;;  %v403_v18 = vld [vmem:[#allocation2 + $0xa88] sm:$0xff]  ;;  %v422_v57 = vld [vmem:[#allocation2 + $0xb20] sm:$0xff]  ;;  %v441_v62 = vld [vmem:[#allocation2 + $0xbb8] sm:$0xff]  ;;  %v2937_v63 = vpack.c.bf16 %v391_v56, %v390_v54 }
  0xbf   :  { %2900 = vmatprep.subr.bf16.mxu1 %v2899_v0  ;;  %v366_v0 = vld [vmem:[#allocation2 + $0x960] sm:$0xff]  ;;  %v2927_v23 = vpack.c.bf16 %v403_v18, %v402_v11  ;;  %v439_v48 = vld [vmem:[#allocation2 + $0xba8] sm:$0xff]  ;;  %v400_v54 = vld [vmem:[#allocation2 + $0xa70] sm:$0xff] }
  0xc0   :  { %2870 = vmatpush3.bf16.msra.mxu0 %v2869_v7  ;;  %v63_v7 = vld [vmem:[%s3510_s0 + $0x28] sm:$0xff]  ;;  %v401_v56 = vld [vmem:[#allocation2 + $0xa78] sm:$0xff]  ;;  %v484_v19 = vld [vmem:[#allocation2 + $0xd10] sm:$0xff] }
  0xc1   :  { %2872 = vmatprep.subr.bf16.mxu0 %v2871_v9  ;;  %v2891_v9 = vpack.c.bf16 %v353_v3, %v352_v2  ;;  %v3407_v31 = vrot.slane %v63_v7, %v3338_v13  ;;  %v424_v2 = vld [vmem:[#allocation2 + $0xb30] sm:$0xff]  ;;  %v427_v18 = vld [vmem:[#allocation2 + $0xb48] sm:$0xff] }
  0xc2   :  { %2902 = vmatpush3.bf16.msra.mxu1 %v2901_v8  ;;  %v2921_v8 = vpack.c.bf16 %v367_v1, %v366_v0  ;;  %v393_v1 = vld [vmem:[#allocation2 + $0xa38] sm:$0xff] }
  0xc3   :  { %2904 = vmatprep.subr.bf16.mxu1 %v2903_v16  ;;  %v2923_v16 = vpack.c.bf16 %v385_v5, %v384_v4  ;;  %v425_v4 = vld [vmem:[#allocation2 + $0xb38] sm:$0xff]  ;;  %v410_v5 = vld [vmem:[#allocation2 + $0xac0] sm:$0xff] }
  0xc4   :  { %2874 = vmatpush3.bf16.msra.mxu0 %v2873_v21  ;;  %v678_v21 = vcombine.high %v63_v7, %v63_v7  ;;  %v442_v7 = vld [vmem:[#allocation2 + $0xbc0] sm:$0xff] }
  0xc5   :  { %2876 = vmatprep.subr.bf16.mxu0 %v2875_v22  ;;  %v2925_v22 = vpack.c.bf16 %v369_v17, %v368_v14  ;;  %v394_v14 = vld [vmem:[#allocation2 + $0xa40] sm:$0xff] }
  0xc6   :  { %2906 = vmatpush3.bf16.msra.mxu1 %v2905_v15  ;;  %v2893_v15 = vpack.c.bf16 %v337_v12, %v336_v10  ;;  %v2973_v10 = vpack.c.bf16 %v425_v4, %v424_v2  ;;  %v426_v17 = vld [vmem:[#allocation2 + $0xb40] sm:$0xff]  ;;  %v451_v2 = vld [vmem:[#allocation2 + $0xc08] sm:$0xff] }
  0xc7   :  { %2908 = vmatprep.subr.bf16.mxu1 %v2907_v26  ;;  %v418_v26 = vld [vmem:[#allocation2 + $0xb00] sm:$0xff] }
  0xc8   :  { %2878 = vmatpush3.bf16.msra.mxu0 %v2877_v32  ;;  %v436_v32 = vld [vmem:[#allocation2 + $0xb90] sm:$0xff]  ;;  %v2961_v37 = vpack.c.bf16 %v419_v28, %v418_v26  ;;  %v397_v26 = vld [vmem:[#allocation2 + $0xa58] sm:$0xff] }
  0xc9   :  { %2880 = vmatprep.subr.bf16.mxu0 %v2879_v35  ;;  %v3410_v35 = vrot.slane %v678_v21, %v3338_v13  ;;  %v444_v21 = vld [vmem:[#allocation2 + $0xbd0] sm:$0xff] }
  0xca   :  { %2910 = vmatpush3.bf16.msra.mxu1 %v2909_v34  ;;  %v437_v34 = vld [vmem:[#allocation2 + $0xb98] sm:$0xff] }
  0xcb   :  { %2912 = vmatprep.subr.bf16.mxu1 %v2911_v42  ;;  %v388_v42 = vld [vmem:[#allocation2 + $0xa10] sm:$0xff]  ;;  %v2963_v41 = vpack.c.bf16 %v437_v34, %v436_v32  ;;  %v694_v49 = vcombine.high %v3410_v35, %v3410_v35  ;;  %v415_v32 = vld [vmem:[#allocation2 + $0xae8] sm:$0xff]  ;;  %v446_v34 = vld [vmem:[#allocation2 + $0xbe0] sm:$0xff] }
  0xcc   :  { %2882 = vmatpush3.bf16.msra.mxu0 %v2881_v44  ;;  %v407_v44 = vld [vmem:[#allocation2 + $0xaa8] sm:$0xff]  ;;  %v2933_v50 = vpack.c.bf16 %v389_v39, %v388_v42  ;;  %v2951_v42 = vpack.c.bf16 %v415_v32, %v414_v30  ;;  %v398_v39 = vld [vmem:[#allocation2 + $0xa60] sm:$0xff] }
  0xcd   :  { %2884 = vmatprep.subr.bf16.mxu0 %v2883_v47  ;;  %v438_v47 = vld [vmem:[#allocation2 + $0xba0] sm:$0xff]  ;;  %v2935_v53 = vpack.c.bf16 %v407_v44, %v406_v52  ;;  %v431_v52 = vld [vmem:[#allocation2 + $0xb68] sm:$0xff]  ;;  %v416_v44 = vld [vmem:[#allocation2 + $0xaf0] sm:$0xff] }
  0xce   :  { %2914 = vmatpush3.bf16.msra.mxu1 %v2913_v46  ;;  %v693_v46 = vcombine.high %v3407_v31, %v3407_v31  ;;  %v2967_v33 = vpack.c.bf16 %v439_v48, %v438_v47  ;;  %v448_v47 = vld [vmem:[#allocation2 + $0xbf0] sm:$0xff]  ;;  %v449_v48 = vld [vmem:[#allocation2 + $0xbf8] sm:$0xff]  ;;  %v454_v30 = vld [vmem:[#allocation2 + $0xc20] sm:$0xff] }
  0xcf   :  { %2916 = vmatprep.subr.bf16.mxu1 %v2915_v51  ;;  %v2965_v51 = vpack.c.bf16 %v421_v43, %v420_v40  ;;  %v399_v40 = vld [vmem:[#allocation2 + $0xa68] sm:$0xff] }
  0xd0   :  { %2886 = vmatpush3.bf16.msra.mxu0 %v2885_v59  ;;  %v423_v59 = vld [vmem:[#allocation2 + $0xb28] sm:$0xff] }
  0xd1   :  { %2888 = vmatprep.subr.bf16.mxu0 %v2887_v61  ;;  %v440_v61 = vld [vmem:[#allocation2 + $0xbb0] sm:$0xff]  ;;  %v455_v32 = vld [vmem:[#allocation2 + $0xc28] sm:$0xff] }
  0xd2   :  { %2918 = vmatpush3.bf16.msra.mxu1 %v2917_v60  ;;  %v409_v60 = vld [vmem:[#allocation2 + $0xab8] sm:$0xff]  ;;  %v2971_v3 = vpack.c.bf16 %v441_v62, %v440_v61  ;;  %v498_v61 = vld [vmem:[#allocation2 + $0xd80] sm:$0xff]  ;;  %v499_v62 = vld [vmem:[#allocation2 + $0xd88] sm:$0xff] }
  0xd3   :  { %2920 = vmatprep.subr.bf16.mxu1 %v2919_v45  ;;  %v392_v45 = vld [vmem:[#allocation2 + $0xa30] sm:$0xff]  ;;  %v3023_v4 = vpack.c.bf16 %v499_v62, %v498_v61  ;;  %v477_v62 = vld [vmem:[#allocation2 + $0xcd8] sm:$0xff] }
  0xd4   :  { %2890 = vmatpush3.bf16.msra.mxu0 %v2889_v6  ;;  %v411_v6 = vld [vmem:[#allocation2 + $0xac8] sm:$0xff]  ;;  %v476_v61 = vld [vmem:[#allocation2 + $0xcd0] sm:$0xff] }
  0xd5   :  { %2892 = vmatprep.subr.bf16.mxu0 %v2891_v9  ;;  %v2941_v9 = vpack.c.bf16 %v393_v1, %v392_v45  ;;  %v2943_v12 = vpack.c.bf16 %v411_v6, %v410_v5  ;;  %v450_v1 = vld [vmem:[#allocation2 + $0xc00] sm:$0xff]  ;;  %v483_v5 = vld [vmem:[#allocation2 + $0xd08] sm:$0xff]  ;;  %v468_v6 = vld [vmem:[#allocation2 + $0xc90] sm:$0xff] }
  0xd6   :  { %2922 = vmatpush3.bf16.msra.mxu1 %v2921_v8  ;;  %v443_v8 = vld [vmem:[#allocation2 + $0xbc8] sm:$0xff] }
  0xd7   :  { %2924 = vmatprep.subr.bf16.mxu1 %v2923_v16  ;;  %v395_v16 = vld [vmem:[#allocation2 + $0xa48] sm:$0xff]  ;;  %v2975_v11 = vpack.c.bf16 %v443_v8, %v442_v7  ;;  %v469_v7 = vld [vmem:[#allocation2 + $0xc98] sm:$0xff] }
  0xd8   :  { %2894 = vmatpush3.bf16.msra.mxu0 %v2893_v15  ;;  %v445_v15 = vld [vmem:[#allocation2 + $0xbd8] sm:$0xff] }
  0xd9   :  { %2928 = vmatprep.subr.bf16.mxu0 %v2927_v23  ;;  %v2977_v23 = vpack.c.bf16 %v427_v18, %v426_v17  ;;  %v2979_v28 = vpack.c.bf16 %v445_v15, %v444_v21  ;;  %v2995_v17 = vpack.c.bf16 %v469_v7, %v468_v6  ;;  %v453_v18 = vld [vmem:[#allocation2 + $0xc18] sm:$0xff]  ;;  %v470_v15 = vld [vmem:[#allocation2 + $0xca0] sm:$0xff] }
  0xda   :  { %2926 = vmatpush3.bf16.msra.mxu1 %v2925_v22  ;;  %v2945_v22 = vpack.c.bf16 %v395_v16, %v394_v14  ;;  %v2993_v14 = vpack.c.bf16 %v451_v2, %v450_v1  ;;  %v485_v21 = vld [vmem:[#allocation2 + $0xd18] sm:$0xff]  ;;  %v3011_v1 = vpack.c.bf16 %v477_v62, %v476_v61  ;;  %v460_v2 = vld [vmem:[#allocation2 + $0xc50] sm:$0xff]  ;;  %v478_v7 = vld [vmem:[#allocation2 + $0xce0] sm:$0xff] }
  0xdb   :  { %2960 = vmatprep.subr.bf16.mxu1 %v2959_v27  ;;  %1386 = vmatmul.mubr.f32.vlgmr.msra.gmra.mrb[8].mxu0 %v3392_v55  ;;  %v408_v55 = vld [vmem:[#allocation2 + $0xab0] sm:$0xff]  ;;  %v493_v6 = vld [vmem:[#allocation2 + $0xd58] sm:$0xff] }
  0xdc   :  { %2930 = vmatpush3.bf16.msra.mxu0 %v2929_v36  ;;  %1525 = vmatprep.mubr.f32.mxu0 %v693_v46  ;;  %v2939_v0 = vpack.c.bf16 %v409_v60, %v408_v55  ;;  %v428_v27 = vld [vmem:[#allocation2 + $0xb50] sm:$0xff]  ;;  %v447_v36 = vld [vmem:[#allocation2 + $0xbe8] sm:$0xff]  ;;  %v417_v46 = vld [vmem:[#allocation2 + $0xaf8] sm:$0xff] }
  0xdd   :  { %1456 = vmatmul.mubr.f32.vlgmr.msra.gmra.mrb[8].mxu1 %v3395_v58  ;;  %2932 = vmatprep.subr.bf16.mxu0 %v2931_v38  ;;  %v2969_v58 = vpack.c.bf16 %v423_v59, %v422_v57  ;;  %v2981_v38 = vpack.c.bf16 %v429_v29, %v428_v27  ;;  %v2983_v43 = vpack.c.bf16 %v447_v36, %v446_v34  ;;  %v432_v57 = vld [vmem:[#allocation2 + $0xb70] sm:$0xff]  ;;  %v433_v59 = vld [vmem:[#allocation2 + $0xb78] sm:$0xff]  ;;  %v466_v55 = vld [vmem:[#allocation2 + $0xc80] sm:$0xff] }
  0xde   :  { %2962 = vmatpush3.bf16.msra.mxu1 %v2961_v37  ;;  %1595 = vmatprep.mubr.f32.mxu1 %v694_v49  ;;  %v2949_v37 = vpack.c.bf16 %v397_v26, %v396_v25  ;;  %v2953_v49 = vpack.c.bf16 %v399_v40, %v398_v39  ;;  %v467_v60 = vld [vmem:[#allocation2 + $0xc88] sm:$0xff]  ;;  %v486_v34 = vld [vmem:[#allocation2 + $0xd20] sm:$0xff]  ;;  %v505_v39 = vld [vmem:[#allocation2 + $0xdb8] sm:$0xff]  ;;  %v3001_v40 = vpack.c.bf16 %v455_v32, %v454_v30 }
  0xdf   :  { %2964 = vmatprep.subr.bf16.mxu1 %v2963_v41  ;;  %v430_v41 = vld [vmem:[#allocation2 + $0xb60] sm:$0xff]  ;;  %v2991_v45 = vpack.c.bf16 %v467_v60, %v466_v55  ;;  %v503_v25 = vld [vmem:[#allocation2 + $0xda8] sm:$0xff]  ;;  %v464_v30 = vld [vmem:[#allocation2 + $0xc70] sm:$0xff] }
  0xe0   :  { %2934 = vmatpush3.bf16.msra.mxu0 %v2933_v50  ;;  %v64_v50 = vld [vmem:[%s3510_s0 + $0x30] sm:$0xff]  ;;  %v491_v60 = vld [vmem:[#allocation2 + $0xd48] sm:$0xff]  ;;  %v465_v32 = vld [vmem:[#allocation2 + $0xc78] sm:$0xff] }
  0xe1   :  { %2936 = vmatprep.subr.bf16.mxu0 %v2935_v53  ;;  %v2955_v53 = vpack.c.bf16 %v417_v46, %v416_v44  ;;  %v3422_v8 = vrot.slane %v64_v50, %v3338_v13  ;;  %v488_v44 = vld [vmem:[#allocation2 + $0xd30] sm:$0xff] }
  0xe2   :  { %2966 = vmatpush3.bf16.msra.mxu1 %v2965_v51  ;;  %v2985_v51 = vpack.c.bf16 %v431_v52, %v430_v41  ;;  %v457_v52 = vld [vmem:[#allocation2 + $0xc38] sm:$0xff]  ;;  %v548_v61 = vld [vmem:[#allocation2 + $0xf10] sm:$0xff] }
  0xe3   :  { %2968 = vmatprep.subr.bf16.mxu1 %v2967_v33  ;;  %v2987_v33 = vpack.c.bf16 %v449_v48, %v448_v47  ;;  %v489_v47 = vld [vmem:[#allocation2 + $0xd38] sm:$0xff]  ;;  %v474_v48 = vld [vmem:[#allocation2 + $0xcc0] sm:$0xff] }
  0xe4   :  { %2938 = vmatpush3.bf16.msra.mxu0 %v2937_v63  ;;  %v695_v63 = vcombine.high %v64_v50, %v64_v50  ;;  %v506_v50 = vld [vmem:[#allocation2 + $0xdc0] sm:$0xff] }
  0xe5   :  { %2940 = vmatprep.subr.bf16.mxu0 %v2939_v0  ;;  %v2989_v0 = vpack.c.bf16 %v433_v59, %v432_v57  ;;  %v458_v57 = vld [vmem:[#allocation2 + $0xc40] sm:$0xff] }
  0xe6   :  { %2970 = vmatpush3.bf16.msra.mxu1 %v2969_v58  ;;  %v2957_v58 = vpack.c.bf16 %v401_v56, %v400_v54  ;;  %v3037_v54 = vpack.c.bf16 %v489_v47, %v488_v44  ;;  %v490_v59 = vld [vmem:[#allocation2 + $0xd40] sm:$0xff]  ;;  %v515_v44 = vld [vmem:[#allocation2 + $0xe08] sm:$0xff] }
  0xe7   :  { %2972 = vmatprep.subr.bf16.mxu1 %v2971_v3  ;;  %v482_v3 = vld [vmem:[#allocation2 + $0xd00] sm:$0xff] }
  0xe8   :  { %2942 = vmatpush3.bf16.msra.mxu0 %v2941_v9  ;;  %v500_v9 = vld [vmem:[#allocation2 + $0xd90] sm:$0xff]  ;;  %v3025_v16 = vpack.c.bf16 %v483_v5, %v482_v3  ;;  %v461_v3 = vld [vmem:[#allocation2 + $0xc58] sm:$0xff] }
  0xe9   :  { %2944 = vmatprep.subr.bf16.mxu0 %v2943_v12  ;;  %v3425_v12 = vrot.slane %v695_v63, %v3338_v13  ;;  %v508_v63 = vld [vmem:[#allocation2 + $0xdd0] sm:$0xff] }
  0xea   :  { %2974 = vmatpush3.bf16.msra.mxu1 %v2973_v10  ;;  %v501_v10 = vld [vmem:[#allocation2 + $0xd98] sm:$0xff] }
  0xeb   :  { %2976 = vmatprep.subr.bf16.mxu1 %v2975_v11  ;;  %v452_v11 = vld [vmem:[#allocation2 + $0xc10] sm:$0xff]  ;;  %v3027_v20 = vpack.c.bf16 %v501_v10, %v500_v9  ;;  %v711_v26 = vcombine.high %v3425_v12, %v3425_v12  ;;  %v479_v9 = vld [vmem:[#allocation2 + $0xce8] sm:$0xff]  ;;  %v510_v10 = vld [vmem:[#allocation2 + $0xde0] sm:$0xff] }
  0xec   :  { %2946 = vmatpush3.bf16.msra.mxu0 %v2945_v22  ;;  %v471_v22 = vld [vmem:[#allocation2 + $0xca8] sm:$0xff]  ;;  %v2997_v27 = vpack.c.bf16 %v453_v18, %v452_v11  ;;  %v3015_v11 = vpack.c.bf16 %v479_v9, %v478_v7  ;;  %v462_v18 = vld [vmem:[#allocation2 + $0xc60] sm:$0xff] }
  0xed   :  { %2948 = vmatprep.subr.bf16.mxu0 %v2947_v24  ;;  %v502_v24 = vld [vmem:[#allocation2 + $0xda0] sm:$0xff]  ;;  %v2999_v29 = vpack.c.bf16 %v471_v22, %v470_v15  ;;  %v495_v15 = vld [vmem:[#allocation2 + $0xd68] sm:$0xff]  ;;  %v480_v22 = vld [vmem:[#allocation2 + $0xcf0] sm:$0xff] }
  0xee   :  { %2978 = vmatpush3.bf16.msra.mxu1 %v2977_v23  ;;  %v710_v23 = vcombine.high %v3422_v8, %v3422_v8  ;;  %v3031_v36 = vpack.c.bf16 %v503_v25, %v502_v24  ;;  %v512_v24 = vld [vmem:[#allocation2 + $0xdf0] sm:$0xff]  ;;  %v513_v25 = vld [vmem:[#allocation2 + $0xdf8] sm:$0xff]  ;;  %v519_v7 = vld [vmem:[#allocation2 + $0xe28] sm:$0xff] }
  0xef   :  { %2980 = vmatprep.subr.bf16.mxu1 %v2979_v28  ;;  %v3029_v28 = vpack.c.bf16 %v485_v21, %v484_v19  ;;  %v463_v19 = vld [vmem:[#allocation2 + $0xc68] sm:$0xff]  ;;  %v550_v9 = vld [vmem:[#allocation2 + $0xf20] sm:$0xff] }
  0xf0   :  { %2950 = vmatpush3.bf16.msra.mxu0 %v2949_v37  ;;  %v487_v37 = vld [vmem:[#allocation2 + $0xd28] sm:$0xff] }
  0xf1   :  { %2952 = vmatprep.subr.bf16.mxu0 %v2951_v42  ;;  %v504_v42 = vld [vmem:[#allocation2 + $0xdb0] sm:$0xff] }
  0xf2   :  { %2982 = vmatpush3.bf16.msra.mxu1 %v2981_v38  ;;  %v473_v38 = vld [vmem:[#allocation2 + $0xcb8] sm:$0xff]  ;;  %v3035_v46 = vpack.c.bf16 %v505_v39, %v504_v42  ;;  %v562_v42 = vld [vmem:[#allocation2 + $0xf80] sm:$0xff]  ;;  %v563_v39 = vld [vmem:[#allocation2 + $0xf88] sm:$0xff] }
  0xf3   :  { %2984 = vmatprep.subr.bf16.mxu1 %v2983_v43  ;;  %v456_v43 = vld [vmem:[#allocation2 + $0xc30] sm:$0xff]  ;;  %v3087_v47 = vpack.c.bf16 %v563_v39, %v562_v42  ;;  %v541_v42 = vld [vmem:[#allocation2 + $0xed8] sm:$0xff] }
  0xf4   :  { %2954 = vmatpush3.bf16.msra.mxu0 %v2953_v49  ;;  %v475_v49 = vld [vmem:[#allocation2 + $0xcc8] sm:$0xff]  ;;  %v572_v39 = vld [vmem:[#allocation2 + $0xfd0] sm:$0xff] }
  0xf5   :  { %2956 = vmatprep.subr.bf16.mxu0 %v2955_v53  ;;  %v3005_v53 = vpack.c.bf16 %v457_v52, %v456_v43  ;;  %v3007_v56 = vpack.c.bf16 %v475_v49, %v474_v48  ;;  %v514_v52 = vld [vmem:[#allocation2 + $0xe00] sm:$0xff]  ;;  %v547_v48 = vld [vmem:[#allocation2 + $0xf08] sm:$0xff]  ;;  %v532_v49 = vld [vmem:[#allocation2 + $0xe90] sm:$0xff] }
  0xf6   :  { %2986 = vmatpush3.bf16.msra.mxu1 %v2985_v51  ;;  %v507_v51 = vld [vmem:[#allocation2 + $0xdc8] sm:$0xff] }
  0xf7   :  { %2988 = vmatprep.subr.bf16.mxu1 %v2987_v33  ;;  %v459_v33 = vld [vmem:[#allocation2 + $0xc48] sm:$0xff]  ;;  %v3039_v55 = vpack.c.bf16 %v507_v51, %v506_v50  ;;  %v533_v50 = vld [vmem:[#allocation2 + $0xe98] sm:$0xff] }
  0xf8   :  { %2958 = vmatpush3.bf16.msra.mxu0 %v2957_v58  ;;  %v509_v58 = vld [vmem:[#allocation2 + $0xdd8] sm:$0xff] }
  0xf9   :  { %2992 = vmatprep.subr.bf16.mxu0 %v2991_v45  ;;  %v3041_v45 = vpack.c.bf16 %v491_v60, %v490_v59  ;;  %v3043_v5 = vpack.c.bf16 %v509_v58, %v508_v63  ;;  %v3059_v59 = vpack.c.bf16 %v533_v50, %v532_v49  ;;  %v517_v60 = vld [vmem:[#allocation2 + $0xe18] sm:$0xff]  ;;  %v534_v58 = vld [vmem:[#allocation2 + $0xea0] sm:$0xff]  ;;  %v543_v50 = vld [vmem:[#allocation2 + $0xee8] sm:$0xff] }
  0xfa   :  { %2990 = vmatpush3.bf16.msra.mxu1 %v2989_v0  ;;  %v3009_v0 = vpack.c.bf16 %v459_v33, %v458_v57  ;;  %v3057_v57 = vpack.c.bf16 %v515_v44, %v514_v52  ;;  %v549_v63 = vld [vmem:[#allocation2 + $0xf18] sm:$0xff]  ;;  %v524_v52 = vld [vmem:[#allocation2 + $0xe50] sm:$0xff]  ;;  %v542_v49 = vld [vmem:[#allocation2 + $0xee0] sm:$0xff] }
  0xfb   :  { %3024 = vmatprep.subr.bf16.mxu1 %v3023_v4  ;;  %1526 = vmatmul.mubr.f32.vlgmr.msra.gmra.mrb[10].mxu0 %v3407_v31  ;;  %v472_v31 = vld [vmem:[#allocation2 + $0xcb0] sm:$0xff]  ;;  %v525_v44 = vld [vmem:[#allocation2 + $0xe58] sm:$0xff] }
  0xfc   :  { %2994 = vmatpush3.bf16.msra.mxu0 %v2993_v14  ;;  %1665 = vmatprep.mubr.f32.mxu0 %v710_v23  ;;  %v3003_v41 = vpack.c.bf16 %v473_v38, %v472_v31  ;;  %v492_v4 = vld [vmem:[#allocation2 + $0xd50] sm:$0xff]  ;;  %v511_v14 = vld [vmem:[#allocation2 + $0xde8] sm:$0xff]  ;;  %v481_v23 = vld [vmem:[#allocation2 + $0xcf8] sm:$0xff] }
  0xfd   :  { %1596 = vmatmul.mubr.f32.vlgmr.msra.gmra.mrb[10].mxu1 %v3410_v35  ;;  %2996 = vmatprep.subr.bf16.mxu0 %v2995_v17  ;;  %v3033_v35 = vpack.c.bf16 %v487_v37, %v486_v34  ;;  %v3045_v17 = vpack.c.bf16 %v493_v6, %v492_v4  ;;  %v3047_v21 = vpack.c.bf16 %v511_v14, %v510_v10  ;;  %v496_v34 = vld [vmem:[#allocation2 + $0xd70] sm:$0xff]  ;;  %v497_v37 = vld [vmem:[#allocation2 + $0xd78] sm:$0xff]  ;;  %v530_v31 = vld [vmem:[#allocation2 + $0xe80] sm:$0xff] }
  0xfe   :  { %3026 = vmatpush3.bf16.msra.mxu1 %v3025_v16  ;;  %1735 = vmatprep.mubr.f32.mxu1 %v711_v26  ;;  %v3013_v16 = vpack.c.bf16 %v461_v3, %v460_v2  ;;  %v3017_v26 = vpack.c.bf16 %v463_v19, %v462_v18  ;;  %v531_v38 = vld [vmem:[#allocation2 + $0xe88] sm:$0xff]  ;;  %v3093_v4 = vpack.c.bf16 %v549_v63, %v548_v61  ;;  %v518_v6 = vld [vmem:[#allocation2 + $0xe20] sm:$0xff] }
  0xff   :  { %3028 = vmatprep.subr.bf16.mxu1 %v3027_v20  ;;  %v494_v20 = vld [vmem:[#allocation2 + $0xd60] sm:$0xff]  ;;  %v3055_v43 = vpack.c.bf16 %v531_v38, %v530_v31  ;;  %v551_v14 = vld [vmem:[#allocation2 + $0xf28] sm:$0xff]  ;;  %v3065_v18 = vpack.c.bf16 %v519_v7, %v518_v6  ;;  %v540_v38 = vld [vmem:[#allocation2 + $0xed0] sm:$0xff] }
 0x100   :  { %2998 = vmatpush3.bf16.msra.mxu0 %v2997_v27  ;;  %v65_v27 = vld [vmem:[%s3510_s0 + $0x38] sm:$0xff]  ;;  %v555_v31 = vld [vmem:[#allocation2 + $0xf48] sm:$0xff]  ;;  %v558_v61 = vld [vmem:[#allocation2 + $0xf60] sm:$0xff] }
 0x101   :  { %3000 = vmatprep.subr.bf16.mxu0 %v2999_v29  ;;  %v3019_v29 = vpack.c.bf16 %v481_v23, %v480_v22  ;;  %v3437_v51 = vrot.slane %v65_v27, %v3338_v13  ;;  %v553_v23 = vld [vmem:[#allocation2 + $0xf38] sm:$0xff] }
 0x102   :  { %3030 = vmatpush3.bf16.msra.mxu1 %v3029_v28  ;;  %v3049_v28 = vpack.c.bf16 %v495_v15, %v494_v20  ;;  %v520_v20 = vld [vmem:[#allocation2 + $0xe30] sm:$0xff] }
 0x103   :  { %3032 = vmatprep.subr.bf16.mxu1 %v3031_v36  ;;  %v3051_v36 = vpack.c.bf16 %v513_v25, %v512_v24  ;;  %v552_v15 = vld [vmem:[#allocation2 + $0xf30] sm:$0xff]  ;;  %v538_v24 = vld [vmem:[#allocation2 + $0xec0] sm:$0xff]  ;;  %v539_v25 = vld [vmem:[#allocation2 + $0xec8] sm:$0xff] }
 0x104   :  { %3002 = vmatpush3.bf16.msra.mxu0 %v3001_v40  ;;  %v712_v40 = vcombine.high %v65_v27, %v65_v27  ;;  %v571_v27 = vld [vmem:[#allocation2 + $0xfc8] sm:$0xff] }
 0x105   :  { %3004 = vmatprep.subr.bf16.mxu0 %v3003_v41  ;;  %v3053_v41 = vpack.c.bf16 %v497_v37, %v496_v34  ;;  %v523_v34 = vld [vmem:[#allocation2 + $0xe48] sm:$0xff] }
 0x106   :  { %3034 = vmatpush3.bf16.msra.mxu1 %v3033_v35  ;;  %v3021_v35 = vpack.c.bf16 %v465_v32, %v464_v30  ;;  %v3071_v30 = vpack.c.bf16 %v539_v25, %v538_v24  ;;  %v522_v32 = vld [vmem:[#allocation2 + $0xe40] sm:$0xff] }
 0x107   :  { %3036 = vmatprep.subr.bf16.mxu1 %v3035_v46  ;;  %v546_v46 = vld [vmem:[#allocation2 + $0xf00] sm:$0xff] }
 0x108   :  { %3006 = vmatpush3.bf16.msra.mxu0 %v3005_v53  ;;  %v564_v53 = vld [vmem:[#allocation2 + $0xf90] sm:$0xff]  ;;  %v3089_v33 = vpack.c.bf16 %v547_v48, %v546_v46  ;;  %v557_v48 = vld [vmem:[#allocation2 + $0xf58] sm:$0xff] }
 0x109   :  { %3008 = vmatprep.subr.bf16.mxu0 %v3007_v56  ;;  %v3440_v56 = vrot.slane %v712_v40, %v3338_v13  ;;  %v566_v13 = vld [vmem:[#allocation2 + $0xfa0] sm:$0xff]  ;;  %v573_v40 = vld [vmem:[#allocation2 + $0xfd8] sm:$0xff]  ;;  %v556_v46 = vld [vmem:[#allocation2 + $0xf50] sm:$0xff] }
 0x10a   :  { %3038 = vmatpush3.bf16.msra.mxu1 %v3037_v54  ;;  %v565_v54 = vld [vmem:[#allocation2 + $0xf98] sm:$0xff] }
 0x10b   :  { %3040 = vmatprep.subr.bf16.mxu1 %v3039_v55  ;;  %v516_v55 = vld [vmem:[#allocation2 + $0xe10] sm:$0xff]  ;;  %v3091_v62 = vpack.c.bf16 %v565_v54, %v564_v53  ;;  %v728_v2 = vcombine.high %v3440_v56, %v3440_v56  ;;  %v574_v53 = vld [vmem:[#allocation2 + $0xfe0] sm:$0xff]  ;;  %v575_v54 = vld [vmem:[#allocation2 + $0xfe8] sm:$0xff] }
 0x10c   :  { %3010 = vmatpush3.bf16.msra.mxu0 %v3009_v0  ;;  %v535_v0 = vld [vmem:[#allocation2 + $0xea8] sm:$0xff]  ;;  %v3061_v3 = vpack.c.bf16 %v517_v60, %v516_v55  ;;  %v526_v55 = vld [vmem:[#allocation2 + $0xe60] sm:$0xff]  ;;  %v3111_v63 = vpack.c.bf16 %v575_v54, %v574_v53  ;;  %v1892_v54 = vld [vmem:[%s3513_s3 + $0x50] sm:$0xff] }
 0x10d   :  { %3012 = vmatprep.subr.bf16.mxu0 %v3011_v1  ;;  %v567_v1 = vld [vmem:[#allocation2 + $0xfa8] sm:$0xff] }
 0x10e   :  { %3042 = vmatpush3.bf16.msra.mxu1 %v3041_v45  ;;  %v727_v45 = vcombine.high %v3437_v51, %v3437_v51  ;;  %v3095_v10 = vpack.c.bf16 %v567_v1, %v566_v13  ;;  %v527_v60 = vld [vmem:[#allocation2 + $0xe68] sm:$0xff]  ;;  %v1993_v13 = vld [vmem:[#allocation5] ss:$0 sm:$0xff] }
 0x10f   :  { %3044 = vmatprep.subr.bf16.mxu1 %v3043_v5  ;;  %v3063_v5 = vpack.c.bf16 %v535_v0, %v534_v58  ;;  %v559_v58 = vld [vmem:[#allocation2 + $0xf68] sm:$0xff]  ;;  %v544_v0 = vld [vmem:[#allocation2 + $0xef0] sm:$0xff]  ;;  %v3081_v7 = vpack.c.bf16 %v527_v60, %v526_v55  ;;  %v1894_v55 = vld [vmem:[%s3513_s3 + $0x60] sm:$0xff] }
 0x110   :  { %3014 = vmatpush3.bf16.msra.mxu0 %v3013_v16  ;;  %v537_v16 = vld [vmem:[#allocation2 + $0xeb8] sm:$0xff]  ;;  %v1895_v60 = vld [vmem:[%s3513_s3 + $0x68] sm:$0xff] }
 0x111   :  { %3016 = vmatprep.subr.bf16.mxu0 %v3015_v11  ;;  %v569_v11 = vld [vmem:[#allocation2 + $0xfb8] sm:$0xff] }
 0x112   :  { %3046 = vmatpush3.bf16.msra.mxu1 %v3045_v17  ;;  %v568_v17 = vld [vmem:[#allocation2 + $0xfb0] sm:$0xff] }
 0x113   :  { %3048 = vmatprep.subr.bf16.mxu1 %v3047_v21  ;;  %v521_v21 = vld [vmem:[#allocation2 + $0xe38] sm:$0xff]  ;;  %v3099_v22 = vpack.c.bf16 %v569_v11, %v568_v17 }
 0x114   :  { %3018 = vmatpush3.bf16.msra.mxu0 %v3017_v26  ;;  %v570_v26 = vld [vmem:[#allocation2 + $0xfc0] sm:$0xff] }
 0x115   :  { %3020 = vmatprep.subr.bf16.mxu0 %v3019_v29  ;;  %v3101_v29 = vpack.c.bf16 %v553_v23, %v552_v15  ;;  %v3103_v37 = vpack.c.bf16 %v571_v27, %v570_v26 }
 0x116   :  { %3050 = vmatpush3.bf16.msra.mxu1 %v3049_v28  ;;  %v3069_v28 = vpack.c.bf16 %v521_v21, %v520_v20 }
 0x117   :  { %3052 = vmatprep.subr.bf16.mxu1 %v3051_v36  ;;  %v554_v36 = vld [vmem:[#allocation2 + $0xf40] sm:$0xff] }
 0x118   :  { %3022 = vmatpush3.bf16.msra.mxu0 %v3021_v35  ;;  %v3073_v35 = vpack.c.bf16 %v523_v34, %v522_v32 }
 0x119   :  { %3056 = vmatprep.subr.bf16.mxu0 %v3055_v43  ;;  %v3075_v43 = vpack.c.bf16 %v541_v42, %v540_v38  ;;  %v1884_v42 = vld [vmem:[%s3513_s3 + $0x10] sm:$0xff] }
 0x11a   :  { %3054 = vmatpush3.bf16.msra.mxu1 %v3053_v41  ;;  %v3105_v41 = vpack.c.bf16 %v555_v31, %v554_v36 }
 0x11b   :  { %3088 = vmatprep.subr.bf16.mxu1 %v3087_v47  ;;  %1666 = vmatmul.mubr.f32.vlgmr.msra.gmra.mrb[12].mxu0 %v3422_v8  ;;  %v536_v8 = vld [vmem:[#allocation2 + $0xeb0] sm:$0xff]  ;;  %v3107_v47 = vpack.c.bf16 %v573_v40, %v572_v39  ;;  %v3261_v39 = vmov 0.0|0.0  }
 0x11c   :  { %3058 = vmatpush3.bf16.msra.mxu0 %v3057_v57  ;;  %1805 = vmatprep.mubr.f32.mxu0 %v727_v45  ;;  %v3067_v19 = vpack.c.bf16 %v537_v16, %v536_v8  ;;  %v3077_v57 = vpack.c.bf16 %v525_v44, %v524_v52  ;;  %v545_v45 = vld [vmem:[#allocation2 + $0xef8] sm:$0xff]  ;;  %v528_v8 = vld [vmem:[#allocation2 + $0xe70] sm:$0xff]  ;;  %v1887_v52 = vld [vmem:[%s3513_s3 + $0x28] sm:$0xff] }
 0x11d   :  { %1736 = vmatmul.mubr.f32.vlgmr.msra.gmra.mrb[12].mxu1 %v3425_v12  ;;  %3060 = vmatprep.subr.bf16.mxu0 %v3059_v59  ;;  %v3097_v12 = vpack.c.bf16 %v551_v14, %v550_v9  ;;  %v3079_v59 = vpack.c.bf16 %v543_v50, %v542_v49  ;;  %v3083_v14 = vpack.c.bf16 %v545_v45, %v544_v0  ;;  %v529_v16 = vld [vmem:[#allocation2 + $0xe78] sm:$0xff]  ;;  %v1890_v49 = vld [vmem:[%s3513_s3 + $0x40] sm:$0xff]  ;;  %v1891_v50 = vld [vmem:[%s3513_s3 + $0x48] sm:$0xff] }
 0x11e   :  { %3090 = vmatpush3.bf16.msra.mxu1 %v3089_v33  ;;  %1875 = vmatprep.mubr.f32.mxu1 %v728_v2  ;;  %v3109_v33 = vpack.c.bf16 %v557_v48, %v556_v46  ;;  %v3085_v20 = vpack.c.bf16 %v529_v16, %v528_v8  ;;  %v1888_v46 = vld [vmem:[%s3513_s3 + $0x30] sm:$0xff]  ;;  %v3132_v53 = vpack.c.bf16 %v1891_v50, %v1890_v49 }
 0x11f   :  { %3092 = vmatprep.subr.bf16.mxu1 %v3091_v62 }
 0x120   :  { %3062 = vmatpush3.bf16.msra.mxu0 %v3061_v3  ;;  %v576_v3 = vld [vmem:[#allocation2 + $0xff0] sm:$0xff] }
 0x121   :  { %3064 = vmatprep.subr.bf16.mxu0 %v3063_v5 }
 0x122   :  { %3094 = vmatpush3.bf16.msra.mxu1 %v3093_v4  ;;  %v577_v4 = vld [vmem:[#allocation2 + $0xff8] sm:$0xff] }
 0x123   :  { %3096 = vmatprep.subr.bf16.mxu1 %v3095_v10  ;;  %v3113_v10 = vpack.c.bf16 %v559_v58, %v558_v61  ;;  %v3115_v11 = vpack.c.bf16 %v577_v4, %v576_v3 }
 0x124   :  { %3066 = vmatpush3.bf16.msra.mxu0 %v3065_v18  ;;  %v560_v18 = vld [vmem:[#allocation2 + $0xf70] sm:$0xff] }
 0x125   :  { %3068 = vmatprep.subr.bf16.mxu0 %v3067_v19 }
 0x126   :  { %3098 = vmatpush3.bf16.msra.mxu1 %v3097_v12  ;;  %v561_v12 = vld [vmem:[#allocation2 + $0xf78] sm:$0xff] }
 0x127   :  { %3100 = vmatprep.subr.bf16.mxu1 %v3099_v22  ;;  %v3117_v21 = vpack.c.bf16 %v561_v12, %v560_v18 }
 0x128   :  { %3070 = vmatpush3.bf16.msra.mxu0 %v3069_v28 }
 0x129   :  { %3072 = vmatprep.subr.bf16.mxu0 %v3071_v30 }
 0x12a   :  { %3102 = vmatpush3.bf16.msra.mxu1 %v3101_v29 }
 0x12b   :  { %3104 = vmatprep.subr.bf16.mxu1 %v3103_v37 }
 0x12c   :  { %3074 = vmatpush3.bf16.msra.mxu0 %v3073_v35  ;;  %v1885_v35 = vld [vmem:[%s3513_s3 + $0x18] sm:$0xff] }
 0x12d   :  { %3076 = vmatprep.subr.bf16.mxu0 %v3075_v43  ;;  %v1886_v43 = vld [vmem:[%s3513_s3 + $0x20] sm:$0xff] }
 0x12e   :  { %3106 = vmatpush3.bf16.msra.mxu1 %v3105_v41  ;;  %v2027_v62 = vpop.f32.mrb[0].mxu0  ;;  %v3123_v41 = vpack.c.bf16 %v1885_v35, %v1884_v42  ;;  %v3126_v44 = vpack.c.bf16 %v1887_v52, %v1886_v43 }
 0x12f   :  { %3108 = vmatprep.subr.bf16.mxu1 %v3107_v47  ;;  %v2028_v1 = vpop.f32.mrb[1].mxu0  ;;  %v1889_v47 = vld [vmem:[%s3513_s3 + $0x38] sm:$0xff] }
 0x130   :  { %v2062_v2 = vpop.f32.mrb[0].mxu1  ;;  %v2029_v5 = vadd.f32 %v2028_v1, %v2027_v62  ;;  %3078 = vmatpush3.bf16.msra.mxu0 %v3077_v57  ;;  %v3129_v48 = vpack.c.bf16 %v1889_v47, %v1888_v46  ;;  %v1893_v57 = vld [vmem:[%s3513_s3 + $0x58] sm:$0xff]  ;;  %v1896_v1 = vld [vmem:[%s3513_s3 + $0x70] sm:$0xff] }
 0x131   :  { %v2063_v6 = vpop.f32.mrb[1].mxu1  ;;  %3080 = vmatprep.subr.bf16.mxu0 %v3079_v59 }
 0x132   :  { %v2064_v9 = vadd.f32 %v2063_v6, %v2062_v2  ;;  %3110 = vmatpush3.bf16.msra.mxu1 %v3109_v33  ;;  %v828_v17 = vadd.f32 %v2029_v5, %v1993_v13  ;;  %v3135_v33 = vpack.c.bf16 %v1893_v57, %v1892_v54  ;;  %v1897_v2 = vld [vmem:[%s3513_s3 + $0x78] sm:$0xff]  ;;  %v3263_v5 = vmov 0.0  }
 0x133   :  { %3112 = vmatprep.subr.bf16.mxu1 %v3111_v63  ;;  %v3138_v63 = vpack.c.bf16 %v1895_v60, %v1894_v55  ;;  %v3141_v3 = vpack.c.bf16 %v1897_v2, %v1896_v1 }
 0x134   :  { %v898_v19 = vadd.f32 %v2064_v9, %v828_v17  ;;  %3082 = vmatpush3.bf16.msra.mxu0 %v3081_v7 }
 0x135   :  { %3084 = vmatprep.subr.bf16.mxu0 %v3083_v14 }
 0x136   :  { %3114 = vmatpush3.bf16.msra.mxu1 %v3113_v10 }
 0x137   :  { %3116 = vmatprep.subr.bf16.mxu1 %v3115_v11 }
 0x138   :  { %3086 = vmatpush3.bf16.msra.mxu0 %v3085_v20 }
 0x139   :  { %3119 = vmatprep.subr.bf16.mxu0 %v3261_v39 }
 0x13a   :  { %3118 = vmatpush3.bf16.msra.mxu1 %v3117_v21 }
 0x13b   :  { %1806 = vmatmul.mubr.f32.vlgmr.msra.gmra.mrb[14].mxu0 %v3437_v51  ;;  %v1882_v51 = vld [vmem:[%s3513_s3] sm:$0xff] }
 0x13c   :  { %2604 = vmatprep.mubr.msk.f32.mxu0 %vm3262_vm0, %v3263_v5 }
 0x13d   :  { %1876 = vmatmul.mubr.f32.vlgmr.msra.gmra.mrb[14].mxu1 %v3440_v56  ;;  %v1883_v56 = vld [vmem:[%s3513_s3 + $0x8] sm:$0xff]  ;;  %s3264_s3 = smov [#allocation8]  }
 0x13e   :  { %v3120_v40 = vpack.c.bf16 %v1883_v56, %v1882_v51  ;;  %s1983_s23 = sshll.u32 %s3264_s3, 4  ;;  %s1984_s23 = int_to_ptr.vmem [resolvable:$true] %s1983_s23 }
 0x13f   :  { %s3227_s24 = scalar_lea.vmem %s1984_s23, 32  ;;  %p3232_p11 = scmp.lt.s32.totalorder %s1984_s23, %s1984_s23 }
 0x140   :  { %3121 = vmatpush3.bf16.msra.mxu0 %v3120_v40  ;;  %p3228_p10 = scmp.ne.s32.totalorder %s1984_s23, %s3227_s24  ;;  %p3233_p12 = scmp.lt.s32.totalorder %s3227_s24, %s3227_s24 }
 0x141   :  { %3122 = vmatprep.subr.bf16.mxu0 %v3261_v39 }
 0x142   :  { %p3234_p13 = por %p3233_p12, %p3232_p11 }
 0x144   :  { %3124 = vmatpush3.bf16.msra.mxu0 %v3123_v41  ;;  %p3235_p0 = pnand %p3234_p13, %p3228_p10 }
 0x145   :  { %3125 = vmatprep.subr.bf16.mxu0 %v3261_v39 }
 0x148   :  { %3127 = vmatpush3.bf16.msra.mxu0 %v3126_v44 }
 0x149   :  { %3128 = vmatprep.subr.bf16.mxu0 %v3261_v39 }
 0x14c   :  { %3130 = vmatpush3.bf16.msra.mxu0 %v3129_v48 }
 0x14d   :  { %3131 = vmatprep.subr.bf16.mxu0 %v3261_v39 }
 0x14e   :  { %v2097_v15 = vpop.f32.mrb[2].mxu0 }
 0x14f   :  { %v2098_v22 = vpop.f32.mrb[3].mxu0 }
 0x150   :  { %v2132_v23 = vpop.f32.mrb[2].mxu1  ;;  %v2099_v24 = vadd.f32 %v2098_v22, %v2097_v15  ;;  %3133 = vmatpush3.bf16.msra.mxu0 %v3132_v53 }
 0x151   :  { %v2133_v25 = vpop.f32.mrb[3].mxu1  ;;  %3134 = vmatprep.subr.bf16.mxu0 %v3261_v39 }
 0x152   :  { %v2134_v26 = vadd.f32 %v2133_v25, %v2132_v23  ;;  %v968_v27 = vadd.f32 %v2099_v24, %v898_v19 }
 0x154   :  { %v1038_v28 = vadd.f32 %v2134_v26, %v968_v27  ;;  %3136 = vmatpush3.bf16.msra.mxu0 %v3135_v33 }
 0x155   :  { %3137 = vmatprep.subr.bf16.mxu0 %v3261_v39 }
 0x158   :  { %3139 = vmatpush3.bf16.msra.mxu0 %v3138_v63 }
 0x159   :  { %3140 = vmatprep.subr.bf16.mxu0 %v3261_v39  ;;  %v1994_v39 = vld [vmem:[#allocation7] ss:$0 sm:$0xff] }
 0x15c   :  { %3142 = vmatpush3.bf16.msra.mxu0 %v3141_v3 }
 0x16e   :  { %v2167_v29 = vpop.f32.mrb[4].mxu0 }
 0x16f   :  { %v2168_v30 = vpop.f32.mrb[5].mxu0 }
 0x170   :  { %v2202_v32 = vpop.f32.mrb[4].mxu1  ;;  %v2169_v34 = vadd.f32 %v2168_v30, %v2167_v29 }
 0x171   :  { %v2203_v36 = vpop.f32.mrb[5].mxu1 }
 0x172   :  { %v2204_v37 = vadd.f32 %v2203_v36, %v2202_v32  ;;  %v1108_v31 = vadd.f32 %v2169_v34, %v1038_v28 }
 0x174   :  { %v1178_v38 = vadd.f32 %v2204_v37, %v1108_v31 }
 0x18e   :  { %v2237_v59 = vpop.f32.mrb[6].mxu0 }
 0x18f   :  { %v2238_v61 = vpop.f32.mrb[7].mxu0 }
 0x190   :  { %v2272_v62 = vpop.f32.mrb[6].mxu1  ;;  %v2239_v58 = vadd.f32 %v2238_v61, %v2237_v59 }
 0x191   :  { %v2273_v0 = vpop.f32.mrb[7].mxu1 }
 0x192   :  { %v2274_v45 = vadd.f32 %v2273_v0, %v2272_v62  ;;  %v1248_v13 = vadd.f32 %v2239_v58, %v1178_v38 }
 0x194   :  { %v1318_v4 = vadd.f32 %v2274_v45, %v1248_v13 }
 0x1ae   :  { %v2307_v6 = vpop.f32.mrb[8].mxu0 }
 0x1af   :  { %v2308_v7 = vpop.f32.mrb[9].mxu0 }
 0x1b0   :  { %v2342_v9 = vpop.f32.mrb[8].mxu1  ;;  %v2309_v10 = vadd.f32 %v2308_v7, %v2307_v6 }
 0x1b1   :  { %v2343_v14 = vpop.f32.mrb[9].mxu1 }
 0x1b2   :  { %v2344_v8 = vadd.f32 %v2343_v14, %v2342_v9  ;;  %v1388_v16 = vadd.f32 %v2309_v10, %v1318_v4 }
 0x1b4   :  { %v1458_v17 = vadd.f32 %v2344_v8, %v1388_v16 }
 0x1ce   :  { %v2377_v11 = vpop.f32.mrb[10].mxu0 }
 0x1cf   :  { %v2378_v18 = vpop.f32.mrb[11].mxu0 }
 0x1d0   :  { %v2412_v12 = vpop.f32.mrb[10].mxu1  ;;  %v2379_v19 = vadd.f32 %v2378_v18, %v2377_v11 }
 0x1d1   :  { %v2413_v20 = vpop.f32.mrb[11].mxu1 }
 0x1d2   :  { %v2414_v21 = vadd.f32 %v2413_v20, %v2412_v12  ;;  %v1528_v15 = vadd.f32 %v2379_v19, %v1458_v17 }
 0x1d4   :  { %v1598_v22 = vadd.f32 %v2414_v21, %v1528_v15 }
 0x1ee   :  { %v2447_v23 = vpop.f32.mrb[12].mxu0 }
 0x1ef   :  { %v2448_v24 = vpop.f32.mrb[13].mxu0 }
 0x1f0   :  { %v2482_v25 = vpop.f32.mrb[12].mxu1  ;;  %v2449_v26 = vadd.f32 %v2448_v24, %v2447_v23 }
 0x1f1   :  { %v2483_v27 = vpop.f32.mrb[13].mxu1 }
 0x1f2   :  { %v2484_v28 = vadd.f32 %v2483_v27, %v2482_v25  ;;  %v1668_v29 = vadd.f32 %v2449_v26, %v1598_v22 }
 0x1f4   :  { %v1738_v30 = vadd.f32 %v2484_v28, %v1668_v29 }
 0x20e   :  { %v2517_v32 = vpop.f32.mrb[14].mxu0 }
 0x20f   :  { %v2518_v34 = vpop.f32.mrb[15].mxu0 }
 0x210   :  { %v2552_v36 = vpop.f32.mrb[14].mxu1  ;;  %v2519_v37 = vadd.f32 %v2518_v34, %v2517_v32 }
 0x211   :  { %v2553_v31 = vpop.f32.mrb[15].mxu1 }
 0x212   :  { %v2554_v38 = vadd.f32 %v2553_v31, %v2552_v36  ;;  %v1808_v51 = vadd.f32 %v2519_v37, %v1738_v30 }
 0x214   :  { %v1878_v56 = vadd.f32 %v2554_v38, %v1808_v51 }
 0x216   :  { %v1881_v42 = vmax.f32 %v1878_v56, 0.0 }
 0x218   :  { %2605 = vmatmul.mubr.f32.vlgmr.msra.gmra.mrb[16].mxu0 %v1881_v42 }
 0x2eb   :  { %v1971_v40 = vpop.f32.mrb[16].mxu0 }
 0x2ec   :  { %v1972_v35 = vadd.f32 %v1994_v39, %v1971_v40  ;;  %v2606_v41 = vpop.f32.mrb[17].mxu0 }
 0x2ee   :  { %1976 = vst.msk [vmem:[#allocation8] sm:$0x3] %vm1975_vm1, %v1972_v35 }
 0x2ef   :  { %3238 = shalt.err (!%p3235_p0)
}
 0x2f0   :  { %s3239_s27 = scalar_lea.hbm %s3515_s5, 32 }
 0x2f1   :  { %p3240_p1 = scmp.ne.s32.totalorder %s3515_s5, %s3239_s27  ;;  %p3243_p2 = scmp.lt.u32.totalorder %s3239_s27, %s3515_s5 }
 0x2f3   :  { %p3245_p3 = pnand %p3243_p2, %p3240_p1 }
 0x2f5   :  { %3248 = shalt.err (!%p3245_p3)
}
 0x2f6   :  { %1986 = dma.vmem_to_hbm [thread:$0]  %s1984_s23, 32, %s3515_s5, [#allocation4]  }
 0x2f7   :  { %3253 = dma.done.wait [#allocation4], 32  }
 0x2f8   :  { %3254 = vsyncadd [#allocation4], 4294967264 }
 0x2f9   :  { %1990 = vsyncpa [#allocation3], 1 }
 0x2fa   :  { %1991 = vsyncpa [#allocation6], 1 }
 0x2fb   :  { %1992 = vsyncpa [#allocation4], 1 }

</bundles_post_ra>
